<compile_context>
chip_gen: v7x
topology: tpu7x:2x2x1
jax: 0.10.0
libtpu: 0.0.40
codegen_flags: <defaults>
</compile_context>

<pallas_src>
import numpy as np
import jax
import jax.numpy as jnp
from jax import lax
from jax.experimental import pallas as pl
from jax.experimental.pallas import tpu as pltpu


# ----------------------------------------------------------------------------
# generation-aware VMEM budget
# ----------------------------------------------------------------------------
def _vmem_limit_bytes():
    cap = None
    try:
        cap = getattr(pltpu.get_tpu_info(), "vmem_capacity_bytes", None)
    except Exception:
        cap = None
    if not cap:
        cap = 64 * 1024 * 1024          # conservative: v7x per-TensorCore VMEM
    return int(min(cap * 3 // 4, 100 * 1024 * 1024))


VMEM_LIMIT = _vmem_limit_bytes()


# ----------------------------------------------------------------------------
# deterministic parameter construction (numpy, mirrors the torch module setup)
# ----------------------------------------------------------------------------
def waveconvparam(bin_resolution, virtual_wavelength, cycles):
    c = 3e8
    s_z = bin_resolution * c
    samples = int(round(cycles * virtual_wavelength / (bin_resolution * c)))
    num_cycles = samples * s_z / virtual_wavelength
    num_samples = samples
    grids_k = np.arange(num_samples, dtype=np.float32) + 1.0
    sin_wave_k = np.sin(2.0 * np.pi * (num_cycles * grids_k) / num_samples)
    cos_wave_k = np.cos(2.0 * np.pi * (num_cycles * grids_k) / num_samples)
    return cos_wave_k.astype(np.float32), sin_wave_k.astype(np.float32)


def definePsf(sptial_grid, temprol_grid, slope):
    # LCT-style point-spread function on the 2x padded grid, shape (2T, 2S, 2S)
    N = sptial_grid
    M = temprol_grid
    x_2x = np.linspace(-1.0, 1.0, 2 * N)
    y_2y = np.linspace(-1.0, 1.0, 2 * N)
    z_2z = np.linspace(0.0, 2.0, 2 * M)
    gz, gy, gx = np.meshgrid(z_2z, y_2y, x_2x, indexing="ij")
    a = (4.0 * slope) ** 2 * (gx ** 2 + gy ** 2) - gz
    b = np.abs(a)
    cmin = np.min(b, axis=0, keepdims=True)
    d = (np.abs(b - cmin) < 1e-8).astype(np.float64)
    e = d / np.linalg.norm(d.ravel())
    f = np.roll(e, shift=N, axis=1)
    psf = np.roll(f, shift=N, axis=2)
    return psf


def resamplingOperator(temprol_grid):
    M = temprol_grid
    row = M ** 2
    mtx = np.zeros((row, M), dtype=np.float64)
    x = np.arange(1, row + 1, dtype=np.float64)
    cols = (np.ceil(np.sqrt(x)) - 1).astype(np.int64)
    mtx[np.arange(row), cols] = 1.0
    mtx = mtx / np.sqrt(x)[:, None]
    K = int(np.log2(M))
    for _ in range(K):
        mtx = 0.5 * (mtx[0::2, :] + mtx[1::2, :])
    mtxi = mtx.T
    return mtx.astype(np.float32), mtxi.astype(np.float32)


def _round_down_pow2(x):
    return 1 << (max(int(x), 1).bit_length() - 1)


def _matmul_lane_tile(T, N, n_streams):
    """Lane-dense column tile for a (.,T)@(T,N) matmul; power of two dividing N."""
    budget = max(1, VMEM_LIMIT // (2 * n_streams))
    tn = _round_down_pow2(max(1, min(N, budget // (4 * T))))
    return min(N, max(tn, 128))


def _elemwise_time_tile(T2, H2, W2, n_streams):
    slice_bytes = 4 * H2 * W2
    budget = max(1, VMEM_LIMIT // (2 * n_streams))
    return _round_down_pow2(max(1, min(T2, budget // slice_bytes)))


def _axis_segments(pad, small, big):
    """Placement of ifftshift(center_pad(w)) along one even-sized axis.

    Returns [(src_start, dst_start, length)]: small[src:src+len] lands at big[dst:dst+len]."""
    s0 = (pad + big // 2) % big
    first = min(small, big - s0)
    segs = []
    if first > 0:
        segs.append((0, s0, first))
    if first < small:
        segs.append((first, 0, small - first))
    return segs


# ----------------------------------------------------------------------------
# Pallas kernels
# ----------------------------------------------------------------------------
def _fwd_bmm_kernel(a_ref, b_ref, o_ref):
    # a: (2, T, T) resident cos/sin left matrices; b: (1, T, TN); o: (2, 1, T, TN)
    b = b_ref[0]
    o_ref[0, 0] = jnp.dot(a_ref[0], b, preferred_element_type=jnp.float32)
    o_ref[1, 0] = jnp.dot(a_ref[1], b, preferred_element_type=jnp.float32)


def fwd_wave_resample_pallas(a_2xTxT, x_bdxtxn):
    """out[c, i] = a[c] @ x[i].  a: (2,T,T), x: (BD,T,N) -> (2,BD,T,N).

    Output is produced directly in (2, BD, T, N) layout so no transpose is needed
    downstream.  Left matrices stay VMEM-resident (constant block index)."""
    two, T, T2 = a_2xTxT.shape
    BD, Tb, N = x_bdxtxn.shape
    assert two == 2 and T == T2 == Tb
    TN = _matmul_lane_tile(T, N, 6)
    grid = (BD, N // TN)
    flops = 2 * 2 * BD * T * T * N
    bytes_accessed = 4 * (2 * T * T + BD * T * N + 2 * BD * T * N)
    return pl.pallas_call(
        _fwd_bmm_kernel,
        out_shape=jax.ShapeDtypeStruct((2, BD, T, N), jnp.float32),
        grid=grid,
        in_specs=[pl.BlockSpec((2, T, T), lambda i, j: (0, 0, 0)),
                  pl.BlockSpec((1, T, TN), lambda i, j: (i, 0, j))],
        out_specs=pl.BlockSpec((2, 1, T, TN), lambda i, j: (0, i, 0, j)),
        compiler_params=pltpu.CompilerParams(
            dimension_semantics=("parallel", "parallel"),
            vmem_limit_bytes=VMEM_LIMIT),
        cost_estimate=pl.CostEstimate(flops=flops, transcendentals=0,
                                      bytes_accessed=bytes_accessed),
    )(a_2xTxT, x_bdxtxn)


def _cplx_mul_kernel(dr_ref, di_ref, w1_ref, w2_ref, rr_ref, ri_ref):
    dr = dr_ref[0]
    di = di_ref[0]
    w1 = w1_ref[...]
    w2 = w2_ref[...]
    rr_ref[0] = dr * w1 - di * w2
    ri_ref[0] = dr * w2 + di * w1


def cplx_mul_pallas(dr, di, w1, w2):
    """Frequency-domain complex multiply; dr/di: (B2,2T,2S,2S), w: (2T,2S,2S).

    Grid is (time-tiles outer, batch inner) so the filter block index is constant over
    the inner axis and the PSF stays VMEM-resident across the batch loop."""
    B2, T2, H2, W2 = dr.shape
    tT = _elemwise_time_tile(T2, H2, W2, 6)
    grid = (T2 // tT, B2)
    d_spec = pl.BlockSpec((1, tT, H2, W2), lambda j, i: (i, j, 0, 0))
    w_spec = pl.BlockSpec((tT, H2, W2), lambda j, i: (j, 0, 0))
    out_sd = jax.ShapeDtypeStruct((B2, T2, H2, W2), jnp.float32)
    return pl.pallas_call(
        _cplx_mul_kernel,
        out_shape=(out_sd, out_sd),
        grid=grid,
        in_specs=[d_spec, d_spec, w_spec, w_spec],
        out_specs=(d_spec, d_spec),
        compiler_params=pltpu.CompilerParams(
            dimension_semantics=("parallel", "parallel"),
            vmem_limit_bytes=VMEM_LIMIT),
    )(dr, di, w1, w2)


def _phasor_resample_kernel(l_ref, cr_ref, ci_ref, sr_ref, si_ref, o_ref):
    cr = cr_ref[0]
    ci = ci_ref[0]
    sr = sr_ref[0]
    si = si_ref[0]
    sum_real = cr * cr - ci * ci + sr * sr - si * si
    sum_imag = 2.0 * cr * ci + 2.0 * sr * si
    tmp = (jnp.sqrt(sum_real * sum_real + sum_imag * sum_imag) + sum_real) * 0.5
    phasor = jnp.sqrt(jnp.maximum(tmp, 0.0))
    o_ref[0] = jnp.dot(l_ref[...], phasor, preferred_element_type=jnp.float32)


def phasor_resample_pallas(left, cr, ci, sr, si):
    """Fused phasor-magnitude + inverse temporal resampling.

    left: (M, T) rows of mtxi; cr/ci/sr/si: (BD, T, N) -> out (BD, M, N).
    The (T, TN) phasor block never leaves VMEM; it is contracted on the MXU
    immediately.  Tiled over lane-dense spatial columns."""
    M, T = left.shape
    BD, Tb, N = cr.shape
    assert T == Tb
    TN = _matmul_lane_tile(T, N, 5)
    grid = (BD, N // TN)
    data_spec = pl.BlockSpec((1, T, TN), lambda i, j: (i, 0, j))
    flops = 2 * BD * M * T * N + 12 * BD * T * N
    bytes_accessed = 4 * (M * T + 4 * BD * T * N + BD * M * N)
    return pl.pallas_call(
        _phasor_resample_kernel,
        out_shape=jax.ShapeDtypeStruct((BD, M, N), jnp.float32),
        grid=grid,
        in_specs=[pl.BlockSpec((M, T), lambda i, j: (0, 0)),
                  data_spec, data_spec, data_spec, data_spec],
        out_specs=pl.BlockSpec((1, M, TN), lambda i, j: (i, 0, j)),
        compiler_params=pltpu.CompilerParams(
            dimension_semantics=("parallel", "parallel"),
            vmem_limit_bytes=VMEM_LIMIT),
        cost_estimate=pl.CostEstimate(flops=flops, transcendentals=2 * BD * T * N,
                                      bytes_accessed=bytes_accessed),
    )(left, cr, ci, sr, si)


# ----------------------------------------------------------------------------
# Module
# ----------------------------------------------------------------------------
class TFPFMultiKernelPallas:
    def __init__(self, spatial=256, crop=512, bin_len=0.01, wall_size=2.0,
                 sampling_coeff=5.0, cycles=4):
        self.spatial_grid = spatial
        self.crop = crop
        assert 2 ** int(np.log2(crop)) == crop
        self.bin_len = bin_len
        self.wall_size = wall_size
        self.sampling_coeff = sampling_coeff
        self.cycles = cycles
        self._prepare()
        self._forward_jit = jax.jit(self._forward)

    def _prepare(self):
        c = 3e8
        self.width = self.wall_size / 2.0
        self.bin_resolution = self.bin_len / c
        self.trange = self.crop * c * self.bin_resolution
        self.scale = 2
        self.number_kernel = self.scale ** 3

        T = self.crop
        S = self.spatial_grid

        s_lamda_limit = self.wall_size / (S - 1)
        virtual_wavelength = self.sampling_coeff * (s_lamda_limit * 2)
        self.virtual_wavelength = virtual_wavelength

        cos_k, sin_k = waveconvparam(self.bin_resolution, virtual_wavelength, self.cycles)
        wave_2xk = np.stack([cos_k, sin_k], axis=0)
        wave_inv_2xk = wave_2xk[:, ::-1].copy()       # flipped conv1d weights
        k = wave_inv_2xk.shape[1]
        self.knum = k

        # Band matrices implementing F.conv1d(x, w, padding=k//2) (dropping the first
        # output sample when k is even): out[:, t] = sum_tau x[:, tau] * band[tau, t]
        p = k // 2
        shift = 0 if (k % 2 == 1) else 1
        tau_idx = np.arange(T)[:, None]
        t_idx = np.arange(T)[None, :]
        j = tau_idx - t_idx + p - shift
        valid = (j >= 0) & (j < k)
        jc = np.clip(j, 0, k - 1)
        band_cos = np.where(valid, wave_inv_2xk[0][jc], 0.0).astype(np.float64)
        band_sin = np.where(valid, wave_inv_2xk[1][jc], 0.0).astype(np.float64)

        mtx, mtxi = resamplingOperator(T)
        self.mtxi_MxM = jnp.asarray(mtxi)

        # Fuse wave-conv (band matmul over time) with the temporal resampling:
        #   mtx @ (band^T @ x) == (mtx @ band^T) @ x   (matrix associativity)
        comb_cos = mtx.astype(np.float64) @ band_cos.T
        comb_sin = mtx.astype(np.float64) @ band_sin.T
        self.fwd_2xTxT = jnp.asarray(
            np.stack([comb_cos, comb_sin], axis=0).astype(np.float32))

        slope = self.width / self.trange
        psf = definePsf(S, T, slope)
        fpsf = np.fft.fftn(psf)
        invpsf = np.conjugate(fpsf)
        Tp, Hp, Wp = invpsf.shape                 # (2T, 2S, 2S)
        # One copy only — all number_kernel PSF copies in the reference are identical.
        self.invpsf_real = jnp.asarray(np.real(invpsf).astype(np.float32))
        self.invpsf_imag = jnp.asarray(np.imag(invpsf).astype(np.float32))

        # learnable weights, zero-initialized exactly as in the torch module
        Tw, Hw, Ww = T // self.scale, S // self.scale, S // self.scale
        self.learnanle_w = jnp.zeros((2, self.number_kernel, Tw, Hw, Ww), jnp.float32)

        self.padT = (Tp - Tw) // 2
        self.padH = (Hp - Hw) // 2
        self.padW = (Wp - Ww) // 2
        # ifftshift(pad(w) + fftshift(invpsf)) == ifftshift(pad(w)) + invpsf requires
        # exact symmetric padding on the (even) padded axes.
        assert 2 * self.padT + Tw == Tp
        assert 2 * self.padH + Hw == Hp
        assert 2 * self.padW + Ww == Wp

        # ifftshift(pad(w)) has support only on 8 static corner boxes of the 2x volume.
        segs_t = _axis_segments(self.padT, Tw, Tp)
        segs_h = _axis_segments(self.padH, Hw, Hp)
        segs_w = _axis_segments(self.padW, Ww, Wp)
        self.corner_boxes = [(st, sh, sw) for st in segs_t for sh in segs_h for sw in segs_w]

    def _forward(self, feat_bxdxtxhxw):
        B, D, T, H, W = feat_bxdxtxhxw.shape
        assert H == W
        assert H == self.spatial_grid
        assert T == self.crop
        S = H
        BD = B * D
        nk = self.number_kernel
        N = S * S

        x = feat_bxdxtxhxw.reshape(BD, T, N).astype(jnp.float32)

        # --- (1) virtual wave conv1d + temporal resampling, fused into one Pallas
        #         batched matmul producing (2, BD, T, N) directly (no transpose)
        fused = fwd_wave_resample_pallas(self.fwd_2xTxT, x)
        tmp2 = fused.reshape(2 * BD, T, S, S)                       # contiguous reshape

        # --- (2) zero-pad into the 2x volume and FFT
        datapad = jnp.pad(tmp2, ((0, 0), (0, T), (0, S), (0, S)))   # (2BD, 2T, 2S, 2S)
        # TODO(synk): torch.fft.fftn/ifftn have no Pallas primitive; kept in plain JAX
        # (all-axes transform, matching torch.fft.fftn defaults).
        datafre = jnp.fft.fftn(datapad)
        dfr = jnp.real(datafre)
        dfi = jnp.imag(datafre)

        # --- (3) frequency-domain multiply with the iteration-invariant inverse PSF,
        #         hoisted out of the nk loop (Pallas tiled elementwise kernel, run once)
        base_rr, base_ri = cplx_mul_pallas(dfr, dfi, self.invpsf_real, self.invpsf_imag)

        # --- (4) small datafre corner blocks needed for the learnable-w correction
        corner_df = [(dfr[:, td:td + tl, hd:hd + hl, wd:wd + wl],
                      dfi[:, td:td + tl, hd:hd + hl, wd:wd + wl])
                     for (_, td, tl), (_, hd, hl), (_, wd, wl) in self.corner_boxes]

        def apply_w_correction(w_re, w_im):
            # re = datafre * (invpsf + ifftshift(pad(w))) == base + datafre * ifftshift(pad(w));
            # the second term is nonzero only on the 8 corner boxes.
            rr, ri = base_rr, base_ri
            for box, (drb, dib) in zip(self.corner_boxes, corner_df):
                (ts, td, tl), (hs, hd, hl), (ws, wd, wl) = box
                c1 = w_re[ts:ts + tl, hs:hs + hl, ws:ws + wl]
                c2 = w_im[ts:ts + tl, hs:hs + hl, ws:ws + wl]
                rr = rr.at[:, td:td + tl, hd:hd + hl, wd:wd + wl].add(drb * c1 - dib * c2)
                ri = ri.at[:, td:td + tl, hd:hd + hl, wd:wd + wl].add(drb * c2 + dib * c1)
            return rr, ri

        w_stack = jnp.transpose(self.learnanle_w, (1, 0, 2, 3, 4))   # (nk, 2, Tw, Hw, Ww)
        Tc = T // nk if T % nk == 0 else None

        def one_kernel(w_i, left_i):
            rr, ri = apply_w_correction(w_i[0], w_i[1])
            re = jnp.fft.ifftn(lax.complex(rr, ri))
            volumn = re[:, :T, :S, :S]
            cr = jnp.real(volumn[:BD]).reshape(BD, T, N)
            ci = jnp.imag(volumn[:BD]).reshape(BD, T, N)
            sr = jnp.real(volumn[BD:]).reshape(BD, T, N)
            si = jnp.imag(volumn[BD:]).reshape(BD, T, N)
            # fused phasor magnitude + inverse resampling (Pallas kernel)
            return phasor_resample_pallas(left_i, cr, ci, sr, si)

        if Tc is not None:
            # only row-block i of mtxi contributes to the retained output chunk i
            mtxi_stack = self.mtxi_MxM.reshape(nk, Tc, T)

            def body(carry, xs):
                w_i, left_i = xs
                chunk = one_kernel(w_i, left_i)                     # (BD, Tc, N)
                return carry, chunk.reshape(BD, T // self.scale,
                                            S // self.scale, S // self.scale)

            _, chunks = lax.scan(body, jnp.zeros((), jnp.int32), (w_stack, mtxi_stack))
            results = jnp.transpose(chunks, (1, 0, 2, 3, 4))        # (BD, nk, T/2, S/2, S/2)
        else:
            # fallback (T not divisible by nk): full inverse resampling, then slice
            outs = []
            for i in range(nk):
                full = one_kernel(w_stack[i], self.mtxi_MxM)        # (BD, T, N)
                outs.append(full.reshape(BD, nk, T // self.scale,
                                         S // self.scale, S // self.scale)[:, i])
            results = jnp.stack(outs, axis=1)

        return results.reshape(B, D, self.crop, H, W)

    def forward(self, feat_bxdxtxhxw):
        return self._forward_jit(feat_bxdxtxhxw)


# ----------------------------------------------------------------------------
if __name__ == "__main__":
    spatial = 16
    crop = 16
    model = TFPFMultiKernelPallas(spatial=spatial, crop=crop, bin_len=0.2,
                                  wall_size=2.0, sampling_coeff=2.0, cycles=2)

    key = jax.random.PRNGKey(0)
    B, D = 2, 1
    x = jax.random.uniform(key, (B, D, crop, spatial, spatial), dtype=jnp.float32)

    out = model.forward(x)
    out = jax.block_until_ready(out)
    assert out.shape == (B, D, crop, spatial, spatial)
    assert out.dtype == jnp.float32
    assert bool(jnp.all(jnp.isfinite(out)))
    print("KERNEL_OK")
</pallas_src>

<mosaic_0001>
module attributes {stable_mosaic.version = 11 : i64} {
  func.func @_fwd_bmm_kernel(%arg0: i32, %arg1: i32, %arg2: memref<2x16x16xf32, #tpu.memory_space<vmem>>, %arg3: memref<1x16x256xf32, #tpu.memory_space<vmem>>, %arg4: memref<2x1x16x256xf32, #tpu.memory_space<vmem>>) attributes {dimension_semantics = [#tpu.dimension_semantics<parallel>, #tpu.dimension_semantics<parallel>], iteration_bounds = array<i64: 2, 1>, scalar_prefetch = 0 : i64, scratch_operands = 0 : i64, tpu.core_type = #tpu.core_type<tc>, window_params = [{pipeline_mode = #tpu.pipeline_mode<synchronous>, transform_indices = @transform_0, window_bounds = array<i64: 2, 16, 16>}, {transform_indices = @transform_1, window_bounds = array<i64: 1, 16, 256>}, {transform_indices = @transform_2, window_bounds = array<i64: 2, 1, 16, 256>}]} {
    %c0 = arith.constant 0 : index
    %c0_0 = arith.constant 0 : index
    %c0_1 = arith.constant 0 : index
    %0 = vector.load %arg3[%c0, %c0_0, %c0_1] : memref<1x16x256xf32, #tpu.memory_space<vmem>>, vector<1x16x256xf32>
    %1 = vector.shape_cast %0 : vector<1x16x256xf32> to vector<16x256xf32>
    %c0_2 = arith.constant 0 : index
    %c0_3 = arith.constant 0 : index
    %c0_4 = arith.constant 0 : index
    %2 = vector.load %arg2[%c0_2, %c0_3, %c0_4] : memref<2x16x16xf32, #tpu.memory_space<vmem>>, vector<1x16x16xf32>
    %3 = vector.shape_cast %2 : vector<1x16x16xf32> to vector<16x16xf32>
    %cst = arith.constant dense<0.000000e+00> : vector<16x256xf32>
    %4 = tpu.matmul %3, %1, %cst {dimension_numbers = #tpu.dot_dimension_numbers<[1], [0], [0], [1], [0, 0, 1, 1], [], []>} : vector<16x16xf32>, vector<16x256xf32>, vector<16x256xf32> -> vector<16x256xf32>
    %c0_5 = arith.constant 0 : index
    %c0_6 = arith.constant 0 : index
    %c0_7 = arith.constant 0 : index
    %c0_8 = arith.constant 0 : index
    %5 = vector.load %arg4[%c0_5, %c0_6, %c0_7, %c0_8] : memref<2x1x16x256xf32, #tpu.memory_space<vmem>>, vector<1x1x16x256xf32>
    %6 = vector.shape_cast %5 : vector<1x1x16x256xf32> to vector<16x256xf32>
    %7 = vector.shape_cast %4 : vector<16x256xf32> to vector<1x1x16x256xf32>
    tpu.vector_store %arg4[%c0_5, %c0_6, %c0_7, %c0_8], %7 {strides = array<i32>} : memref<2x1x16x256xf32, #tpu.memory_space<vmem>>, vector<1x1x16x256xf32>,
    %c1 = arith.constant 1 : index
    %c0_9 = arith.constant 0 : index
    %c0_10 = arith.constant 0 : index
    %8 = vector.load %arg2[%c1, %c0_9, %c0_10] : memref<2x16x16xf32, #tpu.memory_space<vmem>>, vector<1x16x16xf32>
    %9 = vector.shape_cast %8 : vector<1x16x16xf32> to vector<16x16xf32>
    %cst_11 = arith.constant dense<0.000000e+00> : vector<16x256xf32>
    %10 = tpu.matmul %9, %1, %cst_11 {dimension_numbers = #tpu.dot_dimension_numbers<[1], [0], [0], [1], [0, 0, 1, 1], [], []>} : vector<16x16xf32>, vector<16x256xf32>, vector<16x256xf32> -> vector<16x256xf32>
    %c1_12 = arith.constant 1 : index
    %c0_13 = arith.constant 0 : index
    %c0_14 = arith.constant 0 : index
    %c0_15 = arith.constant 0 : index
    %11 = vector.load %arg4[%c1_12, %c0_13, %c0_14, %c0_15] : memref<2x1x16x256xf32, #tpu.memory_space<vmem>>, vector<1x1x16x256xf32>
    %12 = vector.shape_cast %11 : vector<1x1x16x256xf32> to vector<16x256xf32>
    %13 = vector.shape_cast %10 : vector<16x256xf32> to vector<1x1x16x256xf32>
    tpu.vector_store %arg4[%c1_12, %c0_13, %c0_14, %c0_15], %13 {strides = array<i32>} : memref<2x1x16x256xf32, #tpu.memory_space<vmem>>, vector<1x1x16x256xf32>,
    return
  }
  func.func @transform_0(%arg0: i32, %arg1: i32) -> (i32, i32, i32) {
    %c0_i32 = arith.constant 0 : i32
    %c0_i32_0 = arith.constant 0 : i32
    %c0_i32_1 = arith.constant 0 : i32
    %c0_i32_2 = arith.constant 0 : i32
    return %c0_i32, %c0_i32_0, %c0_i32_1 : i32, i32, i32
  }
  func.func @transform_1(%arg0: i32, %arg1: i32) -> (i32, i32, i32) {
    %c0_i32 = arith.constant 0 : i32
    %c0_i32_0 = arith.constant 0 : i32
    return %arg0, %c0_i32, %arg1 : i32, i32, i32
  }
  func.func @transform_2(%arg0: i32, %arg1: i32) -> (i32, i32, i32, i32) {
    %c0_i32 = arith.constant 0 : i32
    %c0_i32_0 = arith.constant 0 : i32
    %c0_i32_1 = arith.constant 0 : i32
    return %c0_i32, %arg0, %c0_i32_0, %arg1 : i32, i32, i32, i32
  }
}

module attributes {stable_mosaic.version = 11 : i64} {
  func.func @_cplx_mul_kernel(%arg0: i32, %arg1: i32, %arg2: memref<1x32x32x32xf32, #tpu.memory_space<vmem>>, %arg3: memref<1x32x32x32xf32, #tpu.memory_space<vmem>>, %arg4: memref<32x32x32xf32, #tpu.memory_space<vmem>>, %arg5: memref<32x32x32xf32, #tpu.memory_space<vmem>>, %arg6: memref<1x32x32x32xf32, #tpu.memory_space<vmem>>, %arg7: memref<1x32x32x32xf32, #tpu.memory_space<vmem>>) attributes {dimension_semantics = [#tpu.dimension_semantics<parallel>, #tpu.dimension_semantics<parallel>], iteration_bounds = array<i64: 1, 4>, scalar_prefetch = 0 : i64, scratch_operands = 0 : i64, tpu.core_type = #tpu.core_type<tc>, window_params = [{transform_indices = @transform_0, window_bounds = array<i64: 1, 32, 32, 32>}, {transform_indices = @transform_1, window_bounds = array<i64: 1, 32, 32, 32>}, {transform_indices = @transform_2, window_bounds = array<i64: 32, 32, 32>}, {transform_indices = @transform_3, window_bounds = array<i64: 32, 32, 32>}, {transform_indices = @transform_4, window_bounds = array<i64: 1, 32, 32, 32>}, {transform_indices = @transform_5, window_bounds = array<i64: 1, 32, 32, 32>}]} {
    %c0 = arith.constant 0 : index
    %c0_0 = arith.constant 0 : index
    %c0_1 = arith.constant 0 : index
    %c0_2 = arith.constant 0 : index
    %0 = vector.load %arg2[%c0, %c0_0, %c0_1, %c0_2] : memref<1x32x32x32xf32, #tpu.memory_space<vmem>>, vector<1x32x32x32xf32>
    %1 = vector.shape_cast %0 : vector<1x32x32x32xf32> to vector<32x32x32xf32>
    %c0_3 = arith.constant 0 : index
    %c0_4 = arith.constant 0 : index
    %c0_5 = arith.constant 0 : index
    %c0_6 = arith.constant 0 : index
    %2 = vector.load %arg3[%c0_3, %c0_4, %c0_5, %c0_6] : memref<1x32x32x32xf32, #tpu.memory_space<vmem>>, vector<1x32x32x32xf32>
    %3 = vector.shape_cast %2 : vector<1x32x32x32xf32> to vector<32x32x32xf32>
    %c0_7 = arith.constant 0 : index
    %c0_8 = arith.constant 0 : index
    %c0_9 = arith.constant 0 : index
    %4 = vector.load %arg4[%c0_7, %c0_8, %c0_9] : memref<32x32x32xf32, #tpu.memory_space<vmem>>, vector<32x32x32xf32>
    %c0_10 = arith.constant 0 : index
    %c0_11 = arith.constant 0 : index
    %c0_12 = arith.constant 0 : index
    %5 = vector.load %arg5[%c0_10, %c0_11, %c0_12] : memref<32x32x32xf32, #tpu.memory_space<vmem>>, vector<32x32x32xf32>
    %6 = arith.mulf %1, %4 : vector<32x32x32xf32>
    %7 = arith.mulf %3, %5 : vector<32x32x32xf32>
    %8 = arith.subf %6, %7 : vector<32x32x32xf32>
    %c0_13 = arith.constant 0 : index
    %c0_14 = arith.constant 0 : index
    %c0_15 = arith.constant 0 : index
    %c0_16 = arith.constant 0 : index
    %9 = vector.load %arg6[%c0_13, %c0_14, %c0_15, %c0_16] : memref<1x32x32x32xf32, #tpu.memory_space<vmem>>, vector<1x32x32x32xf32>
    %10 = vector.shape_cast %9 : vector<1x32x32x32xf32> to vector<32x32x32xf32>
    %11 = vector.shape_cast %8 : vector<32x32x32xf32> to vector<1x32x32x32xf32>
    tpu.vector_store %arg6[%c0_13, %c0_14, %c0_15, %c0_16], %11 {strides = array<i32>} : memref<1x32x32x32xf32, #tpu.memory_space<vmem>>, vector<1x32x32x32xf32>,
    %12 = arith.mulf %1, %5 : vector<32x32x32xf32>
    %13 = arith.mulf %3, %4 : vector<32x32x32xf32>
    %14 = arith.addf %12, %13 : vector<32x32x32xf32>
    %c0_17 = arith.constant 0 : index
    %c0_18 = arith.constant 0 : index
    %c0_19 = arith.constant 0 : index
    %c0_20 = arith.constant 0 : index
    %15 = vector.load %arg7[%c0_17, %c0_18, %c0_19, %c0_20] : memref<1x32x32x32xf32, #tpu.memory_space<vmem>>, vector<1x32x32x32xf32>
    %16 = vector.shape_cast %15 : vector<1x32x32x32xf32> to vector<32x32x32xf32>
    %17 = vector.shape_cast %14 : vector<32x32x32xf32> to vector<1x32x32x32xf32>
    tpu.vector_store %arg7[%c0_17, %c0_18, %c0_19, %c0_20], %17 {strides = array<i32>} : memref<1x32x32x32xf32, #tpu.memory_space<vmem>>, vector<1x32x32x32xf32>,
    return
  }
  func.func @transform_0(%arg0: i32, %arg1: i32) -> (i32, i32, i32, i32) {
    %c0_i32 = arith.constant 0 : i32
    %c0_i32_0 = arith.constant 0 : i32
    %c0_i32_1 = arith.constant 0 : i32
    return %arg1, %arg0, %c0_i32, %c0_i32_0 : i32, i32, i32, i32
  }
  func.func @transform_1(%arg0: i32, %arg1: i32) -> (i32, i32, i32, i32) {
    %c0_i32 = arith.constant 0 : i32
    %c0_i32_0 = arith.constant 0 : i32
    %c0_i32_1 = arith.constant 0 : i32
    return %arg1, %arg0, %c0_i32, %c0_i32_0 : i32, i32, i32, i32
  }
  func.func @transform_2(%arg0: i32, %arg1: i32) -> (i32, i32, i32) {
    %c0_i32 = arith.constant 0 : i32
    %c0_i32_0 = arith.constant 0 : i32
    %c0_i32_1 = arith.constant 0 : i32
    return %arg0, %c0_i32, %c0_i32_0 : i32, i32, i32
  }
  func.func @transform_3(%arg0: i32, %arg1: i32) -> (i32, i32, i32) {
    %c0_i32 = arith.constant 0 : i32
    %c0_i32_0 = arith.constant 0 : i32
    %c0_i32_1 = arith.constant 0 : i32
    return %arg0, %c0_i32, %c0_i32_0 : i32, i32, i32
  }
  func.func @transform_4(%arg0: i32, %arg1: i32) -> (i32, i32, i32, i32) {
    %c0_i32 = arith.constant 0 : i32
    %c0_i32_0 = arith.constant 0 : i32
    %c0_i32_1 = arith.constant 0 : i32
    return %arg1, %arg0, %c0_i32, %c0_i32_0 : i32, i32, i32, i32
  }
  func.func @transform_5(%arg0: i32, %arg1: i32) -> (i32, i32, i32, i32) {
    %c0_i32 = arith.constant 0 : i32
    %c0_i32_0 = arith.constant 0 : i32
    %c0_i32_1 = arith.constant 0 : i32
    return %arg1, %arg0, %c0_i32, %c0_i32_0 : i32, i32, i32, i32
  }
}

module attributes {stable_mosaic.version = 11 : i64} {
  func.func @_phasor_resample_kernel(%arg0: i32, %arg1: i32, %arg2: memref<2x16xf32, #tpu.memory_space<vmem>>, %arg3: memref<1x16x256xf32, #tpu.memory_space<vmem>>, %arg4: memref<1x16x256xf32, #tpu.memory_space<vmem>>, %arg5: memref<1x16x256xf32, #tpu.memory_space<vmem>>, %arg6: memref<1x16x256xf32, #tpu.memory_space<vmem>>, %arg7: memref<1x2x256xf32, #tpu.memory_space<vmem>>) attributes {dimension_semantics = [#tpu.dimension_semantics<parallel>, #tpu.dimension_semantics<parallel>], iteration_bounds = array<i64: 2, 1>, scalar_prefetch = 0 : i64, scratch_operands = 0 : i64, tpu.core_type = #tpu.core_type<tc>, window_params = [{pipeline_mode = #tpu.pipeline_mode<synchronous>, transform_indices = @transform_0, window_bounds = array<i64: 2, 16>}, {transform_indices = @transform_1, window_bounds = array<i64: 1, 16, 256>}, {transform_indices = @transform_2, window_bounds = array<i64: 1, 16, 256>}, {transform_indices = @transform_3, window_bounds = array<i64: 1, 16, 256>}, {transform_indices = @transform_4, window_bounds = array<i64: 1, 16, 256>}, {transform_indices = @transform_5, window_bounds = array<i64: 1, 2, 256>}]} {
    %c0 = arith.constant 0 : index
    %c0_0 = arith.constant 0 : index
    %c0_1 = arith.constant 0 : index
    %0 = vector.load %arg3[%c0, %c0_0, %c0_1] : memref<1x16x256xf32, #tpu.memory_space<vmem>>, vector<1x16x256xf32>
    %1 = vector.shape_cast %0 : vector<1x16x256xf32> to vector<16x256xf32>
    %c0_2 = arith.constant 0 : index
    %c0_3 = arith.constant 0 : index
    %c0_4 = arith.constant 0 : index
    %2 = vector.load %arg4[%c0_2, %c0_3, %c0_4] : memref<1x16x256xf32, #tpu.memory_space<vmem>>, vector<1x16x256xf32>
    %3 = vector.shape_cast %2 : vector<1x16x256xf32> to vector<16x256xf32>
    %c0_5 = arith.constant 0 : index
    %c0_6 = arith.constant 0 : index
    %c0_7 = arith.constant 0 : index
    %4 = vector.load %arg5[%c0_5, %c0_6, %c0_7] : memref<1x16x256xf32, #tpu.memory_space<vmem>>, vector<1x16x256xf32>
    %5 = vector.shape_cast %4 : vector<1x16x256xf32> to vector<16x256xf32>
    %c0_8 = arith.constant 0 : index
    %c0_9 = arith.constant 0 : index
    %c0_10 = arith.constant 0 : index
    %6 = vector.load %arg6[%c0_8, %c0_9, %c0_10] : memref<1x16x256xf32, #tpu.memory_space<vmem>>, vector<1x16x256xf32>
    %7 = vector.shape_cast %6 : vector<1x16x256xf32> to vector<16x256xf32>
    %8 = arith.mulf %1, %1 : vector<16x256xf32>
    %9 = arith.mulf %3, %3 : vector<16x256xf32>
    %10 = arith.subf %8, %9 : vector<16x256xf32>
    %11 = arith.mulf %5, %5 : vector<16x256xf32>
    %12 = arith.addf %10, %11 : vector<16x256xf32>
    %13 = arith.mulf %7, %7 : vector<16x256xf32>
    %14 = arith.subf %12, %13 : vector<16x256xf32>
    %cst = arith.constant 2.000000e+00 : f32
    %15 = vector.broadcast %cst : f32 to vector<16x256xf32>
    %16 = arith.mulf %15, %1 : vector<16x256xf32>
    %17 = arith.mulf %16, %3 : vector<16x256xf32>
    %cst_11 = arith.constant 2.000000e+00 : f32
    %18 = vector.broadcast %cst_11 : f32 to vector<16x256xf32>
    %19 = arith.mulf %18, %5 : vector<16x256xf32>
    %20 = arith.mulf %19, %7 : vector<16x256xf32>
    %21 = arith.addf %17, %20 : vector<16x256xf32>
    %22 = arith.mulf %14, %14 : vector<16x256xf32>
    %23 = arith.mulf %21, %21 : vector<16x256xf32>
    %24 = arith.addf %22, %23 : vector<16x256xf32>
    %25 = math.sqrt %24 : vector<16x256xf32>
    %26 = arith.addf %25, %14 : vector<16x256xf32>
    %cst_12 = arith.constant 5.000000e-01 : f32
    %27 = vector.broadcast %cst_12 : f32 to vector<16x256xf32>
    %28 = arith.mulf %26, %27 : vector<16x256xf32>
    %cst_13 = arith.constant 0.000000e+00 : f32
    %29 = vector.broadcast %cst_13 : f32 to vector<16x256xf32>
    %30 = arith.maximumf %28, %29 : vector<16x256xf32>
    %31 = math.sqrt %30 : vector<16x256xf32>
    %c0_14 = arith.constant 0 : index
    %c0_15 = arith.constant 0 : index
    %32 = vector.load %arg2[%c0_14, %c0_15] : memref<2x16xf32, #tpu.memory_space<vmem>>, vector<2x16xf32>
    %cst_16 = arith.constant dense<0.000000e+00> : vector<2x256xf32>
    %33 = tpu.matmul %32, %31, %cst_16 {dimension_numbers = #tpu.dot_dimension_numbers<[1], [0], [0], [1], [0, 0, 1, 1], [], []>} : vector<2x16xf32>, vector<16x256xf32>, vector<2x256xf32> -> vector<2x256xf32>
    %c0_17 = arith.constant 0 : index
    %c0_18 = arith.constant 0 : index
    %c0_19 = arith.constant 0 : index
    %34 = vector.load %arg7[%c0_17, %c0_18, %c0_19] : memref<1x2x256xf32, #tpu.memory_space<vmem>>, vector<1x2x256xf32>
    %35 = vector.shape_cast %34 : vector<1x2x256xf32> to vector<2x256xf32>
    %36 = vector.shape_cast %33 : vector<2x256xf32> to vector<1x2x256xf32>
    tpu.vector_store %arg7[%c0_17, %c0_18, %c0_19], %36 {strides = array<i32>} : memref<1x2x256xf32, #tpu.memory_space<vmem>>, vector<1x2x256xf32>,
    return
  }
  func.func @transform_0(%arg0: i32, %arg1: i32) -> (i32, i32) {
    %c0_i32 = arith.constant 0 : i32
    %c0_i32_0 = arith.constant 0 : i32
    %c0_i32_1 = arith.constant 0 : i32
    return %c0_i32, %c0_i32_0 : i32, i32
  }
  func.func @transform_1(%arg0: i32, %arg1: i32) -> (i32, i32, i32) {
    %c0_i32 = arith.constant 0 : i32
    %c0_i32_0 = arith.constant 0 : i32
    return %arg0, %c0_i32, %arg1 : i32, i32, i32
  }
  func.func @transform_2(%arg0: i32, %arg1: i32) -> (i32, i32, i32) {
    %c0_i32 = arith.constant 0 : i32
    %c0_i32_0 = arith.constant 0 : i32
    return %arg0, %c0_i32, %arg1 : i32, i32, i32
  }
  func.func @transform_3(%arg0: i32, %arg1: i32) -> (i32, i32, i32) {
    %c0_i32 = arith.constant 0 : i32
    %c0_i32_0 = arith.constant 0 : i32
    return %arg0, %c0_i32, %arg1 : i32, i32, i32
  }
  func.func @transform_4(%arg0: i32, %arg1: i32) -> (i32, i32, i32) {
    %c0_i32 = arith.constant 0 : i32
    %c0_i32_0 = arith.constant 0 : i32
    return %arg0, %c0_i32, %arg1 : i32, i32, i32
  }
  func.func @transform_5(%arg0: i32, %arg1: i32) -> (i32, i32, i32) {
    %c0_i32 = arith.constant 0 : i32
    %c0_i32_0 = arith.constant 0 : i32
    return %arg0, %c0_i32, %arg1 : i32, i32, i32
  }
}

</mosaic_0001>

<bundles_post_ra>
// kernel: _forward.2
= control target key start
LH: loop header
LB: loop body
LE: loop exit
PB: predicated region body
PF: predicated region fallthrough
CT: control target
= control target key end

     0   :  { %7 = vsyncpa [#allocation3], 0  ;;  %s670_s9 = smov 0   ;;  %s672_s10 = smov 0   ;;  %s796_s0 = inlined_call_operand.hbm [shape: f32[2,16,16], index: 0, kind: input, shape index: {}]   ;;  %s797_s1 = inlined_call_operand.vmem [shape: f32[2,16,256], index: 1, kind: input, shape index: {}]   ;;  %s798_s2 = inlined_call_operand.vmem [shape: f32[2,2,16,256], index: 2, kind: output, shape index: {}]  }
   0x1   :  { %s674_s11 = smov 0   ;;  %s676_s12 = smov 0  }
   0x2   :  { %s678_s13 = smov 0  }
   0x3 LB: > { %s492_s14 = sadd.s32 4294967295, %s649_s13   ;;  %s25_s15 = sadd.s32 1, %s645_s12  ;;  %s649_s13 = sphi %s678_s13, %s13_s13   ;;  %s645_s12 = sphi %s676_s12, %s812_s12   ;;  %s641_s11 = sphi %s674_s11, %s811_s11   ;;  %s637_s10 = sphi %s672_s10, %s810_s10   ;;  %s633_s9 = sphi %s670_s9, %s809_s9  }
   0x4   : > { %p27_p0 = scmp.ge.s32.totalorder %s25_s15, 2  ;;  %s83_s16 = sadd.s32 1, %s637_s10 }
   0x5   : > { %p93_p1 = scmp.ne.s32.totalorder %s637_s10, %s633_s9  ;;  %p94_p2 = scmp.eq.s32.totalorder %s492_s14, 1 }
   0x6   : > { %s814_s15 = smov (%p27_p0, %s25_s15), 0  ;;  %p494_p4 = scmp.ge.s32.totalorder %s649_s13, 1 }
   0x7   : > { %p702_p3 = por %p94_p2, %p93_p1  ;;  %s78_s18 = ssub.s32 %s645_s12, %s814_s15 }
   0x8   : > { %p107_p5 = scmp.lt.s32.totalorder %s649_s13, 3  ;;  %p81_p6 = scmp.eq.s32.totalorder %s78_s18, 0 }
   0x9   : > { %s802_s17 = scalar_select %p702_p3, 1, 0 }
   0xa   : > { %p710_p7 = pnand %p494_p4, %p107_p5  ;;  %p714_p8 = scmp.eq.s32.totalorder %s492_s14, 0 }
   0xb   : > { %s719_s21 = scalar_select %p81_p6, %s637_s10, %s83_s16  }
   0xc   : > { %s803_s19 = scalar_select %p710_p7, 1, 0 }
   0xd   : > { %s804_s20 = scalar_select %p714_p8, 1, 0 }
   0xe   : > { %p529_p9 = pneg %p710_p7  ;;  %s651_s22 = smov [#allocation2]  }
   0xf   : > { %s119_s23 = sshll.u32 %s651_s22, 4  ;;  %s579_s27 = scalar_lea.hbm %s796_s0, 512  ;;  %s120_s23 = int_to_ptr.vmem [resolvable:$true] %s119_s23 }
  0x10   : > { %p725_p10 = pnand %p714_p8, %p529_p9  ;;  %p580_p11 = scmp.ne.s32.totalorder %s796_s0, %s579_s27 }
  0x11   : > { %p586_p1 = scmp.lt.u32.totalorder %s579_s27, %s796_s0 }
  0x12   : > { %p581_p12 = pneg %p725_p10 }
  0x14   : > { %p582_p13 = pnand %p581_p12, %p580_p11 }
  0x16   : > { %p583_p0 = pneg %p582_p13 }
  0x18   : > { %p588_p2 = pnand %p586_p1, %p583_p0 }
  0x1a   : > { %591 = shalt.err (!%p588_p2)
}
  0x1b   : > { %s592_s4 = scalar_lea.vmem %s120_s23, 512  ;;  %p600_p9 = scmp.lt.s32.totalorder %s120_s23, %s120_s23 }
  0x1c   : > { %p593_p4 = scmp.ne.s32.totalorder %s120_s23, %s592_s4  ;;  %p601_p3 = scmp.lt.s32.totalorder %s592_s4, %s592_s4 }
  0x1e   : > { %p595_p5 = pnand %p593_p4, %p581_p12  ;;  %p602_p8 = por %p601_p3, %p600_p9 }
  0x20   : > { %p596_p6 = pneg %p595_p5 }
  0x22   : > { %p603_p7 = pnand %p602_p8, %p596_p6 }
  0x24   : > { %606 = shalt.err (!%p603_p7)
}
  0x25   : > { %s652_s5 = smov 128   ;;  %s653_s6 = smov 8  }
  0x26   : > { %532 = dma.hbm_to_vmem [thread:$0]  (!%p725_p10), %s796_s0, 512, %s120_s23, [#allocation3], %s652_s5, %s652_s5, %s653_s6  }
  0x27   : > { %p806_p11 = scmp.ne.s32.totalorder %s803_s19, 0 }
  0x28   : > { %p807_p13 = scmp.ne.s32.totalorder (!%p806_p11), %s804_s20, 0 }
  0x29   : > { %148 = sbr.rel (%p806_p11) target bundleno = 289 (0x121), region = 28 }
  0x30   : > { %628 = dma.done.wait (%p807_p13), [#allocation3], 512  }
  0x31   : > { %630 = vsyncadd (%p807_p13), [#allocation3], 4294966784  ;;  %p174_p3 = scmp.lt.s32.totalorder %s641_s11, 1  ;;  %v654_v0 = vmov 0.0   ;;  %v188_v7 = vld [vmem:[#allocation2] sm:$0xff]  ;;  %vm190_vm0 = vcmask 130048  }
  0x32   : > { %261 = vmatprep.mubr.f32.mxu0 %v654_v0  ;;  %351 = vmatprep.mubr.f32.mxu1 %v654_v0  ;;  %v279_v8 = vld [vmem:[#allocation2 + $0x10] sm:$0xff]  ;;  %v189_v9 = vld [vmem:[#allocation2 + $0x8] sm:$0xff]  ;;  %v280_v10 = vld [vmem:[#allocation2 + $0x18] sm:$0xff]  ;;  %s170_s19 = sand.u32 1, %s633_s9   ;;  %p808_p7 = scmp.ne.s32.totalorder %s802_s17, 0 }
  0x33   : > { %s175_s14 = scalar_select %p174_p3, %s641_s11, 1 }
  0x34   : > { %s499_s20 = sshll.u32 %s170_s19, 6  ;;  %s516_s9 = sshll.u32 (%p808_p7), %s641_s11, 5 }
  0x35   : > { %s515_s16 = sshll.u32 %s175_s14, 5  ;;  %s757_s24 = scalar_lea.vmem [#allocation4], %s499_s20 }
  0x36   : > { %s181_s23 = scalar_lea.vmem %s797_s1, %s515_s16  ;;  %s380_s27 = scalar_lea.vmem (%p808_p7), %s798_s2, %s516_s9 }
  0x37   : > { %v185_v1 = vld [vmem:[%s181_s23 + $0x8] sm:$0xff]  ;;  %v187_v2 = vld [vmem:[%s181_s23 + $0x18] sm:$0xff]  ;;  %v184_v3 = vld [vmem:[%s181_s23] sm:$0xff] }
  0x38   : > { %v517_v4 = vpack.c.bf16 %v187_v2, %v185_v1  ;;  %v186_v5 = vld [vmem:[%s181_s23 + $0x10] sm:$0xff] }
  0x39   : > { %v519_v6 = vpack.c.bf16 %v186_v5, %v184_v3 }
  0x3a   : > { %518 = vmatprep.subr.bf16.mxu0 %v517_v4  ;;  %522 = vmatprep.subr.bf16.mxu1 %v517_v4 }
  0x3b   : > { %520 = vmatpush1.bf16.msra.mxu0 %v519_v6  ;;  %524 = vmatpush1.bf16.msra.mxu1 %v519_v6 }
  0x3e   : > { %502 = vmatmul.mubr.msk.f32.vlgmr.msra.gmra.mrb[0].mxu0 %vm190_vm0, %v188_v7  ;;  %504 = vmatmul.mubr.msk.f32.vlgmr.msra.gmra.mrb[0].mxu1 %vm190_vm0, %v279_v8 }
  0x3f   : > { %267 = vmatprep.mubr.f32.mxu0 %v654_v0  ;;  %357 = vmatprep.mubr.f32.mxu1 %v654_v0 }
  0x42   : > { %503 = vmatmul.mubr.msk.f32.gmra.mrb[2].mxu0 %vm190_vm0, %v189_v9  ;;  %505 = vmatmul.mubr.msk.f32.gmra.mrb[2].mxu1 %vm190_vm0, %v280_v10 }
 0x111   : > { %v263_v11 = vpop.f32.mrb[0].mxu0  ;;  %v353_v12 = vpop.f32.mrb[0].mxu1  ;;  %375 = sbr.rel (!%p808_p7) target bundleno = 289 (0x121), region = 36 }
 0x112   : > { %274 = vst [vmem:[%s757_s24] sm:$0xff] %v263_v11  ;;  %506 = vst [vmem:[%s757_s24 + $0x20] sm:$0xff] %v353_v12  ;;  %v265_v13 = vpop.f32.mrb[1].mxu0  ;;  %v355_v14 = vpop.f32.mrb[1].mxu1 }
 0x113   : > { %275 = vst [vmem:[%s757_s24 + $0x8] sm:$0xff] %v265_v13  ;;  %507 = vst [vmem:[%s757_s24 + $0x28] sm:$0xff] %v355_v14 }
 0x115   : > { %v269_v15 = vpop.f32.mrb[2].mxu0  ;;  %v359_v16 = vpop.f32.mrb[2].mxu1 }
 0x116   : > { %276 = vst [vmem:[%s757_s24 + $0x10] sm:$0xff] %v269_v15  ;;  %508 = vst [vmem:[%s757_s24 + $0x30] sm:$0xff] %v359_v16  ;;  %v271_v17 = vpop.f32.mrb[3].mxu0  ;;  %v361_v18 = vpop.f32.mrb[3].mxu1 }
 0x117   : > { %277 = vst [vmem:[%s757_s24 + $0x18] sm:$0xff] %v271_v17  ;;  %509 = vst [vmem:[%s757_s24 + $0x38] sm:$0xff] %v361_v18 }
 0x119   : > { %v393_v19 = vld [vmem:[%s757_s24] sm:$0xff] }
 0x11a   : > { %v395_v20 = vld [vmem:[%s757_s24 + $0x8] sm:$0xff]  ;;  %v401_v23 = vld [vmem:[%s757_s24 + $0x20] sm:$0xff]  ;;  %394 = vst [vmem:[%s380_s27] sm:$0xff] %v393_v19 }
 0x11b   : > { %v403_v24 = vld [vmem:[%s757_s24 + $0x28] sm:$0xff]  ;;  %396 = vst [vmem:[%s380_s27 + $0x8] sm:$0xff] %v395_v20  ;;  %402 = vst [vmem:[%s380_s27 + $0x40] sm:$0xff] %v401_v23 }
 0x11c   : > { %404 = vst [vmem:[%s380_s27 + $0x48] sm:$0xff] %v403_v24 }
 0x11d   : > { %v397_v21 = vld [vmem:[%s757_s24 + $0x10] sm:$0xff] }
 0x11e   : > { %v399_v22 = vld [vmem:[%s757_s24 + $0x18] sm:$0xff]  ;;  %398 = vst [vmem:[%s380_s27 + $0x10] sm:$0xff] %v397_v21  ;;  %v405_v25 = vld [vmem:[%s757_s24 + $0x30] sm:$0xff] }
 0x11f   : > { %400 = vst [vmem:[%s380_s27 + $0x18] sm:$0xff] %v399_v22  ;;  %v407_v26 = vld [vmem:[%s757_s24 + $0x38] sm:$0xff]  ;;  %406 = vst [vmem:[%s380_s27 + $0x50] sm:$0xff] %v405_v25 }
 0x120   : > { %408 = vst [vmem:[%s380_s27 + $0x58] sm:$0xff] %v407_v26 }
 0x121 PF: > { %s13_s13 = sadd.s32 1, %s649_s13   ;;  %s809_s9 = smov %s637_s10 }
 0x122   : > { %p10_p8 = scmp.ge.s32.totalorder %s13_s13, 4   ;;  %s810_s10 = smov %s719_s21 }
 0x123   : > { %s811_s11 = smov %s645_s12  ;;  %s812_s12 = smov %s814_s15 }
 0x124   :  { %12 = sbr.rel (!%p10_p8) target bundleno = 3 (0x3), region = 88 }
 0x12b   :  { %424 = vsyncpa [#allocation3], 1 }
 0x12c   :  { %426 = vsyncpa [#allocation3 + $0x1], 1 }

// kernel: _forward.3
= control target key start
LH: loop header
LB: loop body
LE: loop exit
PB: predicated region body
PF: predicated region fallthrough
CT: control target
= control target key end

     0   :  { %s2374_s18 = smov 0   ;;  %s2376_s19 = smov 0   ;;  %s5706_s0 = inlined_call_operand.vmem [shape: f32[4,32,32,32], index: 0, kind: input, shape index: {}]   ;;  %s5707_s1 = inlined_call_operand.vmem [shape: f32[4,32,32,32], index: 1, kind: input, shape index: {}]   ;;  %s5708_s2 = inlined_call_operand.vmem [shape: f32[32,32,32], index: 2, kind: input, shape index: {}]   ;;  %s5709_s3 = inlined_call_operand.vmem [shape: f32[32,32,32], index: 3, kind: input, shape index: {}]   ;;  %s5710_s4 = inlined_call_operand.vmem [shape: f32[4,32,32,32], index: 4, kind: output, shape index: {0}]   ;;  %s5711_s5 = inlined_call_operand.vmem [shape: f32[4,32,32,32], index: 5, kind: output, shape index: {1}]  }
   0x1   :  { %s2378_s20 = smov 0  }
   0x2 LB: > { %s25_s21 = sadd.s32 1, %s2338_s19  ;;  %p2130_p0 = scmp.ge.s32.totalorder %s2342_s20, 1  ;;  %s2342_s20 = sphi %s2378_s20, %s16_s20   ;;  %s2338_s19 = sphi %s2376_s19, %s6403_s19   ;;  %s2334_s18 = sphi %s2374_s18, %s6402_s18  }
   0x3   : > { %p26_p1 = scmp.ge.s32.totalorder %s25_s21, 4  ;;  %p256_p2 = scmp.lt.s32.totalorder %s2342_s20, 5 }
   0x5   : > { %s6405_s21 = smov (%p26_p1, %s25_s21), 0  ;;  %p257_p3 = pnand %p2130_p0, %p256_p2 }
   0x7   : > { %260 = sbr.rel (%p257_p3) target bundleno = 379 (0x17b), region = 36 }
   0xe   : > { %p327_p4 = scmp.lt.s32.totalorder %s2334_s18, 3  ;;  %v2395_v0 = vld [vmem:[%s5708_s2] sm:$0xff]  ;;  %v2405_v2 = vld [vmem:[%s5708_s2 + $0x8] sm:$0xff]  ;;  %v2415_v4 = vld [vmem:[%s5708_s2 + $0x10] sm:$0xff]  ;;  %vm1280_vm0 = vcmask 261120  }
   0xf   : > { %v2400_v1 = vld [vmem:[%s5709_s3] sm:$0xff]  ;;  %v2410_v3 = vld [vmem:[%s5709_s3 + $0x8] sm:$0xff]  ;;  %v2422_v5 = vld [vmem:[%s5709_s3 + $0x10] sm:$0xff] }
  0x10   : > { %s6407_s18 = smov (!%p327_p4, %s2334_s18), 3  ;;  %v2427_v6 = vld [vmem:[%s5708_s2 + $0x18] sm:$0xff]  ;;  %v2449_v8 = vld [vmem:[%s5708_s2 + $0x20] sm:$0xff]  ;;  %v2459_v10 = vld [vmem:[%s5708_s2 + $0x28] sm:$0xff] }
  0x11   : > { %s2417_s7 = sshll.u32 %s6407_s18, 10  ;;  %v2432_v7 = vld [vmem:[%s5709_s3 + $0x18] sm:$0xff]  ;;  %v2454_v9 = vld [vmem:[%s5709_s3 + $0x20] sm:$0xff]  ;;  %v2473_v14 = vld [vmem:[%s5709_s3 + $0x28] sm:$0xff] }
  0x12   : > { %s2438_s16 = scalar_lea.vmem %s5706_s0, %s2417_s7  ;;  %s2444_s22 = scalar_lea.vmem %s5707_s1, %s2417_s7  ;;  %v2478_v15 = vld [vmem:[%s5708_s2 + $0x30] sm:$0xff]  ;;  %v2503_v23 = vld [vmem:[%s5708_s2 + $0x38] sm:$0xff]  ;;  %v2513_v25 = vld [vmem:[%s5708_s2 + $0x40] sm:$0xff] }
  0x13   : > { %v2462_v11 = vld [vmem:[%s2438_s16] sm:$0xff]  ;;  %v2468_v13 = vld [vmem:[%s2438_s16 + $0x8] sm:$0xff]  ;;  %v2483_v16 = vld [vmem:[%s5709_s3 + $0x30] sm:$0xff]  ;;  %s2519_s24 = scalar_lea.vmem %s5710_s4, %s2417_s7  ;;  %s3185_s25 = scalar_lea.vmem %s5711_s5, %s2417_s7 }
  0x14   : > { %v2465_v12 = vld [vmem:[%s2444_s22] sm:$0xff]  ;;  %v896_v17 = vmul.f32 %v2395_v0, %v2462_v11  ;;  %v2490_v19 = vld [vmem:[%s2444_s22 + $0x8] sm:$0xff]  ;;  %v897_v20 = vmul.f32 %v2405_v2, %v2468_v13  ;;  %v2495_v21 = vld [vmem:[%s2438_s16 + $0x10] sm:$0xff] }
  0x15   : > { %v1024_v18 = vmul.f32 %v2400_v1, %v2465_v12  ;;  %v2498_v22 = vld [vmem:[%s2444_s22 + $0x10] sm:$0xff]  ;;  %v2508_v24 = vld [vmem:[%s5709_s3 + $0x38] sm:$0xff]  ;;  %v1025_v26 = vmul.f32 %v2410_v3, %v2490_v19  ;;  %v898_v27 = vmul.f32 %v2415_v4, %v2495_v21  ;;  %v2534_v31 = vld [vmem:[%s2438_s16 + $0x20] sm:$0xff] }
  0x16   : > { %v1026_v28 = vmul.f32 %v2422_v5, %v2498_v22  ;;  %v2528_v29 = vld [vmem:[%s2438_s16 + $0x18] sm:$0xff]  ;;  %v2539_v32 = vld [vmem:[%s5709_s3 + $0x40] sm:$0xff]  ;;  %v900_v37 = vmul.f32 %v2449_v8, %v2534_v31  ;;  %v2551_v38 = vld [vmem:[%s2438_s16 + $0x28] sm:$0xff] }
  0x17   : > { %v2531_v30 = vld [vmem:[%s2444_s22 + $0x18] sm:$0xff]  ;;  %v1152_v33 = vsub.f32 %v896_v17, %v1024_v18  ;;  %v899_v34 = vmul.f32 %v2427_v6, %v2528_v29  ;;  %v2546_v36 = vld [vmem:[%s2444_s22 + $0x20] sm:$0xff]  ;;  %v2554_v39 = vld [vmem:[%s2444_s22 + $0x28] sm:$0xff]  ;;  %v1153_v40 = vsub.f32 %v897_v20, %v1025_v26  ;;  %v901_v43 = vmul.f32 %v2459_v10, %v2551_v38 }
  0x18   : > { %v1027_v35 = vmul.f32 %v2432_v7, %v2531_v30  ;;  %v1154_v41 = vsub.f32 %v898_v27, %v1026_v28  ;;  %v1028_v42 = vmul.f32 %v2454_v9, %v2546_v36  ;;  %v2561_v44 = vld [vmem:[%s2438_s16 + $0x30] sm:$0xff]  ;;  %v2567_v46 = vld [vmem:[%s2438_s16 + $0x38] sm:$0xff]  ;;  %v1029_v48 = vmul.f32 %v2473_v14, %v2554_v39  ;;  %v2581_v52 = vld [vmem:[%s2438_s16 + $0x40] sm:$0xff] }
  0x19   : > { %v2564_v45 = vld [vmem:[%s2444_s22 + $0x30] sm:$0xff]  ;;  %1281 = vst.msk [vmem:[%s2519_s24] sm:$0xff] %vm1280_vm0, %v1152_v33  ;;  %v902_v49 = vmul.f32 %v2478_v15, %v2561_v44  ;;  %v2578_v51 = vld [vmem:[%s2444_s22 + $0x38] sm:$0xff]  ;;  %v2584_v53 = vld [vmem:[%s2444_s22 + $0x40] sm:$0xff]  ;;  %v903_v55 = vmul.f32 %v2503_v23, %v2567_v46  ;;  %v904_v57 = vmul.f32 %v2513_v25, %v2581_v52 }
  0x1a   : > { %v1155_v47 = vsub.f32 %v899_v34, %v1027_v35  ;;  %v1030_v50 = vmul.f32 %v2483_v16, %v2564_v45  ;;  %1282 = vst.msk [vmem:[%s2519_s24 + $0x8] sm:$0xff] %vm1280_vm0, %v1153_v40  ;;  %1283 = vst.msk [vmem:[%s2519_s24 + $0x10] sm:$0xff] %vm1280_vm0, %v1154_v41  ;;  %v1156_v54 = vsub.f32 %v900_v37, %v1028_v42  ;;  %v2597_v58 = vld [vmem:[%s2438_s16 + $0x48] sm:$0xff]  ;;  %v2619_v20 = vld [vmem:[%s2438_s16 + $0x50] sm:$0xff] }
  0x1b   : > { %v1031_v56 = vmul.f32 %v2508_v24, %v2578_v51  ;;  %v2600_v59 = vld [vmem:[%s2444_s22 + $0x48] sm:$0xff]  ;;  %v1157_v61 = vsub.f32 %v901_v43, %v1029_v48  ;;  %v1032_v63 = vmul.f32 %v2539_v32, %v2584_v53  ;;  %v2622_v26 = vld [vmem:[%s2444_s22 + $0x50] sm:$0xff]  ;;  %v2639_v35 = vld [vmem:[%s2438_s16 + $0x58] sm:$0xff] }
  0x1c   : > { %v2605_v60 = vld [vmem:[%s5708_s2 + $0x48] sm:$0xff]  ;;  %1284 = vst.msk [vmem:[%s2519_s24 + $0x18] sm:$0xff] %vm1280_vm0, %v1155_v47  ;;  %v1158_v62 = vsub.f32 %v902_v49, %v1030_v50  ;;  %1285 = vst.msk [vmem:[%s2519_s24 + $0x20] sm:$0xff] %vm1280_vm0, %v1156_v54  ;;  %v2631_v33 = vld [vmem:[%s5708_s2 + $0x50] sm:$0xff] }
  0x1d   : > { %v2614_v17 = vld [vmem:[%s5709_s3 + $0x48] sm:$0xff]  ;;  %v905_v18 = vmul.f32 %v2605_v60, %v2597_v58  ;;  %v1159_v27 = vsub.f32 %v903_v55, %v1031_v56  ;;  %v2636_v34 = vld [vmem:[%s5709_s3 + $0x50] sm:$0xff]  ;;  %1286 = vst.msk [vmem:[%s2519_s24 + $0x28] sm:$0xff] %vm1280_vm0, %v1157_v61  ;;  %v1160_v37 = vsub.f32 %v904_v57, %v1032_v63  ;;  %v906_v40 = vmul.f32 %v2631_v33, %v2619_v20  ;;  %v2650_v42 = vld [vmem:[%s2444_s22 + $0x58] sm:$0xff] }
  0x1e   : > { %v1033_v28 = vmul.f32 %v2614_v17, %v2600_v59  ;;  %1287 = vst.msk [vmem:[%s2519_s24 + $0x30] sm:$0xff] %vm1280_vm0, %v1158_v62  ;;  %v1034_v41 = vmul.f32 %v2636_v34, %v2622_v26  ;;  %v2655_v43 = vld [vmem:[%s5708_s2 + $0x58] sm:$0xff]  ;;  %v2669_v54 = vld [vmem:[%s2438_s16 + $0x60] sm:$0xff]  ;;  %v2689_v63 = vld [vmem:[%s2438_s16 + $0x68] sm:$0xff] }
  0x1f   : > { %v2660_v47 = vld [vmem:[%s5709_s3 + $0x58] sm:$0xff]  ;;  %1288 = vst.msk [vmem:[%s2519_s24 + $0x38] sm:$0xff] %vm1280_vm0, %v1159_v27  ;;  %v907_v49 = vmul.f32 %v2655_v43, %v2639_v35  ;;  %5942 = vst [vmem:[#allocation2_spill] sm:$0xff] %v2669_v54  ;;  %v2672_v55 = vld [vmem:[%s2444_s22 + $0x60] sm:$0xff] }
  0x20   : > { %v1161_v48 = vsub.f32 %v905_v18, %v1033_v28  ;;  %v1035_v50 = vmul.f32 %v2660_v47, %v2650_v42  ;;  %5943 = vst [vmem:[#allocation3_spill] sm:$0xff] %v2672_v55  ;;  %v2677_v56 = vld [vmem:[%s5708_s2 + $0x60] sm:$0xff]  ;;  %1289 = vst.msk [vmem:[%s2519_s24 + $0x40] sm:$0xff] %vm1280_vm0, %v1160_v37  ;;  %v1162_v57 = vsub.f32 %v906_v40, %v1034_v41  ;;  %v2692_v18 = vld [vmem:[%s2444_s22 + $0x68] sm:$0xff] }
  0x21   : > { %5944 = vst [vmem:[#allocation4_spill] sm:$0xff] %v2677_v56  ;;  %v2684_v61 = vld [vmem:[%s5709_s3 + $0x60] sm:$0xff]  ;;  %v908_v62 = vmul.f32 %v2677_v56, %v2669_v54  ;;  %5946 = vst [vmem:[#allocation6_spill] sm:$0xff] %v2689_v63  ;;  %v2701_v37 = vld [vmem:[%s5708_s2 + $0x68] sm:$0xff] }
  0x22   : > { %5945 = vst [vmem:[#allocation5_spill] sm:$0xff] %v2684_v61  ;;  %5947 = vst [vmem:[#allocation7_spill] sm:$0xff] %v2692_v18  ;;  %v1163_v27 = vsub.f32 %v907_v49, %v1035_v50  ;;  %v1036_v28 = vmul.f32 %v2684_v61, %v2672_v55  ;;  %v2706_v40 = vld [vmem:[%s5709_s3 + $0x68] sm:$0xff]  ;;  %v2709_v41 = vld [vmem:[%s2438_s16 + $0x70] sm:$0xff] }
  0x23   : > { %1290 = vst.msk [vmem:[%s2519_s24 + $0x48] sm:$0xff] %vm1280_vm0, %v1161_v48  ;;  %5948 = vst [vmem:[#allocation8_spill] sm:$0xff] %v2701_v37  ;;  %v909_v48 = vmul.f32 %v2701_v37, %v2689_v63  ;;  %v1037_v49 = vmul.f32 %v2706_v40, %v2692_v18  ;;  %v2718_v50 = vld [vmem:[%s2444_s22 + $0x70] sm:$0xff]  ;;  %v2737_v63 = vld [vmem:[%s2438_s16 + $0x78] sm:$0xff] }
  0x24   : > { %5949 = vst [vmem:[#allocation9_spill] sm:$0xff] %v2706_v40  ;;  %5950 = vst [vmem:[#allocation10_spill] sm:$0xff] %v2709_v41  ;;  %v2723_v56 = vld [vmem:[%s5708_s2 + $0x70] sm:$0xff]  ;;  %v1164_v37 = vsub.f32 %v908_v62, %v1036_v28  ;;  %v2740_v55 = vld [vmem:[%s2444_s22 + $0x78] sm:$0xff] }
  0x25   : > { %1291 = vst.msk [vmem:[%s2519_s24 + $0x50] sm:$0xff] %vm1280_vm0, %v1162_v57  ;;  %5951 = vst [vmem:[#allocation11_spill] sm:$0xff] %v2718_v50  ;;  %v2728_v57 = vld [vmem:[%s5709_s3 + $0x70] sm:$0xff]  ;;  %v910_v18 = vmul.f32 %v2723_v56, %v2709_v41  ;;  %v2745_v61 = vld [vmem:[%s5708_s2 + $0x78] sm:$0xff] }
  0x26   : > { %5952 = vst [vmem:[#allocation12_spill] sm:$0xff] %v2723_v56  ;;  %5953 = vst [vmem:[#allocation13_spill] sm:$0xff] %v2728_v57  ;;  %v1038_v40 = vmul.f32 %v2728_v57, %v2718_v50  ;;  %v2750_v62 = vld [vmem:[%s5709_s3 + $0x78] sm:$0xff]  ;;  %v911_v28 = vmul.f32 %v2745_v61, %v2737_v63  ;;  %v2755_v56 = vld [vmem:[%s2438_s16 + $0x80] sm:$0xff] }
  0x27   : > { %1292 = vst.msk [vmem:[%s2519_s24 + $0x58] sm:$0xff] %vm1280_vm0, %v1163_v27  ;;  %5954 = vst [vmem:[#allocation14_spill] sm:$0xff] %v2737_v63  ;;  %v1165_v27 = vsub.f32 %v909_v48, %v1037_v49  ;;  %v2758_v50 = vld [vmem:[%s2444_s22 + $0x80] sm:$0xff]  ;;  %v1039_v48 = vmul.f32 %v2750_v62, %v2740_v55  ;;  %v2775_v63 = vld [vmem:[%s2438_s16 + $0x88] sm:$0xff] }
  0x28   : > { %5955 = vst [vmem:[#allocation15_spill] sm:$0xff] %v2740_v55  ;;  %5956 = vst [vmem:[#allocation16_spill] sm:$0xff] %v2745_v61  ;;  %v1166_v57 = vsub.f32 %v910_v18, %v1038_v40  ;;  %v2767_v49 = vld [vmem:[%s5708_s2 + $0x80] sm:$0xff]  ;;  %v2784_v40 = vld [vmem:[%s2444_s22 + $0x88] sm:$0xff] }
  0x29   : > { %5957 = vst [vmem:[#allocation17_spill] sm:$0xff] %v2750_v62  ;;  %5958 = vst [vmem:[#allocation18_spill] sm:$0xff] %v2755_v56  ;;  %v2772_v61 = vld [vmem:[%s5709_s3 + $0x80] sm:$0xff]  ;;  %v912_v18 = vmul.f32 %v2767_v49, %v2755_v56  ;;  %v2789_v55 = vld [vmem:[%s5708_s2 + $0x88] sm:$0xff] }
  0x2a   : > { %5959 = vst [vmem:[#allocation19_spill] sm:$0xff] %v2758_v50  ;;  %1293 = vst.msk [vmem:[%s2519_s24 + $0x60] sm:$0xff] %vm1280_vm0, %v1164_v37  ;;  %v1040_v37 = vmul.f32 %v2772_v61, %v2758_v50  ;;  %v913_v50 = vmul.f32 %v2789_v55, %v2775_v63  ;;  %v2803_v56 = vld [vmem:[%s2438_s16 + $0x90] sm:$0xff]  ;;  %v3140_v54 = vld [vmem:[%s2444_s22 + $0x108] sm:$0xff] }
  0x2b   : > { %5960 = vst [vmem:[#allocation20_spill] sm:$0xff] %v2767_v49  ;;  %5961 = vst [vmem:[#allocation21_spill] sm:$0xff] %v2772_v61  ;;  %v1167_v49 = vsub.f32 %v911_v28, %v1039_v48  ;;  %v2806_v62 = vld [vmem:[%s2444_s22 + $0x90] sm:$0xff] }
  0x2c   : > { %5962 = vst [vmem:[#allocation22_spill] sm:$0xff] %v2775_v63  ;;  %1294 = vst.msk [vmem:[%s2519_s24 + $0x68] sm:$0xff] %vm1280_vm0, %v1165_v27  ;;  %v2794_v27 = vld [vmem:[%s5709_s3 + $0x88] sm:$0xff]  ;;  %v2811_v41 = vld [vmem:[%s5708_s2 + $0x90] sm:$0xff] }
  0x2d   : > { %5963 = vst [vmem:[#allocation23_spill] sm:$0xff] %v2784_v40  ;;  %5964 = vst [vmem:[#allocation24_spill] sm:$0xff] %v2789_v55  ;;  %v1041_v61 = vmul.f32 %v2794_v27, %v2784_v40  ;;  %v2816_v28 = vld [vmem:[%s5709_s3 + $0x90] sm:$0xff]  ;;  %v914_v48 = vmul.f32 %v2811_v41, %v2803_v56  ;;  %v2821_v55 = vld [vmem:[%s2438_s16 + $0x98] sm:$0xff] }
  0x2e   : > { %5965 = vst [vmem:[#allocation25_spill] sm:$0xff] %v2794_v27  ;;  %1295 = vst.msk [vmem:[%s2519_s24 + $0x70] sm:$0xff] %vm1280_vm0, %v1166_v57  ;;  %v1168_v57 = vsub.f32 %v912_v18, %v1040_v37  ;;  %v2824_v40 = vld [vmem:[%s2444_s22 + $0x98] sm:$0xff]  ;;  %v1042_v18 = vmul.f32 %v2816_v28, %v2806_v62  ;;  %v2877_v63 = vld [vmem:[%s5708_s2 + $0xa8] sm:$0xff] }
  0x2f   : > { %5966 = vst [vmem:[#allocation26_spill] sm:$0xff] %v2803_v56  ;;  %5967 = vst [vmem:[#allocation27_spill] sm:$0xff] %v2806_v62  ;;  %v1169_v27 = vsub.f32 %v913_v50, %v1041_v61  ;;  %v2833_v37 = vld [vmem:[%s5708_s2 + $0x98] sm:$0xff]  ;;  %v2841_v56 = vld [vmem:[%s2438_s16 + $0xa0] sm:$0xff] }
  0x30   : > { %5968 = vst [vmem:[#allocation28_spill] sm:$0xff] %v2811_v41  ;;  %5969 = vst [vmem:[#allocation29_spill] sm:$0xff] %v2816_v28  ;;  %v2838_v41 = vld [vmem:[%s5709_s3 + $0x98] sm:$0xff]  ;;  %v915_v61 = vmul.f32 %v2833_v37, %v2821_v55  ;;  %v2855_v62 = vld [vmem:[%s5708_s2 + $0xa0] sm:$0xff] }
  0x31   : > { %5970 = vst [vmem:[#allocation30_spill] sm:$0xff] %v2821_v55  ;;  %5971 = vst [vmem:[#allocation31_spill] sm:$0xff] %v2824_v40  ;;  %v1043_v50 = vmul.f32 %v2838_v41, %v2824_v40  ;;  %v916_v40 = vmul.f32 %v2855_v62, %v2841_v56  ;;  %v2869_v55 = vld [vmem:[%s2438_s16 + $0xa8] sm:$0xff] }
  0x32   : > { %1296 = vst.msk [vmem:[%s2519_s24 + $0x78] sm:$0xff] %vm1280_vm0, %v1167_v49  ;;  %5972 = vst [vmem:[#allocation32_spill] sm:$0xff] %v2833_v37  ;;  %v2850_v49 = vld [vmem:[%s2444_s22 + $0xa0] sm:$0xff]  ;;  %v1170_v37 = vsub.f32 %v914_v48, %v1042_v18  ;;  %v2872_v28 = vld [vmem:[%s2444_s22 + $0xa8] sm:$0xff]  ;;  %v917_v18 = vmul.f32 %v2877_v63, %v2869_v55 }
  0x33   : > { %5973 = vst [vmem:[#allocation33_spill] sm:$0xff] %v2838_v41  ;;  %5974 = vst [vmem:[#allocation34_spill] sm:$0xff] %v2841_v56  ;;  %v2882_v48 = vld [vmem:[%s5709_s3 + $0xa8] sm:$0xff]  ;;  %v2943_v56 = vld [vmem:[%s5708_s2 + $0xc0] sm:$0xff] }
  0x34   : > { %1297 = vst.msk [vmem:[%s2519_s24 + $0x80] sm:$0xff] %vm1280_vm0, %v1168_v57  ;;  %5975 = vst [vmem:[#allocation35_spill] sm:$0xff] %v2850_v49  ;;  %v2860_v57 = vld [vmem:[%s5709_s3 + $0xa0] sm:$0xff] }
  0x35   : > { %5976 = vst [vmem:[#allocation36_spill] sm:$0xff] %v2855_v62  ;;  %5977 = vst [vmem:[#allocation37_spill] sm:$0xff] %v2860_v57  ;;  %v1044_v41 = vmul.f32 %v2860_v57, %v2850_v49  ;;  %v2887_v62 = vld [vmem:[%s2438_s16 + $0xb0] sm:$0xff] }
  0x36   : > { %1298 = vst.msk [vmem:[%s2519_s24 + $0x88] sm:$0xff] %vm1280_vm0, %v1169_v27  ;;  %5978 = vst [vmem:[#allocation38_spill] sm:$0xff] %v2869_v55  ;;  %v1171_v27 = vsub.f32 %v915_v61, %v1043_v50  ;;  %v2890_v49 = vld [vmem:[%s2444_s22 + $0xb0] sm:$0xff]  ;;  %v1045_v61 = vmul.f32 %v2882_v48, %v2872_v28  ;;  %v2907_v55 = vld [vmem:[%s2438_s16 + $0xb8] sm:$0xff] }
  0x37   : > { %5979 = vst [vmem:[#allocation39_spill] sm:$0xff] %v2872_v28  ;;  %5980 = vst [vmem:[#allocation40_spill] sm:$0xff] %v2877_v63  ;;  %v1172_v57 = vsub.f32 %v916_v40, %v1044_v41  ;;  %v2899_v50 = vld [vmem:[%s5708_s2 + $0xb0] sm:$0xff]  ;;  %v2921_v28 = vld [vmem:[%s5708_s2 + $0xb8] sm:$0xff] }
  0x38   : > { %5981 = vst [vmem:[#allocation41_spill] sm:$0xff] %v2882_v48  ;;  %5982 = vst [vmem:[#allocation42_spill] sm:$0xff] %v2887_v62  ;;  %v2904_v63 = vld [vmem:[%s5709_s3 + $0xb0] sm:$0xff]  ;;  %v918_v41 = vmul.f32 %v2899_v50, %v2887_v62  ;;  %v2935_v62 = vld [vmem:[%s2438_s16 + $0xc0] sm:$0xff] }
  0x39   : > { %5983 = vst [vmem:[#allocation43_spill] sm:$0xff] %v2890_v49  ;;  %1299 = vst.msk [vmem:[%s2519_s24 + $0x90] sm:$0xff] %vm1280_vm0, %v1170_v37  ;;  %v1046_v40 = vmul.f32 %v2904_v63, %v2890_v49  ;;  %v2916_v37 = vld [vmem:[%s2444_s22 + $0xb8] sm:$0xff]  ;;  %v919_v49 = vmul.f32 %v2921_v28, %v2907_v55  ;;  %v2938_v48 = vld [vmem:[%s2444_s22 + $0xc0] sm:$0xff] }
  0x3a   : > { %5984 = vst [vmem:[#allocation44_spill] sm:$0xff] %v2899_v50  ;;  %5985 = vst [vmem:[#allocation45_spill] sm:$0xff] %v2904_v63  ;;  %v1173_v50 = vsub.f32 %v917_v18, %v1045_v61  ;;  %v2948_v18 = vld [vmem:[%s5709_s3 + $0xc0] sm:$0xff]  ;;  %v920_v61 = vmul.f32 %v2943_v56, %v2935_v62 }
  0x3b   : > { %5986 = vst [vmem:[#allocation46_spill] sm:$0xff] %v2907_v55  ;;  %1300 = vst.msk [vmem:[%s2519_s24 + $0x98] sm:$0xff] %vm1280_vm0, %v1171_v27  ;;  %v2926_v27 = vld [vmem:[%s5709_s3 + $0xb8] sm:$0xff] }
  0x3c   : > { %5987 = vst [vmem:[#allocation47_spill] sm:$0xff] %v2916_v37  ;;  %5988 = vst [vmem:[#allocation48_spill] sm:$0xff] %v2921_v28  ;;  %v1047_v63 = vmul.f32 %v2926_v27, %v2916_v37  ;;  %v2953_v28 = vld [vmem:[%s2438_s16 + $0xc8] sm:$0xff]  ;;  %v3009_v55 = vld [vmem:[%s5708_s2 + $0xd8] sm:$0xff] }
  0x3d   : > { %5989 = vst [vmem:[#allocation49_spill] sm:$0xff] %v2926_v27  ;;  %1301 = vst.msk [vmem:[%s2519_s24 + $0xa0] sm:$0xff] %vm1280_vm0, %v1172_v57  ;;  %v1174_v57 = vsub.f32 %v918_v41, %v1046_v40  ;;  %v2956_v37 = vld [vmem:[%s2444_s22 + $0xc8] sm:$0xff]  ;;  %v1048_v41 = vmul.f32 %v2948_v18, %v2938_v48 }
  0x3e   : > { %5990 = vst [vmem:[#allocation50_spill] sm:$0xff] %v2935_v62  ;;  %5991 = vst [vmem:[#allocation51_spill] sm:$0xff] %v2938_v48  ;;  %v1175_v27 = vsub.f32 %v919_v49, %v1047_v63  ;;  %v2965_v40 = vld [vmem:[%s5708_s2 + $0xc8] sm:$0xff]  ;;  %v2973_v62 = vld [vmem:[%s2438_s16 + $0xd0] sm:$0xff] }
  0x3f   : > { %5992 = vst [vmem:[#allocation52_spill] sm:$0xff] %v2943_v56  ;;  %5993 = vst [vmem:[#allocation53_spill] sm:$0xff] %v2948_v18  ;;  %v2970_v56 = vld [vmem:[%s5709_s3 + $0xc8] sm:$0xff]  ;;  %v921_v63 = vmul.f32 %v2965_v40, %v2953_v28  ;;  %v2987_v48 = vld [vmem:[%s5708_s2 + $0xd0] sm:$0xff] }
  0x40   : > { %5994 = vst [vmem:[#allocation54_spill] sm:$0xff] %v2953_v28  ;;  %5995 = vst [vmem:[#allocation55_spill] sm:$0xff] %v2956_v37  ;;  %v1049_v49 = vmul.f32 %v2970_v56, %v2956_v37  ;;  %v922_v37 = vmul.f32 %v2987_v48, %v2973_v62  ;;  %v3001_v28 = vld [vmem:[%s2438_s16 + $0xd8] sm:$0xff] }
  0x41   : > { %1302 = vst.msk [vmem:[%s2519_s24 + $0xa8] sm:$0xff] %vm1280_vm0, %v1173_v50  ;;  %5996 = vst [vmem:[#allocation56_spill] sm:$0xff] %v2965_v40  ;;  %v2982_v50 = vld [vmem:[%s2444_s22 + $0xd0] sm:$0xff]  ;;  %v1176_v40 = vsub.f32 %v920_v61, %v1048_v41  ;;  %v3004_v18 = vld [vmem:[%s2444_s22 + $0xd8] sm:$0xff]  ;;  %v923_v41 = vmul.f32 %v3009_v55, %v3001_v28 }
  0x42   : > { %5997 = vst [vmem:[#allocation57_spill] sm:$0xff] %v2970_v56  ;;  %5998 = vst [vmem:[#allocation58_spill] sm:$0xff] %v2973_v62  ;;  %v3014_v61 = vld [vmem:[%s5709_s3 + $0xd8] sm:$0xff]  ;;  %v3075_v62 = vld [vmem:[%s5708_s2 + $0xf0] sm:$0xff] }
  0x43   : > { %1303 = vst.msk [vmem:[%s2519_s24 + $0xb0] sm:$0xff] %vm1280_vm0, %v1174_v57  ;;  %5999 = vst [vmem:[#allocation59_spill] sm:$0xff] %v2982_v50  ;;  %v2992_v57 = vld [vmem:[%s5709_s3 + $0xd0] sm:$0xff] }
  0x44   : > { %6000 = vst [vmem:[#allocation60_spill] sm:$0xff] %v2987_v48  ;;  %6001 = vst [vmem:[#allocation61_spill] sm:$0xff] %v2992_v57  ;;  %v1050_v56 = vmul.f32 %v2992_v57, %v2982_v50  ;;  %v3019_v48 = vld [vmem:[%s2438_s16 + $0xe0] sm:$0xff] }
  0x45   : > { %1304 = vst.msk [vmem:[%s2519_s24 + $0xb8] sm:$0xff] %vm1280_vm0, %v1175_v27  ;;  %6002 = vst [vmem:[#allocation62_spill] sm:$0xff] %v3001_v28  ;;  %v1177_v27 = vsub.f32 %v921_v63, %v1049_v49  ;;  %v3022_v50 = vld [vmem:[%s2444_s22 + $0xe0] sm:$0xff]  ;;  %v1051_v63 = vmul.f32 %v3014_v61, %v3004_v18  ;;  %v3039_v28 = vld [vmem:[%s2438_s16 + $0xe8] sm:$0xff] }
  0x46   : > { %6003 = vst [vmem:[#allocation63_spill] sm:$0xff] %v3004_v18  ;;  %6004 = vst [vmem:[#allocation64_spill] sm:$0xff] %v3009_v55  ;;  %v1178_v57 = vsub.f32 %v922_v37, %v1050_v56  ;;  %v3031_v49 = vld [vmem:[%s5708_s2 + $0xe0] sm:$0xff]  ;;  %v3053_v18 = vld [vmem:[%s5708_s2 + $0xe8] sm:$0xff] }
  0x47   : > { %6005 = vst [vmem:[#allocation65_spill] sm:$0xff] %v3014_v61  ;;  %6006 = vst [vmem:[#allocation66_spill] sm:$0xff] %v3019_v48  ;;  %v3036_v55 = vld [vmem:[%s5709_s3 + $0xe0] sm:$0xff]  ;;  %v924_v56 = vmul.f32 %v3031_v49, %v3019_v48  ;;  %v3067_v48 = vld [vmem:[%s2438_s16 + $0xf0] sm:$0xff] }
  0x48   : > { %6007 = vst [vmem:[#allocation67_spill] sm:$0xff] %v3022_v50  ;;  %1305 = vst.msk [vmem:[%s2519_s24 + $0xc0] sm:$0xff] %vm1280_vm0, %v1176_v40  ;;  %v1052_v37 = vmul.f32 %v3036_v55, %v3022_v50  ;;  %v3048_v40 = vld [vmem:[%s2444_s22 + $0xe8] sm:$0xff]  ;;  %v925_v50 = vmul.f32 %v3053_v18, %v3039_v28  ;;  %v3070_v61 = vld [vmem:[%s2444_s22 + $0xf0] sm:$0xff] }
  0x49   : > { %6008 = vst [vmem:[#allocation68_spill] sm:$0xff] %v3031_v49  ;;  %6009 = vst [vmem:[#allocation69_spill] sm:$0xff] %v3036_v55  ;;  %v1179_v49 = vsub.f32 %v923_v41, %v1051_v63  ;;  %v3080_v41 = vld [vmem:[%s5709_s3 + $0xf0] sm:$0xff]  ;;  %v926_v63 = vmul.f32 %v3075_v62, %v3067_v48 }
  0x4a   : > { %6010 = vst [vmem:[#allocation70_spill] sm:$0xff] %v3039_v28  ;;  %1306 = vst.msk [vmem:[%s2519_s24 + $0xc8] sm:$0xff] %vm1280_vm0, %v1177_v27  ;;  %v3058_v27 = vld [vmem:[%s5709_s3 + $0xe8] sm:$0xff]  ;;  %v1054_v28 = vmul.f32 %v3080_v41, %v3070_v61 }
  0x4b   : > { %6011 = vst [vmem:[#allocation71_spill] sm:$0xff] %v3048_v40  ;;  %6012 = vst [vmem:[#allocation72_spill] sm:$0xff] %v3053_v18  ;;  %v1053_v55 = vmul.f32 %v3058_v27, %v3048_v40  ;;  %v3085_v18 = vld [vmem:[%s2438_s16 + $0xf8] sm:$0xff] }
  0x4c   : > { %6013 = vst [vmem:[#allocation73_spill] sm:$0xff] %v3058_v27  ;;  %1307 = vst.msk [vmem:[%s2519_s24 + $0xd0] sm:$0xff] %vm1280_vm0, %v1178_v57  ;;  %v1180_v57 = vsub.f32 %v924_v56, %v1052_v37  ;;  %v3088_v40 = vld [vmem:[%s2444_s22 + $0xf8] sm:$0xff] }
  0x4d   : > { %6014 = vst [vmem:[#allocation74_spill] sm:$0xff] %v3067_v48  ;;  %6015 = vst [vmem:[#allocation75_spill] sm:$0xff] %v3070_v61  ;;  %v1181_v27 = vsub.f32 %v925_v50, %v1053_v55  ;;  %v3097_v56 = vld [vmem:[%s5708_s2 + $0xf8] sm:$0xff]  ;;  %v3119_v61 = vld [vmem:[%s5708_s2 + $0x100] sm:$0xff] }
  0x4e   : > { %6016 = vst [vmem:[#allocation76_spill] sm:$0xff] %v3075_v62  ;;  %6017 = vst [vmem:[#allocation77_spill] sm:$0xff] %v3080_v41  ;;  %v3102_v37 = vld [vmem:[%s5709_s3 + $0xf8] sm:$0xff]  ;;  %v3105_v62 = vld [vmem:[%s2438_s16 + $0x100] sm:$0xff]  ;;  %v927_v55 = vmul.f32 %v3097_v56, %v3085_v18 }
  0x4f   : > { %6018 = vst [vmem:[#allocation78_spill] sm:$0xff] %v3085_v18  ;;  %6019 = vst [vmem:[#allocation79_spill] sm:$0xff] %v3088_v40  ;;  %v1055_v50 = vmul.f32 %v3102_v37, %v3088_v40  ;;  %v3124_v41 = vld [vmem:[%s5709_s3 + $0x100] sm:$0xff]  ;;  %v1182_v40 = vsub.f32 %v926_v63, %v1054_v28  ;;  %v3137_v48 = vld [vmem:[%s2438_s16 + $0x108] sm:$0xff] }
  0x50   : > { %1308 = vst.msk [vmem:[%s2519_s24 + $0xd8] sm:$0xff] %vm1280_vm0, %v1179_v49  ;;  %6020 = vst [vmem:[#allocation80_spill] sm:$0xff] %v3097_v56  ;;  %v3114_v49 = vld [vmem:[%s2444_s22 + $0x100] sm:$0xff]  ;;  %v1537_v56 = vmul.f32 %v2395_v0, %v2465_v12  ;;  %v3145_v0 = vld [vmem:[%s5708_s2 + $0x108] sm:$0xff] }
  0x51   : > { %6021 = vst [vmem:[#allocation81_spill] sm:$0xff] %v3102_v37  ;;  %1309 = vst.msk [vmem:[%s2519_s24 + $0xe0] sm:$0xff] %vm1280_vm0, %v1180_v57  ;;  %v1409_v57 = vmul.f32 %v2400_v1, %v2462_v11  ;;  %v928_v37 = vmul.f32 %v3119_v61, %v3105_v62  ;;  %v1056_v18 = vmul.f32 %v3124_v41, %v3114_v49  ;;  %v3152_v12 = vld [vmem:[%s5709_s3 + $0x108] sm:$0xff]  ;;  %v3160_v63 = vld [vmem:[%s2444_s22 + $0x110] sm:$0xff] }
  0x52   : > { %6022 = vst [vmem:[#allocation82_spill] sm:$0xff] %v3114_v49  ;;  %6023 = vst [vmem:[#allocation83_spill] sm:$0xff] %v3119_v61  ;;  %v1410_v1 = vmul.f32 %v2410_v3, %v2468_v13  ;;  %v1183_v11 = vsub.f32 %v927_v55, %v1055_v50  ;;  %v929_v28 = vmul.f32 %v3145_v0, %v3137_v48  ;;  %v3171_v55 = vld [vmem:[%s5708_s2 + $0x110] sm:$0xff] }
  0x53   : > { %1310 = vst.msk [vmem:[%s2519_s24 + $0xe8] sm:$0xff] %vm1280_vm0, %v1181_v27  ;;  %v3157_v27 = vld [vmem:[%s2438_s16 + $0x110] sm:$0xff]  ;;  %6024 = vst [vmem:[#allocation84_spill] sm:$0xff] %v3160_v63  ;;  %v1665_v61 = vadd.f32 %v1537_v56, %v1409_v57  ;;  %v1538_v49 = vmul.f32 %v2405_v2, %v2490_v19  ;;  %v1184_v3 = vsub.f32 %v928_v37, %v1056_v18  ;;  %v3179_v56 = vld [vmem:[%s2438_s16 + $0x118] sm:$0xff] }
  0x54   : > { %1311 = vst.msk [vmem:[%s2519_s24 + $0xf0] sm:$0xff] %vm1280_vm0, %v1182_v40  ;;  %v1057_v13 = vmul.f32 %v3152_v12, %v3140_v54  ;;  %6025 = vst [vmem:[#allocation85_spill] sm:$0xff] %v3171_v55  ;;  %v3176_v50 = vld [vmem:[%s5709_s3 + $0x110] sm:$0xff]  ;;  %v1411_v2 = vmul.f32 %v2422_v5, %v2495_v21  ;;  %v1539_v19 = vmul.f32 %v2415_v4, %v2498_v22  ;;  %v3198_v37 = vld [vmem:[%s2444_s22 + $0x118] sm:$0xff] }
  0x55   : > { %6026 = vst [vmem:[#allocation86_spill] sm:$0xff] %v3176_v50  ;;  %1312 = vst.msk [vmem:[%s2519_s24 + $0xf8] sm:$0xff] %vm1280_vm0, %v1183_v11  ;;  %v930_v18 = vmul.f32 %v3171_v55, %v3157_v27  ;;  %v1058_v40 = vmul.f32 %v3176_v50, %v3160_v63  ;;  %v3203_v57 = vld [vmem:[%s5708_s2 + $0x118] sm:$0xff]  ;;  %v1666_v5 = vadd.f32 %v1538_v49, %v1410_v1  ;;  %v3221_v63 = vld [vmem:[%s2438_s16 + $0x120] sm:$0xff] }
  0x56   : > { %v3208_v4 = vld [vmem:[%s5709_s3 + $0x118] sm:$0xff]  ;;  %1793 = vst.msk [vmem:[%s3185_s25] sm:$0xff] %vm1280_vm0, %v1665_v61  ;;  %v1412_v21 = vmul.f32 %v2432_v7, %v2528_v29  ;;  %1313 = vst.msk [vmem:[%s2519_s24 + $0x100] sm:$0xff] %vm1280_vm0, %v1184_v3  ;;  %v1185_v22 = vsub.f32 %v929_v28, %v1057_v13  ;;  %v931_v11 = vmul.f32 %v3203_v57, %v3179_v56  ;;  %v3224_v50 = vld [vmem:[%s2444_s22 + $0x120] sm:$0xff] }
  0x57   : > { %v1059_v55 = vmul.f32 %v3208_v4, %v3198_v37  ;;  %v3229_v61 = vld [vmem:[%s5708_s2 + $0x120] sm:$0xff]  ;;  %v1667_v7 = vadd.f32 %v1539_v19, %v1411_v2  ;;  %v1186_v29 = vsub.f32 %v930_v18, %v1058_v40  ;;  %v3239_v28 = vld [vmem:[%s2438_s16 + $0x128] sm:$0xff]  ;;  %1794 = vst.msk [vmem:[%s3185_s25 + $0x8] sm:$0xff] %vm1280_vm0, %v1666_v5  ;;  %v1540_v13 = vmul.f32 %v2427_v6, %v2531_v30  ;;  %v3265_v6 = vld [vmem:[%s2438_s16 + $0x130] sm:$0xff] }
  0x58   : > { %v3234_v49 = vld [vmem:[%s5709_s3 + $0x120] sm:$0xff]  ;;  %v932_v1 = vmul.f32 %v3229_v61, %v3221_v63  ;;  %v3242_v3 = vld [vmem:[%s2444_s22 + $0x128] sm:$0xff]  ;;  %v1413_v2 = vmul.f32 %v2454_v9, %v2534_v31  ;;  %1314 = vst.msk [vmem:[%s2519_s24 + $0x108] sm:$0xff] %vm1280_vm0, %v1185_v22  ;;  %v1541_v9 = vmul.f32 %v2449_v8, %v2546_v36  ;;  %v1414_v30 = vmul.f32 %v2473_v14, %v2551_v38  ;;  %v3280_v22 = vld [vmem:[%s2444_s22 + $0x130] sm:$0xff] }
  0x59   : > { %6027 = vst [vmem:[#allocation87_spill] sm:$0xff] %v3242_v3  ;;  %v1187_v19 = vsub.f32 %v931_v11, %v1059_v55  ;;  %v1060_v18 = vmul.f32 %v3234_v49, %v3224_v50  ;;  %v3257_v40 = vld [vmem:[%s5708_s2 + $0x128] sm:$0xff]  ;;  %1795 = vst.msk [vmem:[%s3185_s25 + $0x10] sm:$0xff] %vm1280_vm0, %v1667_v7  ;;  %v3285_v11 = vld [vmem:[%s5708_s2 + $0x130] sm:$0xff]  ;;  %v1668_v14 = vadd.f32 %v1540_v13, %v1412_v21 }
  0x5a   : > { %6028 = vst [vmem:[#allocation88_spill] sm:$0xff] %v3257_v40  ;;  %v3262_v5 = vld [vmem:[%s5709_s3 + $0x128] sm:$0xff]  ;;  %1315 = vst.msk [vmem:[%s2519_s24 + $0x110] sm:$0xff] %vm1280_vm0, %v1186_v29  ;;  %v933_v31 = vmul.f32 %v3257_v40, %v3239_v28  ;;  %v3290_v8 = vld [vmem:[%s5709_s3 + $0x130] sm:$0xff]  ;;  %v1542_v36 = vmul.f32 %v2459_v10, %v2554_v39  ;;  %v934_v7 = vmul.f32 %v3285_v11, %v3265_v6 }
  0x5b   : > { %v1061_v55 = vmul.f32 %v3262_v5, %v3242_v3  ;;  %6029 = vst [vmem:[#allocation89_spill] sm:$0xff] %v3285_v11  ;;  %1316 = vst.msk [vmem:[%s2519_s24 + $0x118] sm:$0xff] %vm1280_vm0, %v1187_v19  ;;  %v1188_v38 = vsub.f32 %v932_v1, %v1060_v18  ;;  %v1062_v29 = vmul.f32 %v3290_v8, %v3280_v22  ;;  %v3301_v40 = vld [vmem:[%s2438_s16 + $0x138] sm:$0xff]  ;;  %v3319_v19 = vld [vmem:[%s2438_s16 + $0x140] sm:$0xff] }
  0x5c   : > { %v3304_v3 = vld [vmem:[%s2444_s22 + $0x138] sm:$0xff]  ;;  %v1669_v10 = vadd.f32 %v1541_v9, %v1413_v2  ;;  %v3322_v18 = vld [vmem:[%s2444_s22 + $0x140] sm:$0xff]  ;;  %1796 = vst.msk [vmem:[%s3185_s25 + $0x18] sm:$0xff] %vm1280_vm0, %v1668_v14  ;;  %v1670_v11 = vadd.f32 %v1542_v36, %v1414_v30  ;;  %v1415_v2 = vmul.f32 %v2483_v16, %v2561_v44  ;;  %v3343_v14 = vld [vmem:[%s2438_s16 + $0x148] sm:$0xff]  ;;  %v1543_v16 = vmul.f32 %v2478_v15, %v2564_v45 }
  0x5d   : > { %v3309_v21 = vld [vmem:[%s5708_s2 + $0x138] sm:$0xff]  ;;  %v1189_v39 = vsub.f32 %v933_v31, %v1061_v55  ;;  %1317 = vst.msk [vmem:[%s2519_s24 + $0x120] sm:$0xff] %vm1280_vm0, %v1188_v38  ;;  %v1190_v9 = vsub.f32 %v934_v7, %v1062_v29  ;;  %v3335_v55 = vld [vmem:[%s5708_s2 + $0x140] sm:$0xff]  ;;  %v1416_v44 = vmul.f32 %v2508_v24, %v2567_v46  ;;  %v3358_v7 = vld [vmem:[%s2444_s22 + $0x148] sm:$0xff]  ;;  %v1544_v24 = vmul.f32 %v2503_v23, %v2578_v51 }
  0x5e   : > { %v3314_v1 = vld [vmem:[%s5709_s3 + $0x138] sm:$0xff]  ;;  %v935_v13 = vmul.f32 %v3309_v21, %v3301_v40  ;;  %6030 = vst [vmem:[#allocation90_spill] sm:$0xff] %v3335_v55  ;;  %v3340_v30 = vld [vmem:[%s5709_s3 + $0x140] sm:$0xff]  ;;  %1797 = vst.msk [vmem:[%s3185_s25 + $0x20] sm:$0xff] %vm1280_vm0, %v1669_v10  ;;  %v936_v36 = vmul.f32 %v3335_v55, %v3319_v19  ;;  %v1417_v45 = vmul.f32 %v2539_v32, %v2581_v52 }
  0x5f   : > { %v1063_v31 = vmul.f32 %v3314_v1, %v3304_v3  ;;  %1318 = vst.msk [vmem:[%s2519_s24 + $0x128] sm:$0xff] %vm1280_vm0, %v1189_v39  ;;  %v1064_v38 = vmul.f32 %v3340_v30, %v3322_v18  ;;  %6031 = vst [vmem:[#allocation91_spill] sm:$0xff] %v3358_v7  ;;  %v3363_v29 = vld [vmem:[%s5708_s2 + $0x148] sm:$0xff]  ;;  %v3383_v55 = vld [vmem:[%s2438_s16 + $0x150] sm:$0xff]  ;;  %v1671_v32 = vadd.f32 %v1543_v16, %v1415_v2 }
  0x60   : > { %6032 = vst [vmem:[#allocation92_spill] sm:$0xff] %v3363_v29  ;;  %v3368_v15 = vld [vmem:[%s5709_s3 + $0x148] sm:$0xff]  ;;  %1798 = vst.msk [vmem:[%s3185_s25 + $0x28] sm:$0xff] %vm1280_vm0, %v1670_v11  ;;  %v937_v10 = vmul.f32 %v3363_v29, %v3343_v14  ;;  %v3386_v11 = vld [vmem:[%s2444_s22 + $0x150] sm:$0xff]  ;;  %v1672_v29 = vadd.f32 %v1544_v24, %v1416_v44 }
  0x61   : > { %1319 = vst.msk [vmem:[%s2519_s24 + $0x130] sm:$0xff] %vm1280_vm0, %v1190_v9  ;;  %v1191_v46 = vsub.f32 %v935_v13, %v1063_v31  ;;  %v1065_v39 = vmul.f32 %v3368_v15, %v3358_v7  ;;  %v3391_v23 = vld [vmem:[%s5708_s2 + $0x150] sm:$0xff]  ;;  %v1192_v51 = vsub.f32 %v936_v36, %v1064_v38  ;;  %v3401_v9 = vld [vmem:[%s2438_s16 + $0x158] sm:$0xff]  ;;  %v1545_v7 = vmul.f32 %v2513_v25, %v2584_v53  ;;  %v3423_v38 = vld [vmem:[%s2438_s16 + $0x160] sm:$0xff] }
  0x62   : > { %v3396_v52 = vld [vmem:[%s5709_s3 + $0x150] sm:$0xff]  ;;  %v938_v13 = vmul.f32 %v3391_v23, %v3383_v55  ;;  %v3404_v31 = vld [vmem:[%s2444_s22 + $0x158] sm:$0xff]  ;;  %1799 = vst.msk [vmem:[%s3185_s25 + $0x30] sm:$0xff] %vm1280_vm0, %v1671_v32  ;;  %v1418_v25 = vmul.f32 %v2614_v17, %v2597_v58  ;;  %v1546_v53 = vmul.f32 %v2605_v60, %v2600_v59  ;;  %v3448_v58 = vld [vmem:[%s5709_s3 + $0x160] sm:$0xff]  ;;  %v1419_v60 = vmul.f32 %v2636_v34, %v2619_v20 }
  0x63   : > { %6033 = vst [vmem:[#allocation93_spill] sm:$0xff] %v3404_v31  ;;  %1320 = vst.msk [vmem:[%s2519_s24 + $0x138] sm:$0xff] %vm1280_vm0, %v1191_v46  ;;  %v1193_v2 = vsub.f32 %v937_v10, %v1065_v39  ;;  %v1066_v16 = vmul.f32 %v3396_v52, %v3386_v11  ;;  %v3415_v36 = vld [vmem:[%s5708_s2 + $0x158] sm:$0xff]  ;;  %v3438_v10 = vld [vmem:[%s2444_s22 + $0x160] sm:$0xff]  ;;  %v1673_v59 = vadd.f32 %v1545_v7, %v1417_v45 }
  0x64   : > { %6034 = vst [vmem:[#allocation94_spill] sm:$0xff] %v3415_v36  ;;  %v3420_v44 = vld [vmem:[%s5709_s3 + $0x158] sm:$0xff]  ;;  %1321 = vst.msk [vmem:[%s2519_s24 + $0x140] sm:$0xff] %vm1280_vm0, %v1192_v51  ;;  %v939_v24 = vmul.f32 %v3415_v36, %v3401_v9  ;;  %v3443_v39 = vld [vmem:[%s5708_s2 + $0x160] sm:$0xff]  ;;  %v1068_v51 = vmul.f32 %v3448_v58, %v3438_v10  ;;  %v1674_v20 = vadd.f32 %v1546_v53, %v1418_v25 }
  0x65   : > { %v1067_v46 = vmul.f32 %v3420_v44, %v3404_v31  ;;  %6035 = vst [vmem:[#allocation95_spill] sm:$0xff] %v3443_v39  ;;  %1800 = vst.msk [vmem:[%s3185_s25 + $0x38] sm:$0xff] %vm1280_vm0, %v1672_v29  ;;  %v1194_v17 = vsub.f32 %v938_v13, %v1066_v16  ;;  %v940_v32 = vmul.f32 %v3443_v39, %v3423_v38  ;;  %v3461_v36 = vld [vmem:[%s2438_s16 + $0x168] sm:$0xff]  ;;  %v3479_v13 = vld [vmem:[%s2438_s16 + $0x170] sm:$0xff] }
  0x66   : > { %1322 = vst.msk [vmem:[%s2519_s24 + $0x148] sm:$0xff] %vm1280_vm0, %v1193_v2  ;;  %6036 = vst [vmem:[#allocation96_spill] sm:$0xff] %v3461_v36  ;;  %v3464_v31 = vld [vmem:[%s2444_s22 + $0x168] sm:$0xff]  ;;  %v3482_v2 = vld [vmem:[%s2444_s22 + $0x170] sm:$0xff]  ;;  %v1547_v16 = vmul.f32 %v2631_v33, %v2622_v26  ;;  %v1420_v25 = vmul.f32 %v2660_v47, %v2639_v35  ;;  %v1548_v33 = vmul.f32 %v2655_v43, %v2650_v42 }
  0x67   : > { %6037 = vst [vmem:[#allocation97_spill] sm:$0xff] %v3464_v31  ;;  %v3469_v7 = vld [vmem:[%s5708_s2 + $0x168] sm:$0xff]  ;;  %v1195_v34 = vsub.f32 %v939_v24, %v1067_v46  ;;  %6040 = vst [vmem:[#allocation100_spill] sm:$0xff] %v3479_v13  ;;  %v1196_v53 = vsub.f32 %v940_v32, %v1068_v51  ;;  %v3497_v46 = vld [vmem:[%s5708_s2 + $0x170] sm:$0xff] }
  0x68   : > { %6038 = vst [vmem:[#allocation98_spill] sm:$0xff] %v3469_v7  ;;  %v3474_v29 = vld [vmem:[%s5709_s3 + $0x168] sm:$0xff]  ;;  %v941_v45 = vmul.f32 %v3469_v7, %v3461_v36  ;;  %6041 = vst [vmem:[#allocation101_spill] sm:$0xff] %v3482_v2  ;;  %v3505_v26 = vld [vmem:[%s2438_s16 + $0x178] sm:$0xff]  ;;  %v942_v32 = vmul.f32 %v3497_v46, %v3479_v13  ;;  %v1675_v43 = vadd.f32 %v1547_v16, %v1419_v60 }
  0x69   : > { %6039 = vst [vmem:[#allocation99_spill] sm:$0xff] %v3474_v29  ;;  %1801 = vst.msk [vmem:[%s3185_s25 + $0x40] sm:$0xff] %vm1280_vm0, %v1673_v59  ;;  %v1069_v24 = vmul.f32 %v3474_v29, %v3464_v31  ;;  %v3502_v59 = vld [vmem:[%s5709_s3 + $0x170] sm:$0xff]  ;;  %v6045_v35 = vld [vmem:[#allocation2_spill] sm:$0xff]  ;;  %v1676_v16 = vadd.f32 %v1548_v33, %v1420_v25 }
  0x6a   : > { %1323 = vst.msk [vmem:[%s2519_s24 + $0x150] sm:$0xff] %vm1280_vm0, %v1194_v17  ;;  %6042 = vst [vmem:[#allocation102_spill] sm:$0xff] %v3497_v46  ;;  %v6046_v47 = vld [vmem:[#allocation5_spill] sm:$0xff]  ;;  %v1070_v51 = vmul.f32 %v3502_v59, %v3482_v2  ;;  %v3541_v13 = vld [vmem:[%s2438_s16 + $0x180] sm:$0xff] }
  0x6b   : > { %6043 = vst [vmem:[#allocation103_spill] sm:$0xff] %v3502_v59  ;;  %6044 = vst [vmem:[#allocation104_spill] sm:$0xff] %v3505_v26  ;;  %v1421_v17 = vmul.f32 %v6046_v47, %v6045_v35  ;;  %v3520_v7 = vld [vmem:[%s2444_s22 + $0x178] sm:$0xff]  ;;  %v6051_v35 = vld [vmem:[#allocation4_spill] sm:$0xff]  ;;  %v1197_v46 = vsub.f32 %v941_v45, %v1069_v24 }
  0x6c   : > { %1802 = vst.msk [vmem:[%s3185_s25 + $0x48] sm:$0xff] %vm1280_vm0, %v1674_v20  ;;  %1324 = vst.msk [vmem:[%s2519_s24 + $0x158] sm:$0xff] %vm1280_vm0, %v1195_v34  ;;  %v3525_v20 = vld [vmem:[%s5708_s2 + $0x178] sm:$0xff]  ;;  %v6050_v34 = vld [vmem:[#allocation3_spill] sm:$0xff] }
  0x6d   : > { %6047 = vst [vmem:[#allocation2_spill] sm:$0xff] %v3520_v7  ;;  %6048 = vst [vmem:[#allocation5_spill] sm:$0xff] %v3525_v20  ;;  %v3530_v42 = vld [vmem:[%s5709_s3 + $0x178] sm:$0xff]  ;;  %v1549_v47 = vmul.f32 %v6051_v35, %v6050_v34  ;;  %v943_v2 = vmul.f32 %v3525_v20, %v3505_v26  ;;  %v560_v31 = vld [vmem:[%s2444_s22 + $0x180] sm:$0xff]  ;;  %v1198_v34 = vsub.f32 %v942_v32, %v1070_v51 }
  0x6e   : > { %6049 = vst [vmem:[#allocation105_spill] sm:$0xff] %v3530_v42  ;;  %1325 = vst.msk [vmem:[%s2519_s24 + $0x160] sm:$0xff] %vm1280_vm0, %v1196_v53  ;;  %v1071_v59 = vmul.f32 %v3530_v42, %v3520_v7  ;;  %v688_v60 = vld [vmem:[%s5708_s2 + $0x180] sm:$0xff]  ;;  %v433_v24 = vld [vmem:[%s2438_s16 + $0x188] sm:$0xff] }
  0x6f   : > { %6052 = vst [vmem:[#allocation3_spill] sm:$0xff] %v3541_v13  ;;  %v3550_v45 = vld [vmem:[%s5709_s3 + $0x180] sm:$0xff]  ;;  %v944_v53 = vmul.f32 %v688_v60, %v3541_v13  ;;  %v561_v35 = vld [vmem:[%s2444_s22 + $0x188] sm:$0xff]  ;;  %1803 = vst.msk [vmem:[%s3185_s25 + $0x50] sm:$0xff] %vm1280_vm0, %v1675_v43  ;;  %v1677_v20 = vadd.f32 %v1549_v47, %v1421_v17 }
  0x70   : > { %6053 = vst [vmem:[#allocation4_spill] sm:$0xff] %v3550_v45  ;;  %v6054_v7 = vld [vmem:[#allocation6_spill] sm:$0xff]  ;;  %v6055_v42 = vld [vmem:[#allocation9_spill] sm:$0xff]  ;;  %1326 = vst.msk [vmem:[%s2519_s24 + $0x168] sm:$0xff] %vm1280_vm0, %v1197_v46  ;;  %v1199_v25 = vsub.f32 %v943_v2, %v1071_v59  ;;  %v1072_v33 = vmul.f32 %v3550_v45, %v560_v31 }
  0x71   : > { %v1422_v26 = vmul.f32 %v6055_v42, %v6054_v7  ;;  %v689_v32 = vld [vmem:[%s5708_s2 + $0x188] sm:$0xff]  ;;  %v434_v17 = vld [vmem:[%s2438_s16 + $0x190] sm:$0xff]  ;;  %1804 = vst.msk [vmem:[%s3185_s25 + $0x58] sm:$0xff] %vm1280_vm0, %v1676_v16  ;;  %v6059_v2 = vld [vmem:[#allocation10_spill] sm:$0xff] }
  0x72   : > { %v3568_v51 = vld [vmem:[%s5709_s3 + $0x188] sm:$0xff]  ;;  %v6058_v42 = vld [vmem:[#allocation8_spill] sm:$0xff]  ;;  %v6060_v59 = vld [vmem:[#allocation13_spill] sm:$0xff]  ;;  %1327 = vst.msk [vmem:[%s2519_s24 + $0x170] sm:$0xff] %vm1280_vm0, %v1198_v34  ;;  %v945_v43 = vmul.f32 %v689_v32, %v433_v24 }
  0x73   : > { %6056 = vst [vmem:[#allocation6_spill] sm:$0xff] %v3568_v51  ;;  %v6057_v7 = vld [vmem:[#allocation7_spill] sm:$0xff]  ;;  %v1423_v31 = vmul.f32 %v6060_v59, %v6059_v2  ;;  %v1073_v47 = vmul.f32 %v3568_v51, %v561_v35  ;;  %v562_v60 = vld [vmem:[%s2444_s22 + $0x190] sm:$0xff]  ;;  %1805 = vst.msk [vmem:[%s3185_s25 + $0x60] sm:$0xff] %vm1280_vm0, %v1677_v20  ;;  %v1200_v2 = vsub.f32 %v944_v53, %v1072_v33 }
  0x74   : > { %v1550_v46 = vmul.f32 %v6058_v42, %v6057_v7  ;;  %v690_v45 = vld [vmem:[%s5708_s2 + $0x190] sm:$0xff]  ;;  %v6062_v7 = vld [vmem:[#allocation11_spill] sm:$0xff]  ;;  %v6064_v24 = vld [vmem:[#allocation14_spill] sm:$0xff]  ;;  %1328 = vst.msk [vmem:[%s2519_s24 + $0x178] sm:$0xff] %vm1280_vm0, %v1199_v25 }
  0x75   : > { %v3587_v16 = vld [vmem:[%s5709_s3 + $0x190] sm:$0xff]  ;;  %v6065_v32 = vld [vmem:[#allocation17_spill] sm:$0xff]  ;;  %v946_v59 = vmul.f32 %v690_v45, %v434_v17  ;;  %v436_v53 = vld [vmem:[%s2438_s16 + $0x1a0] sm:$0xff]  ;;  %1329 = vst.msk [vmem:[%s2519_s24 + $0x180] sm:$0xff] %vm1280_vm0, %v1200_v2 }
  0x76   : > { %6061 = vst [vmem:[#allocation9_spill] sm:$0xff] %v3587_v16  ;;  %v6063_v42 = vld [vmem:[#allocation12_spill] sm:$0xff]  ;;  %v1424_v35 = vmul.f32 %v6065_v32, %v6064_v24  ;;  %v1074_v51 = vmul.f32 %v3587_v16, %v562_v60  ;;  %v435_v13 = vld [vmem:[%s2438_s16 + $0x198] sm:$0xff]  ;;  %v1678_v36 = vadd.f32 %v1550_v46, %v1422_v26  ;;  %v564_v45 = vld [vmem:[%s2444_s22 + $0x1a0] sm:$0xff] }
  0x77   : > { %v1551_v34 = vmul.f32 %v6063_v42, %v6062_v7  ;;  %v563_v29 = vld [vmem:[%s2444_s22 + $0x198] sm:$0xff]  ;;  %v1201_v7 = vsub.f32 %v945_v43, %v1073_v47  ;;  %v6066_v17 = vld [vmem:[#allocation15_spill] sm:$0xff]  ;;  %v6067_v60 = vld [vmem:[#allocation16_spill] sm:$0xff] }
  0x78   : > { %v691_v20 = vld [vmem:[%s5708_s2 + $0x198] sm:$0xff]  ;;  %v1552_v24 = vmul.f32 %v6067_v60, %v6066_v17  ;;  %v1202_v32 = vsub.f32 %v946_v59, %v1074_v51  ;;  %v692_v26 = vld [vmem:[%s5708_s2 + $0x1a0] sm:$0xff]  ;;  %v437_v46 = vld [vmem:[%s2438_s16 + $0x1a8] sm:$0xff]  ;;  %1806 = vst.msk [vmem:[%s3185_s25 + $0x68] sm:$0xff] %vm1280_vm0, %v1678_v36 }
  0x79   : > { %v819_v42 = vld [vmem:[%s5709_s3 + $0x198] sm:$0xff]  ;;  %v947_v25 = vmul.f32 %v691_v20, %v435_v13  ;;  %v1679_v33 = vadd.f32 %v1551_v34, %v1423_v31  ;;  %v820_v13 = vld [vmem:[%s5709_s3 + $0x1a0] sm:$0xff]  ;;  %v6070_v34 = vld [vmem:[#allocation19_spill] sm:$0xff]  ;;  %1330 = vst.msk [vmem:[%s2519_s24 + $0x188] sm:$0xff] %vm1280_vm0, %v1201_v7  ;;  %v948_v51 = vmul.f32 %v692_v26, %v436_v53 }
  0x7a   : > { %v1075_v16 = vmul.f32 %v819_v42, %v563_v29  ;;  %v6068_v31 = vld [vmem:[#allocation18_spill] sm:$0xff]  ;;  %v6069_v43 = vld [vmem:[#allocation21_spill] sm:$0xff]  ;;  %v6071_v2 = vld [vmem:[#allocation20_spill] sm:$0xff]  ;;  %v1076_v59 = vmul.f32 %v820_v13, %v564_v45  ;;  %v1680_v17 = vadd.f32 %v1552_v24, %v1424_v35  ;;  %1331 = vst.msk [vmem:[%s2519_s24 + $0x190] sm:$0xff] %vm1280_vm0, %v1202_v32 }
  0x7b   : > { %v1425_v47 = vmul.f32 %v6069_v43, %v6068_v31  ;;  %v1553_v29 = vmul.f32 %v6071_v2, %v6070_v34  ;;  %v565_v20 = vld [vmem:[%s2444_s22 + $0x1a8] sm:$0xff]  ;;  %1807 = vst.msk [vmem:[%s3185_s25 + $0x70] sm:$0xff] %vm1280_vm0, %v1679_v33  ;;  %v6072_v60 = vld [vmem:[#allocation22_spill] sm:$0xff]  ;;  %v6073_v31 = vld [vmem:[#allocation25_spill] sm:$0xff] }
  0x7c   : > { %v693_v42 = vld [vmem:[%s5708_s2 + $0x1a8] sm:$0xff]  ;;  %v1426_v7 = vmul.f32 %v6073_v31, %v6072_v60  ;;  %v1203_v53 = vsub.f32 %v947_v25, %v1075_v16  ;;  %v438_v13 = vld [vmem:[%s2438_s16 + $0x1b0] sm:$0xff]  ;;  %v1204_v2 = vsub.f32 %v948_v51, %v1076_v59  ;;  %v439_v32 = vld [vmem:[%s2438_s16 + $0x1b8] sm:$0xff]  ;;  %1808 = vst.msk [vmem:[%s3185_s25 + $0x78] sm:$0xff] %vm1280_vm0, %v1680_v17 }
  0x7d   : > { %v821_v36 = vld [vmem:[%s5709_s3 + $0x1a8] sm:$0xff]  ;;  %v949_v45 = vmul.f32 %v693_v42, %v437_v46  ;;  %v566_v43 = vld [vmem:[%s2444_s22 + $0x1b0] sm:$0xff]  ;;  %v1681_v33 = vadd.f32 %v1553_v29, %v1425_v47  ;;  %v567_v16 = vld [vmem:[%s2444_s22 + $0x1b8] sm:$0xff] }
  0x7e   : > { %v1077_v26 = vmul.f32 %v821_v36, %v565_v20  ;;  %v694_v34 = vld [vmem:[%s5708_s2 + $0x1b0] sm:$0xff]  ;;  %v6074_v25 = vld [vmem:[#allocation23_spill] sm:$0xff]  ;;  %v6076_v42 = vld [vmem:[#allocation26_spill] sm:$0xff]  ;;  %1332 = vst.msk [vmem:[%s2519_s24 + $0x198] sm:$0xff] %vm1280_vm0, %v1203_v53 }
  0x7f   : > { %v822_v35 = vld [vmem:[%s5709_s3 + $0x1b0] sm:$0xff]  ;;  %v950_v24 = vmul.f32 %v694_v34, %v438_v13  ;;  %v6077_v36 = vld [vmem:[#allocation29_spill] sm:$0xff]  ;;  %v440_v17 = vld [vmem:[%s2438_s16 + $0x1c0] sm:$0xff]  ;;  %1809 = vst.msk [vmem:[%s3185_s25 + $0x80] sm:$0xff] %vm1280_vm0, %v1681_v33 }
  0x80   : > { %v6075_v46 = vld [vmem:[#allocation24_spill] sm:$0xff]  ;;  %v1427_v60 = vmul.f32 %v6077_v36, %v6076_v42  ;;  %v1205_v47 = vsub.f32 %v949_v45, %v1077_v26  ;;  %v1078_v29 = vmul.f32 %v822_v35, %v566_v43  ;;  %v695_v51 = vld [vmem:[%s5708_s2 + $0x1b8] sm:$0xff]  ;;  %v6078_v31 = vld [vmem:[#allocation27_spill] sm:$0xff]  ;;  %1333 = vst.msk [vmem:[%s2519_s24 + $0x1a0] sm:$0xff] %vm1280_vm0, %v1204_v2 }
  0x81   : > { %v1554_v20 = vmul.f32 %v6075_v46, %v6074_v25  ;;  %v823_v59 = vld [vmem:[%s5709_s3 + $0x1b8] sm:$0xff]  ;;  %v6079_v13 = vld [vmem:[#allocation28_spill] sm:$0xff]  ;;  %v6080_v53 = vld [vmem:[#allocation30_spill] sm:$0xff]  ;;  %v951_v43 = vmul.f32 %v695_v51, %v439_v32 }
  0x82   : > { %v1555_v34 = vmul.f32 %v6079_v13, %v6078_v31  ;;  %v6081_v45 = vld [vmem:[#allocation33_spill] sm:$0xff]  ;;  %v1079_v35 = vmul.f32 %v823_v59, %v567_v16  ;;  %v568_v25 = vld [vmem:[%s2444_s22 + $0x1c0] sm:$0xff]  ;;  %v6082_v36 = vld [vmem:[#allocation31_spill] sm:$0xff]  ;;  %1334 = vst.msk [vmem:[%s2519_s24 + $0x1a8] sm:$0xff] %vm1280_vm0, %v1205_v47  ;;  %v1206_v2 = vsub.f32 %v950_v24, %v1078_v29 }
  0x83   : > { %v1428_v26 = vmul.f32 %v6081_v45, %v6080_v53  ;;  %v696_v46 = vld [vmem:[%s5708_s2 + $0x1c0] sm:$0xff]  ;;  %v1682_v42 = vadd.f32 %v1554_v20, %v1426_v7  ;;  %v6083_v31 = vld [vmem:[#allocation32_spill] sm:$0xff]  ;;  %v441_v51 = vld [vmem:[%s2438_s16 + $0x1c8] sm:$0xff] }
  0x84   : > { %v824_v33 = vld [vmem:[%s5709_s3 + $0x1c0] sm:$0xff]  ;;  %v1556_v13 = vmul.f32 %v6083_v31, %v6082_v36  ;;  %v952_v32 = vmul.f32 %v696_v46, %v440_v17  ;;  %v569_v59 = vld [vmem:[%s2444_s22 + $0x1c8] sm:$0xff]  ;;  %v1683_v45 = vadd.f32 %v1555_v34, %v1427_v60  ;;  %v1207_v39 = vsub.f32 %v951_v43, %v1079_v35  ;;  %v442_v47 = vld [vmem:[%s2438_s16 + $0x1d0] sm:$0xff]  ;;  %1335 = vst.msk [vmem:[%s2519_s24 + $0x1b0] sm:$0xff] %vm1280_vm0, %v1206_v2 }
  0x85   : > { %v1080_v16 = vmul.f32 %v824_v33, %v568_v25  ;;  %v697_v53 = vld [vmem:[%s5708_s2 + $0x1c8] sm:$0xff]  ;;  %v570_v24 = vld [vmem:[%s2444_s22 + $0x1d0] sm:$0xff]  ;;  %1810 = vst.msk [vmem:[%s3185_s25 + $0x88] sm:$0xff] %vm1280_vm0, %v1682_v42  ;;  %v6084_v17 = vld [vmem:[#allocation34_spill] sm:$0xff] }
  0x86   : > { %v825_v7 = vld [vmem:[%s5709_s3 + $0x1c8] sm:$0xff]  ;;  %v953_v20 = vmul.f32 %v697_v53, %v441_v51  ;;  %v1684_v29 = vadd.f32 %v1556_v13, %v1428_v26  ;;  %v6085_v25 = vld [vmem:[#allocation37_spill] sm:$0xff]  ;;  %v698_v43 = vld [vmem:[%s5708_s2 + $0x1d0] sm:$0xff]  ;;  %1811 = vst.msk [vmem:[%s3185_s25 + $0x90] sm:$0xff] %vm1280_vm0, %v1683_v45 }
  0x87   : > { %v1429_v46 = vmul.f32 %v6085_v25, %v6084_v17  ;;  %v1208_v60 = vsub.f32 %v952_v32, %v1080_v16  ;;  %v1081_v34 = vmul.f32 %v825_v7, %v569_v59  ;;  %v826_v35 = vld [vmem:[%s5709_s3 + $0x1d0] sm:$0xff]  ;;  %v443_v33 = vld [vmem:[%s2438_s16 + $0x1d8] sm:$0xff]  ;;  %v6086_v26 = vld [vmem:[#allocation35_spill] sm:$0xff]  ;;  %1336 = vst.msk [vmem:[%s2519_s24 + $0x1b8] sm:$0xff] %vm1280_vm0, %v1207_v39  ;;  %v954_v32 = vmul.f32 %v698_v43, %v442_v47 }
  0x88   : > { %v6087_v42 = vld [vmem:[#allocation36_spill] sm:$0xff]  ;;  %v6088_v31 = vld [vmem:[#allocation38_spill] sm:$0xff]  ;;  %v6089_v13 = vld [vmem:[#allocation41_spill] sm:$0xff]  ;;  %v1082_v16 = vmul.f32 %v826_v35, %v570_v24  ;;  %1812 = vst.msk [vmem:[%s3185_s25 + $0x98] sm:$0xff] %vm1280_vm0, %v1684_v29 }
  0x89   : > { %v1557_v36 = vmul.f32 %v6087_v42, %v6086_v26  ;;  %v1430_v2 = vmul.f32 %v6089_v13, %v6088_v31  ;;  %v571_v51 = vld [vmem:[%s2444_s22 + $0x1d8] sm:$0xff]  ;;  %v6090_v45 = vld [vmem:[#allocation39_spill] sm:$0xff]  ;;  %v6091_v7 = vld [vmem:[#allocation40_spill] sm:$0xff]  ;;  %1337 = vst.msk [vmem:[%s2519_s24 + $0x1c0] sm:$0xff] %vm1280_vm0, %v1208_v60  ;;  %v1209_v24 = vsub.f32 %v953_v20, %v1081_v34 }
  0x8a   : > { %v699_v59 = vld [vmem:[%s5708_s2 + $0x1d8] sm:$0xff]  ;;  %v1558_v17 = vmul.f32 %v6091_v7, %v6090_v45  ;;  %v6092_v25 = vld [vmem:[#allocation42_spill] sm:$0xff]  ;;  %v1210_v13 = vsub.f32 %v954_v32, %v1082_v16  ;;  %v445_v60 = vld [vmem:[%s2438_s16 + $0x1e8] sm:$0xff] }
  0x8b   : > { %v827_v53 = vld [vmem:[%s5709_s3 + $0x1d8] sm:$0xff]  ;;  %v955_v43 = vmul.f32 %v699_v59, %v443_v33  ;;  %v444_v26 = vld [vmem:[%s2438_s16 + $0x1e0] sm:$0xff]  ;;  %v1685_v31 = vadd.f32 %v1557_v36, %v1429_v46  ;;  %v573_v20 = vld [vmem:[%s2444_s22 + $0x1e8] sm:$0xff]  ;;  %1338 = vst.msk [vmem:[%s2519_s24 + $0x1c8] sm:$0xff] %vm1280_vm0, %v1209_v24 }
  0x8c   : > { %v6093_v39 = vld [vmem:[#allocation45_spill] sm:$0xff]  ;;  %v1083_v35 = vmul.f32 %v827_v53, %v571_v51  ;;  %v572_v42 = vld [vmem:[%s2444_s22 + $0x1e0] sm:$0xff]  ;;  %v1686_v34 = vadd.f32 %v1558_v17, %v1430_v2  ;;  %v6094_v33 = vld [vmem:[#allocation43_spill] sm:$0xff]  ;;  %1339 = vst.msk [vmem:[%s2519_s24 + $0x1d0] sm:$0xff] %vm1280_vm0, %v1210_v13 }
  0x8d   : > { %v1431_v47 = vmul.f32 %v6093_v39, %v6092_v25  ;;  %v700_v29 = vld [vmem:[%s5708_s2 + $0x1e0] sm:$0xff]  ;;  %v6095_v51 = vld [vmem:[#allocation44_spill] sm:$0xff]  ;;  %v701_v46 = vld [vmem:[%s5708_s2 + $0x1e8] sm:$0xff]  ;;  %1813 = vst.msk [vmem:[%s3185_s25 + $0xa0] sm:$0xff] %vm1280_vm0, %v1685_v31 }
  0x8e   : > { %v828_v45 = vld [vmem:[%s5709_s3 + $0x1e0] sm:$0xff]  ;;  %v956_v7 = vmul.f32 %v700_v29, %v444_v26  ;;  %v1559_v59 = vmul.f32 %v6095_v51, %v6094_v33  ;;  %v1211_v53 = vsub.f32 %v955_v43, %v1083_v35  ;;  %v829_v36 = vld [vmem:[%s5709_s3 + $0x1e8] sm:$0xff]  ;;  %v446_v32 = vld [vmem:[%s2438_s16 + $0x1f0] sm:$0xff]  ;;  %v957_v35 = vmul.f32 %v701_v46, %v445_v60  ;;  %1814 = vst.msk [vmem:[%s3185_s25 + $0xa8] sm:$0xff] %vm1280_vm0, %v1686_v34 }
  0x8f   : > { %v1084_v25 = vmul.f32 %v828_v45, %v572_v42  ;;  %v6096_v2 = vld [vmem:[#allocation46_spill] sm:$0xff]  ;;  %v6097_v16 = vld [vmem:[#allocation49_spill] sm:$0xff]  ;;  %v6098_v39 = vld [vmem:[#allocation47_spill] sm:$0xff]  ;;  %v1085_v26 = vmul.f32 %v829_v36, %v573_v20 }
  0x90   : > { %v1432_v17 = vmul.f32 %v6097_v16, %v6096_v2  ;;  %v6099_v24 = vld [vmem:[#allocation48_spill] sm:$0xff]  ;;  %v1687_v45 = vadd.f32 %v1559_v59, %v1431_v47  ;;  %v6100_v33 = vld [vmem:[#allocation50_spill] sm:$0xff]  ;;  %v6101_v51 = vld [vmem:[#allocation53_spill] sm:$0xff]  ;;  %1340 = vst.msk [vmem:[%s2519_s24 + $0x1d8] sm:$0xff] %vm1280_vm0, %v1211_v53 }
  0x91   : > { %v1560_v43 = vmul.f32 %v6099_v24, %v6098_v39  ;;  %v574_v42 = vld [vmem:[%s2444_s22 + $0x1f0] sm:$0xff]  ;;  %v1433_v13 = vmul.f32 %v6101_v51, %v6100_v33  ;;  %v1212_v60 = vsub.f32 %v956_v7, %v1084_v25  ;;  %v447_v36 = vld [vmem:[%s2438_s16 + $0x1f8] sm:$0xff]  ;;  %v1213_v39 = vsub.f32 %v957_v35, %v1085_v26  ;;  %v448_v53 = vld [vmem:[%s2438_s16 + $0x200] sm:$0xff] }
  0x92   : > { %v702_v29 = vld [vmem:[%s5708_s2 + $0x1f0] sm:$0xff]  ;;  %v575_v2 = vld [vmem:[%s2444_s22 + $0x1f8] sm:$0xff]  ;;  %v576_v7 = vld [vmem:[%s2444_s22 + $0x200] sm:$0xff]  ;;  %1815 = vst.msk [vmem:[%s3185_s25 + $0xb0] sm:$0xff] %vm1280_vm0, %v1687_v45 }
  0x93   : > { %v830_v31 = vld [vmem:[%s5709_s3 + $0x1f0] sm:$0xff]  ;;  %v958_v20 = vmul.f32 %v702_v29, %v446_v32  ;;  %v703_v16 = vld [vmem:[%s5708_s2 + $0x1f8] sm:$0xff]  ;;  %v1688_v34 = vadd.f32 %v1560_v43, %v1432_v17  ;;  %v6102_v25 = vld [vmem:[#allocation51_spill] sm:$0xff]  ;;  %1341 = vst.msk [vmem:[%s2519_s24 + $0x1e0] sm:$0xff] %vm1280_vm0, %v1212_v60 }
  0x94   : > { %v1086_v46 = vmul.f32 %v830_v31, %v574_v42  ;;  %v831_v47 = vld [vmem:[%s5709_s3 + $0x1f8] sm:$0xff]  ;;  %v959_v59 = vmul.f32 %v703_v16, %v447_v36  ;;  %v6103_v32 = vld [vmem:[#allocation52_spill] sm:$0xff]  ;;  %v6104_v42 = vld [vmem:[#allocation54_spill] sm:$0xff]  ;;  %1342 = vst.msk [vmem:[%s2519_s24 + $0x1e8] sm:$0xff] %vm1280_vm0, %v1213_v39 }
  0x95   : > { %v1561_v24 = vmul.f32 %v6103_v32, %v6102_v25  ;;  %v6105_v29 = vld [vmem:[#allocation57_spill] sm:$0xff]  ;;  %v1087_v43 = vmul.f32 %v831_v47, %v575_v2  ;;  %v704_v35 = vld [vmem:[%s5708_s2 + $0x200] sm:$0xff]  ;;  %v449_v45 = vld [vmem:[%s2438_s16 + $0x208] sm:$0xff]  ;;  %1816 = vst.msk [vmem:[%s3185_s25 + $0xb8] sm:$0xff] %vm1280_vm0, %v1688_v34 }
  0x96   : > { %v1434_v31 = vmul.f32 %v6105_v29, %v6104_v42  ;;  %v1214_v17 = vsub.f32 %v958_v20, %v1086_v46  ;;  %v832_v26 = vld [vmem:[%s5709_s3 + $0x200] sm:$0xff]  ;;  %v6106_v33 = vld [vmem:[#allocation55_spill] sm:$0xff]  ;;  %v6107_v51 = vld [vmem:[#allocation56_spill] sm:$0xff]  ;;  %v960_v2 = vmul.f32 %v704_v35, %v448_v53 }
  0x97   : > { %v1562_v36 = vmul.f32 %v6107_v51, %v6106_v33  ;;  %v6108_v60 = vld [vmem:[#allocation58_spill] sm:$0xff]  ;;  %v6109_v20 = vld [vmem:[#allocation61_spill] sm:$0xff]  ;;  %v1088_v16 = vmul.f32 %v832_v26, %v576_v7  ;;  %v577_v47 = vld [vmem:[%s2444_s22 + $0x208] sm:$0xff]  ;;  %v1689_v32 = vadd.f32 %v1561_v24, %v1433_v13  ;;  %v1215_v39 = vsub.f32 %v959_v59, %v1087_v43 }
  0x98   : > { %v1435_v46 = vmul.f32 %v6109_v20, %v6108_v60  ;;  %v705_v25 = vld [vmem:[%s5708_s2 + $0x208] sm:$0xff]  ;;  %v6111_v29 = vld [vmem:[#allocation60_spill] sm:$0xff]  ;;  %1343 = vst.msk [vmem:[%s2519_s24 + $0x1f0] sm:$0xff] %vm1280_vm0, %v1214_v17  ;;  %v451_v17 = vld [vmem:[%s2438_s16 + $0x218] sm:$0xff] }
  0x99   : > { %v833_v34 = vld [vmem:[%s5709_s3 + $0x208] sm:$0xff]  ;;  %v961_v53 = vmul.f32 %v705_v25, %v449_v45  ;;  %v450_v35 = vld [vmem:[%s2438_s16 + $0x210] sm:$0xff]  ;;  %v1690_v60 = vadd.f32 %v1562_v36, %v1434_v31  ;;  %v1216_v20 = vsub.f32 %v960_v2, %v1088_v16  ;;  %v579_v59 = vld [vmem:[%s2444_s22 + $0x218] sm:$0xff]  ;;  %1817 = vst.msk [vmem:[%s3185_s25 + $0xc0] sm:$0xff] %vm1280_vm0, %v1689_v32 }
  0x9a   : > { %v6110_v42 = vld [vmem:[#allocation59_spill] sm:$0xff]  ;;  %v1089_v7 = vmul.f32 %v833_v34, %v577_v47  ;;  %v578_v26 = vld [vmem:[%s2444_s22 + $0x210] sm:$0xff]  ;;  %v6112_v45 = vld [vmem:[#allocation62_spill] sm:$0xff]  ;;  %1344 = vst.msk [vmem:[%s2519_s24 + $0x1f8] sm:$0xff] %vm1280_vm0, %v1215_v39 }
  0x9b   : > { %v1563_v33 = vmul.f32 %v6111_v29, %v6110_v42  ;;  %v706_v51 = vld [vmem:[%s5708_s2 + $0x210] sm:$0xff]  ;;  %v6113_v47 = vld [vmem:[#allocation65_spill] sm:$0xff]  ;;  %v452_v34 = vld [vmem:[%s2438_s16 + $0x220] sm:$0xff]  ;;  %1818 = vst.msk [vmem:[%s3185_s25 + $0xc8] sm:$0xff] %vm1280_vm0, %v1690_v60 }
  0x9c   : > { %v834_v13 = vld [vmem:[%s5709_s3 + $0x210] sm:$0xff]  ;;  %v962_v24 = vmul.f32 %v706_v51, %v450_v35  ;;  %v1436_v25 = vmul.f32 %v6113_v47, %v6112_v45  ;;  %v1217_v31 = vsub.f32 %v961_v53, %v1089_v7  ;;  %v707_v2 = vld [vmem:[%s5708_s2 + $0x218] sm:$0xff]  ;;  %v6116_v29 = vld [vmem:[#allocation66_spill] sm:$0xff]  ;;  %1345 = vst.msk [vmem:[%s2519_s24 + $0x200] sm:$0xff] %vm1280_vm0, %v1216_v20 }
  0x9d   : > { %v1691_v43 = vadd.f32 %v1563_v33, %v1435_v46  ;;  %v1090_v36 = vmul.f32 %v834_v13, %v578_v26  ;;  %v835_v16 = vld [vmem:[%s5709_s3 + $0x218] sm:$0xff]  ;;  %v6114_v46 = vld [vmem:[#allocation63_spill] sm:$0xff]  ;;  %v6115_v32 = vld [vmem:[#allocation64_spill] sm:$0xff]  ;;  %v963_v53 = vmul.f32 %v707_v2, %v451_v17 }
  0x9e   : > { %v1564_v42 = vmul.f32 %v6115_v32, %v6114_v46  ;;  %v6117_v33 = vld [vmem:[#allocation69_spill] sm:$0xff]  ;;  %v1091_v7 = vmul.f32 %v835_v16, %v579_v59  ;;  %v580_v35 = vld [vmem:[%s2444_s22 + $0x220] sm:$0xff]  ;;  %v6118_v60 = vld [vmem:[#allocation67_spill] sm:$0xff]  ;;  %1346 = vst.msk [vmem:[%s2519_s24 + $0x208] sm:$0xff] %vm1280_vm0, %v1217_v31 }
  0x9f   : > { %v1437_v39 = vmul.f32 %v6117_v33, %v6116_v29  ;;  %v708_v26 = vld [vmem:[%s5708_s2 + $0x220] sm:$0xff]  ;;  %1819 = vst.msk [vmem:[%s3185_s25 + $0xd0] sm:$0xff] %vm1280_vm0, %v1691_v43  ;;  %v6119_v13 = vld [vmem:[#allocation68_spill] sm:$0xff]  ;;  %v6121_v20 = vld [vmem:[#allocation73_spill] sm:$0xff]  ;;  %v1218_v59 = vsub.f32 %v962_v24, %v1090_v36 }
  0xa0   : > { %v836_v51 = vld [vmem:[%s5709_s3 + $0x220] sm:$0xff]  ;;  %v1565_v45 = vmul.f32 %v6119_v13, %v6118_v60  ;;  %v964_v2 = vmul.f32 %v708_v26, %v452_v34  ;;  %v453_v46 = vld [vmem:[%s2438_s16 + $0x228] sm:$0xff]  ;;  %v1692_v29 = vadd.f32 %v1564_v42, %v1436_v25  ;;  %v1219_v33 = vsub.f32 %v963_v53, %v1091_v7  ;;  %v454_v31 = vld [vmem:[%s2438_s16 + $0x230] sm:$0xff] }
  0xa1   : > { %v6120_v47 = vld [vmem:[#allocation70_spill] sm:$0xff]  ;;  %v1092_v16 = vmul.f32 %v836_v51, %v580_v35  ;;  %v581_v32 = vld [vmem:[%s2444_s22 + $0x228] sm:$0xff]  ;;  %v582_v24 = vld [vmem:[%s2444_s22 + $0x230] sm:$0xff]  ;;  %1347 = vst.msk [vmem:[%s2519_s24 + $0x210] sm:$0xff] %vm1280_vm0, %v1218_v59 }
  0xa2   : > { %v1438_v17 = vmul.f32 %v6121_v20, %v6120_v47  ;;  %v709_v43 = vld [vmem:[%s5708_s2 + $0x228] sm:$0xff]  ;;  %v1693_v36 = vadd.f32 %v1565_v45, %v1437_v39  ;;  %v6123_v35 = vld [vmem:[#allocation72_spill] sm:$0xff]  ;;  %v455_v53 = vld [vmem:[%s2438_s16 + $0x238] sm:$0xff]  ;;  %1820 = vst.msk [vmem:[%s3185_s25 + $0xd8] sm:$0xff] %vm1280_vm0, %v1692_v29 }
  0xa3   : > { %v837_v60 = vld [vmem:[%s5709_s3 + $0x228] sm:$0xff]  ;;  %v965_v13 = vmul.f32 %v709_v43, %v453_v46  ;;  %v1220_v51 = vsub.f32 %v964_v2, %v1092_v16  ;;  %v710_v25 = vld [vmem:[%s5708_s2 + $0x230] sm:$0xff]  ;;  %v6124_v39 = vld [vmem:[#allocation74_spill] sm:$0xff]  ;;  %1348 = vst.msk [vmem:[%s2519_s24 + $0x218] sm:$0xff] %vm1280_vm0, %v1219_v33 }
  0xa4   : > { %v6122_v34 = vld [vmem:[#allocation71_spill] sm:$0xff]  ;;  %v1093_v47 = vmul.f32 %v837_v60, %v581_v32  ;;  %v838_v42 = vld [vmem:[%s5709_s3 + $0x230] sm:$0xff]  ;;  %v6125_v7 = vld [vmem:[#allocation77_spill] sm:$0xff]  ;;  %v966_v16 = vmul.f32 %v710_v25, %v454_v31  ;;  %1821 = vst.msk [vmem:[%s3185_s25 + $0xe0] sm:$0xff] %vm1280_vm0, %v1693_v36 }
  0xa5   : > { %v1566_v26 = vmul.f32 %v6123_v35, %v6122_v34  ;;  %v1439_v45 = vmul.f32 %v6125_v7, %v6124_v39  ;;  %v6126_v20 = vld [vmem:[#allocation75_spill] sm:$0xff]  ;;  %v6127_v59 = vld [vmem:[#allocation76_spill] sm:$0xff]  ;;  %v1094_v46 = vmul.f32 %v838_v42, %v582_v24  ;;  %v583_v32 = vld [vmem:[%s2444_s22 + $0x238] sm:$0xff]  ;;  %1349 = vst.msk [vmem:[%s2519_s24 + $0x220] sm:$0xff] %vm1280_vm0, %v1220_v51 }
  0xa6   : > { %v1567_v2 = vmul.f32 %v6127_v59, %v6126_v20  ;;  %v711_v43 = vld [vmem:[%s5708_s2 + $0x238] sm:$0xff]  ;;  %v6128_v34 = vld [vmem:[#allocation78_spill] sm:$0xff]  ;;  %v1221_v31 = vsub.f32 %v965_v13, %v1093_v47  ;;  %v457_v51 = vld [vmem:[%s2438_s16 + $0x248] sm:$0xff] }
  0xa7   : > { %v839_v29 = vld [vmem:[%s5709_s3 + $0x238] sm:$0xff]  ;;  %v1694_v60 = vadd.f32 %v1566_v26, %v1438_v17  ;;  %v967_v24 = vmul.f32 %v711_v43, %v455_v53  ;;  %v456_v42 = vld [vmem:[%s2438_s16 + $0x240] sm:$0xff]  ;;  %v1222_v20 = vsub.f32 %v966_v16, %v1094_v46  ;;  %v585_v13 = vld [vmem:[%s2444_s22 + $0x248] sm:$0xff] }
  0xa8   : > { %v6129_v35 = vld [vmem:[#allocation81_spill] sm:$0xff]  ;;  %v1095_v25 = vmul.f32 %v839_v29, %v583_v32  ;;  %v584_v39 = vld [vmem:[%s2444_s22 + $0x240] sm:$0xff]  ;;  %v1695_v36 = vadd.f32 %v1567_v2, %v1439_v45  ;;  %v6130_v47 = vld [vmem:[#allocation79_spill] sm:$0xff]  ;;  %v1441_v32 = vmul.f32 %v3124_v41, %v3105_v62  ;;  %1350 = vst.msk [vmem:[%s2519_s24 + $0x228] sm:$0xff] %vm1280_vm0, %v1221_v31  ;;  %v1442_v41 = vmul.f32 %v3152_v12, %v3137_v48 }
  0xa9   : > { %v1440_v33 = vmul.f32 %v6129_v35, %v6128_v34  ;;  %v712_v7 = vld [vmem:[%s5708_s2 + $0x240] sm:$0xff]  ;;  %1822 = vst.msk [vmem:[%s3185_s25 + $0xe8] sm:$0xff] %vm1280_vm0, %v1694_v60  ;;  %v6131_v53 = vld [vmem:[#allocation80_spill] sm:$0xff]  ;;  %v713_v16 = vld [vmem:[%s5708_s2 + $0x248] sm:$0xff]  ;;  %v1570_v48 = vmul.f32 %v3145_v0, %v3140_v54 }
  0xaa   : > { %v840_v17 = vld [vmem:[%s5709_s3 + $0x240] sm:$0xff]  ;;  %v968_v26 = vmul.f32 %v712_v7, %v456_v42  ;;  %v1568_v59 = vmul.f32 %v6131_v53, %v6130_v47  ;;  %v1223_v45 = vsub.f32 %v967_v24, %v1095_v25  ;;  %v841_v46 = vld [vmem:[%s5709_s3 + $0x248] sm:$0xff]  ;;  %v458_v43 = vld [vmem:[%s2438_s16 + $0x250] sm:$0xff]  ;;  %1823 = vst.msk [vmem:[%s3185_s25 + $0xf0] sm:$0xff] %vm1280_vm0, %v1695_v36  ;;  %v969_v34 = vmul.f32 %v713_v16, %v457_v51 }
  0xab   : > { %v1096_v2 = vmul.f32 %v840_v17, %v584_v39  ;;  %v6132_v29 = vld [vmem:[#allocation82_spill] sm:$0xff]  ;;  %v6133_v60 = vld [vmem:[#allocation83_spill] sm:$0xff]  ;;  %1351 = vst.msk [vmem:[%s2519_s24 + $0x230] sm:$0xff] %vm1280_vm0, %v1222_v20  ;;  %v1097_v35 = vmul.f32 %v841_v46, %v585_v13  ;;  %v586_v31 = vld [vmem:[%s2444_s22 + $0x250] sm:$0xff]  ;;  %v1698_v47 = vadd.f32 %v1570_v48, %v1442_v41 }
  0xac   : > { %v1569_v62 = vmul.f32 %v6133_v60, %v6132_v29  ;;  %v714_v24 = vld [vmem:[%s5708_s2 + $0x250] sm:$0xff]  ;;  %v1696_v42 = vadd.f32 %v1568_v59, %v1440_v33  ;;  %1352 = vst.msk [vmem:[%s2519_s24 + $0x238] sm:$0xff] %vm1280_vm0, %v1223_v45  ;;  %v459_v36 = vld [vmem:[%s2438_s16 + $0x258] sm:$0xff]  ;;  %v460_v33 = vld [vmem:[%s2438_s16 + $0x260] sm:$0xff]  ;;  %v1444_v60 = vmul.f32 %v3208_v4, %v3179_v56  ;;  %v1572_v56 = vmul.f32 %v3203_v57, %v3198_v37 }
  0xad   : > { %v842_v25 = vld [vmem:[%s5709_s3 + $0x250] sm:$0xff]  ;;  %v1224_v12 = vsub.f32 %v968_v26, %v1096_v2  ;;  %v970_v39 = vmul.f32 %v714_v24, %v458_v43  ;;  %v587_v20 = vld [vmem:[%s2444_s22 + $0x258] sm:$0xff]  ;;  %v1225_v13 = vsub.f32 %v969_v34, %v1097_v35  ;;  %v588_v26 = vld [vmem:[%s2444_s22 + $0x260] sm:$0xff]  ;;  %1826 = vst.msk [vmem:[%s3185_s25 + $0x108] sm:$0xff] %vm1280_vm0, %v1698_v47  ;;  %v1445_v4 = vmul.f32 %v3234_v49, %v3221_v63 }
  0xae   : > { %v1098_v7 = vmul.f32 %v842_v25, %v586_v31  ;;  %v715_v17 = vld [vmem:[%s5708_s2 + $0x258] sm:$0xff]  ;;  %v1697_v51 = vadd.f32 %v1569_v62, %v1441_v32  ;;  %1824 = vst.msk [vmem:[%s3185_s25 + $0xf8] sm:$0xff] %vm1280_vm0, %v1696_v42  ;;  %v6134_v53 = vld [vmem:[#allocation86_spill] sm:$0xff]  ;;  %v461_v46 = vld [vmem:[%s2438_s16 + $0x268] sm:$0xff] }
  0xaf   : > { %v843_v54 = vld [vmem:[%s5709_s3 + $0x258] sm:$0xff]  ;;  %v971_v0 = vmul.f32 %v715_v17, %v459_v36  ;;  %v1443_v59 = vmul.f32 %v6134_v53, %v3157_v27  ;;  %1353 = vst.msk [vmem:[%s2519_s24 + $0x240] sm:$0xff] %vm1280_vm0, %v1224_v12  ;;  %v716_v2 = vld [vmem:[%s5708_s2 + $0x260] sm:$0xff]  ;;  %v6135_v43 = vld [vmem:[#allocation84_spill] sm:$0xff]  ;;  %v1573_v17 = vmul.f32 %v3229_v61, %v3224_v50  ;;  %v1446_v50 = vmul.f32 %v3262_v5, %v3239_v28 }
  0xb0   : > { %v1226_v32 = vsub.f32 %v970_v39, %v1098_v7  ;;  %v1099_v45 = vmul.f32 %v843_v54, %v587_v20  ;;  %v844_v16 = vld [vmem:[%s5709_s3 + $0x260] sm:$0xff]  ;;  %1825 = vst.msk [vmem:[%s3185_s25 + $0x100] sm:$0xff] %vm1280_vm0, %v1697_v51  ;;  %v6136_v29 = vld [vmem:[#allocation85_spill] sm:$0xff]  ;;  %1354 = vst.msk [vmem:[%s2519_s24 + $0x248] sm:$0xff] %vm1280_vm0, %v1225_v13  ;;  %v972_v62 = vmul.f32 %v716_v2, %v460_v33 }
  0xb1   : > { %v1571_v27 = vmul.f32 %v6136_v29, %v6135_v43  ;;  %v1100_v41 = vmul.f32 %v844_v16, %v588_v26  ;;  %v589_v34 = vld [vmem:[%s2444_s22 + $0x268] sm:$0xff]  ;;  %v462_v48 = vld [vmem:[%s2438_s16 + $0x270] sm:$0xff]  ;;  %v463_v57 = vld [vmem:[%s2438_s16 + $0x278] sm:$0xff]  ;;  %v1700_v20 = vadd.f32 %v1572_v56, %v1444_v60  ;;  %v1701_v28 = vadd.f32 %v1573_v17, %v1445_v4 }
  0xb2   : > { %v717_v35 = vld [vmem:[%s5708_s2 + $0x268] sm:$0xff]  ;;  %1355 = vst.msk [vmem:[%s2519_s24 + $0x250] sm:$0xff] %vm1280_vm0, %v1226_v32  ;;  %v1227_v24 = vsub.f32 %v971_v0, %v1099_v45  ;;  %v590_v12 = vld [vmem:[%s2444_s22 + $0x270] sm:$0xff]  ;;  %v591_v49 = vld [vmem:[%s2444_s22 + $0x278] sm:$0xff]  ;;  %v1447_v5 = vmul.f32 %v3290_v8, %v3265_v6  ;;  %v1448_v4 = vmul.f32 %v3314_v1, %v3301_v40  ;;  %v1576_v40 = vmul.f32 %v3309_v21, %v3304_v3 }
  0xb3   : > { %v845_v31 = vld [vmem:[%s5709_s3 + $0x268] sm:$0xff]  ;;  %v973_v25 = vmul.f32 %v717_v35, %v461_v46  ;;  %v718_v39 = vld [vmem:[%s5708_s2 + $0x270] sm:$0xff]  ;;  %v1699_v7 = vadd.f32 %v1571_v27, %v1443_v59  ;;  %v1228_v36 = vsub.f32 %v972_v62, %v1100_v41  ;;  %v719_v54 = vld [vmem:[%s5708_s2 + $0x278] sm:$0xff]  ;;  %1828 = vst.msk [vmem:[%s3185_s25 + $0x118] sm:$0xff] %vm1280_vm0, %v1700_v20 }
  0xb4   : > { %v1101_v42 = vmul.f32 %v845_v31, %v589_v34  ;;  %v846_v63 = vld [vmem:[%s5709_s3 + $0x270] sm:$0xff]  ;;  %v974_v37 = vmul.f32 %v718_v39, %v462_v48  ;;  %1356 = vst.msk [vmem:[%s2519_s24 + $0x258] sm:$0xff] %vm1280_vm0, %v1227_v24  ;;  %v847_v0 = vld [vmem:[%s5709_s3 + $0x278] sm:$0xff]  ;;  %v464_v33 = vld [vmem:[%s2438_s16 + $0x280] sm:$0xff]  ;;  %v975_v53 = vmul.f32 %v719_v54, %v463_v57 }
  0xb5   : > { %v1102_v13 = vmul.f32 %v846_v63, %v590_v12  ;;  %1827 = vst.msk [vmem:[%s3185_s25 + $0x110] sm:$0xff] %vm1280_vm0, %v1699_v7  ;;  %v6137_v61 = vld [vmem:[#allocation87_spill] sm:$0xff]  ;;  %v6138_v26 = vld [vmem:[#allocation88_spill] sm:$0xff]  ;;  %1357 = vst.msk [vmem:[%s2519_s24 + $0x260] sm:$0xff] %vm1280_vm0, %v1228_v36  ;;  %v1103_v59 = vmul.f32 %v847_v0, %v591_v49 }
  0xb6   : > { %v1229_v51 = vsub.f32 %v973_v25, %v1101_v42  ;;  %v1574_v47 = vmul.f32 %v6138_v26, %v6137_v61  ;;  %v592_v32 = vld [vmem:[%s2444_s22 + $0x280] sm:$0xff]  ;;  %v465_v29 = vld [vmem:[%s2438_s16 + $0x288] sm:$0xff]  ;;  %v466_v34 = vld [vmem:[%s2438_s16 + $0x290] sm:$0xff]  ;;  %1829 = vst.msk [vmem:[%s3185_s25 + $0x120] sm:$0xff] %vm1280_vm0, %v1701_v28  ;;  %v1450_v61 = vmul.f32 %v3368_v15, %v3343_v14  ;;  %v1451_v15 = vmul.f32 %v3396_v52, %v3383_v55 }
  0xb7   : > { %v720_v45 = vld [vmem:[%s5708_s2 + $0x280] sm:$0xff]  ;;  %v1230_v16 = vsub.f32 %v974_v37, %v1102_v13  ;;  %v593_v27 = vld [vmem:[%s2444_s22 + $0x288] sm:$0xff]  ;;  %v1231_v41 = vsub.f32 %v975_v53, %v1103_v59  ;;  %v594_v35 = vld [vmem:[%s2444_s22 + $0x290] sm:$0xff]  ;;  %v1579_v55 = vmul.f32 %v3391_v23, %v3386_v11  ;;  %v1452_v52 = vmul.f32 %v3420_v44, %v3401_v9 }
  0xb8   : > { %v848_v2 = vld [vmem:[%s5709_s3 + $0x280] sm:$0xff]  ;;  %1358 = vst.msk [vmem:[%s2519_s24 + $0x268] sm:$0xff] %vm1280_vm0, %v1229_v51  ;;  %v976_v46 = vmul.f32 %v720_v45, %v464_v33  ;;  %v721_v60 = vld [vmem:[%s5708_s2 + $0x288] sm:$0xff]  ;;  %v1702_v62 = vadd.f32 %v1574_v47, %v1446_v50  ;;  %v6139_v31 = vld [vmem:[#allocation89_spill] sm:$0xff]  ;;  %v1704_v51 = vadd.f32 %v1576_v40, %v1448_v4  ;;  %v1453_v40 = vmul.f32 %v3448_v58, %v3423_v38 }
  0xb9   : > { %v1104_v43 = vmul.f32 %v848_v2, %v592_v32  ;;  %v849_v6 = vld [vmem:[%s5709_s3 + $0x288] sm:$0xff]  ;;  %v977_v8 = vmul.f32 %v721_v60, %v465_v29  ;;  %v1575_v56 = vmul.f32 %v6139_v31, %v3280_v22  ;;  %1359 = vst.msk [vmem:[%s2519_s24 + $0x270] sm:$0xff] %vm1280_vm0, %v1230_v16  ;;  %v722_v42 = vld [vmem:[%s5708_s2 + $0x290] sm:$0xff]  ;;  %v467_v12 = vld [vmem:[%s2438_s16 + $0x298] sm:$0xff]  ;;  %v1449_v22 = vmul.f32 %v3340_v30, %v3319_v19 }
  0xba   : > { %v1105_v25 = vmul.f32 %v849_v6, %v593_v27  ;;  %v850_v48 = vld [vmem:[%s5709_s3 + $0x290] sm:$0xff]  ;;  %1830 = vst.msk [vmem:[%s3185_s25 + $0x128] sm:$0xff] %vm1280_vm0, %v1702_v62  ;;  %1360 = vst.msk [vmem:[%s2519_s24 + $0x278] sm:$0xff] %vm1280_vm0, %v1231_v41  ;;  %v978_v1 = vmul.f32 %v722_v42, %v466_v34  ;;  %v595_v7 = vld [vmem:[%s2444_s22 + $0x298] sm:$0xff] }
  0xbb   : > { %v1232_v24 = vsub.f32 %v976_v46, %v1104_v43  ;;  %v1106_v39 = vmul.f32 %v850_v48, %v594_v35  ;;  %v723_v36 = vld [vmem:[%s5708_s2 + $0x298] sm:$0xff]  ;;  %v1703_v3 = vadd.f32 %v1575_v56, %v1447_v5  ;;  %v6140_v21 = vld [vmem:[#allocation90_spill] sm:$0xff]  ;;  %v469_v0 = vld [vmem:[%s2438_s16 + $0x2a8] sm:$0xff]  ;;  %1832 = vst.msk [vmem:[%s3185_s25 + $0x138] sm:$0xff] %vm1280_vm0, %v1704_v51  ;;  %v1707_v35 = vadd.f32 %v1579_v55, %v1451_v15 }
  0xbc   : > { %v851_v63 = vld [vmem:[%s5709_s3 + $0x298] sm:$0xff]  ;;  %v1577_v19 = vmul.f32 %v6140_v21, %v3322_v18  ;;  %v1233_v30 = vsub.f32 %v977_v8, %v1105_v25  ;;  %v979_v37 = vmul.f32 %v723_v36, %v467_v12  ;;  %v468_v49 = vld [vmem:[%s2438_s16 + $0x2a0] sm:$0xff]  ;;  %v597_v33 = vld [vmem:[%s2444_s22 + $0x2a8] sm:$0xff] }
  0xbd   : > { %1361 = vst.msk [vmem:[%s2519_s24 + $0x280] sm:$0xff] %vm1280_vm0, %v1232_v24  ;;  %v1107_v57 = vmul.f32 %v851_v63, %v595_v7  ;;  %v596_v20 = vld [vmem:[%s2444_s22 + $0x2a0] sm:$0xff]  ;;  %v1234_v13 = vsub.f32 %v978_v1, %v1106_v39  ;;  %1831 = vst.msk [vmem:[%s3185_s25 + $0x130] sm:$0xff] %vm1280_vm0, %v1703_v3  ;;  %v725_v53 = vld [vmem:[%s5708_s2 + $0x2a8] sm:$0xff] }
  0xbe   : > { %v724_v17 = vld [vmem:[%s5708_s2 + $0x2a0] sm:$0xff]  ;;  %v1705_v50 = vadd.f32 %v1577_v19, %v1449_v22  ;;  %1362 = vst.msk [vmem:[%s2519_s24 + $0x288] sm:$0xff] %vm1280_vm0, %v1233_v30  ;;  %v853_v59 = vld [vmem:[%s5709_s3 + $0x2a8] sm:$0xff]  ;;  %v470_v32 = vld [vmem:[%s2438_s16 + $0x2b0] sm:$0xff]  ;;  %v981_v28 = vmul.f32 %v725_v53, %v469_v0 }
  0xbf   : > { %v852_v18 = vld [vmem:[%s5709_s3 + $0x2a0] sm:$0xff]  ;;  %v980_v54 = vmul.f32 %v724_v17, %v468_v49  ;;  %v1235_v26 = vsub.f32 %v979_v37, %v1107_v57  ;;  %v6141_v45 = vld [vmem:[#allocation91_spill] sm:$0xff]  ;;  %v6142_v2 = vld [vmem:[#allocation92_spill] sm:$0xff]  ;;  %1363 = vst.msk [vmem:[%s2519_s24 + $0x290] sm:$0xff] %vm1280_vm0, %v1234_v13  ;;  %v1109_v5 = vmul.f32 %v853_v59, %v597_v33 }
  0xc0   : > { %v1108_v47 = vmul.f32 %v852_v18, %v596_v20  ;;  %v1578_v14 = vmul.f32 %v6142_v2, %v6141_v45  ;;  %v598_v16 = vld [vmem:[%s2444_s22 + $0x2b0] sm:$0xff]  ;;  %1833 = vst.msk [vmem:[%s3185_s25 + $0x140] sm:$0xff] %vm1280_vm0, %v1705_v50  ;;  %v4130_v62 = vld [vmem:[%s2438_s16 + $0x2b8] sm:$0xff]  ;;  %v4148_v8 = vld [vmem:[%s2438_s16 + $0x2c0] sm:$0xff] }
  0xc1   : > { %v726_v46 = vld [vmem:[%s5708_s2 + $0x2b0] sm:$0xff]  ;;  %1364 = vst.msk [vmem:[%s2519_s24 + $0x298] sm:$0xff] %vm1280_vm0, %v1235_v26  ;;  %v4133_v41 = vld [vmem:[%s2444_s22 + $0x2b8] sm:$0xff]  ;;  %v1237_v9 = vsub.f32 %v981_v28, %v1109_v5  ;;  %v4151_v34 = vld [vmem:[%s2444_s22 + $0x2c0] sm:$0xff] }
  0xc2   : > { %v4118_v43 = vld [vmem:[%s5709_s3 + $0x2b0] sm:$0xff]  ;;  %v1236_v29 = vsub.f32 %v980_v54, %v1108_v47  ;;  %v982_v27 = vmul.f32 %v726_v46, %v470_v32  ;;  %v4138_v11 = vld [vmem:[%s5708_s2 + $0x2b8] sm:$0xff]  ;;  %v1706_v23 = vadd.f32 %v1578_v14, %v1450_v61  ;;  %v6144_v56 = vld [vmem:[#allocation94_spill] sm:$0xff]  ;;  %1835 = vst.msk [vmem:[%s3185_s25 + $0x150] sm:$0xff] %vm1280_vm0, %v1707_v35 }
  0xc3   : > { %v1110_v60 = vmul.f32 %v4118_v43, %v598_v16  ;;  %v4143_v44 = vld [vmem:[%s5709_s3 + $0x2b8] sm:$0xff]  ;;  %v983_v6 = vmul.f32 %v4138_v11, %v4130_v62  ;;  %v4162_v42 = vld [vmem:[%s5708_s2 + $0x2c0] sm:$0xff]  ;;  %v4170_v12 = vld [vmem:[%s2438_s16 + $0x2c8] sm:$0xff]  ;;  %1366 = vst.msk [vmem:[%s2519_s24 + $0x2a8] sm:$0xff] %vm1280_vm0, %v1237_v9 }
  0xc4   : > { %v6143_v31 = vld [vmem:[#allocation93_spill] sm:$0xff]  ;;  %1365 = vst.msk [vmem:[%s2519_s24 + $0x2a0] sm:$0xff] %vm1280_vm0, %v1236_v29  ;;  %v1111_v25 = vmul.f32 %v4143_v44, %v4133_v41  ;;  %v4167_v48 = vld [vmem:[%s5709_s3 + $0x2c0] sm:$0xff]  ;;  %1834 = vst.msk [vmem:[%s3185_s25 + $0x148] sm:$0xff] %vm1280_vm0, %v1706_v23  ;;  %v984_v39 = vmul.f32 %v4162_v42, %v4148_v8 }
  0xc5   : > { %v1580_v4 = vmul.f32 %v6144_v56, %v6143_v31  ;;  %v1238_v24 = vsub.f32 %v982_v27, %v1110_v60  ;;  %v6145_v22 = vld [vmem:[#allocation95_spill] sm:$0xff]  ;;  %v1112_v7 = vmul.f32 %v4167_v48, %v4151_v34  ;;  %v6146_v58 = vld [vmem:[#allocation96_spill] sm:$0xff]  ;;  %v4226_v54 = vld [vmem:[%s2438_s16 + $0x2d8] sm:$0xff] }
  0xc6   : > { %v1581_v1 = vmul.f32 %v6145_v22, %v3438_v10  ;;  %v4185_v36 = vld [vmem:[%s2444_s22 + $0x2c8] sm:$0xff]  ;;  %v1239_v19 = vsub.f32 %v983_v6, %v1111_v25  ;;  %v4208_v57 = vld [vmem:[%s2438_s16 + $0x2d0] sm:$0xff]  ;;  %v4229_v0 = vld [vmem:[%s2444_s22 + $0x2d8] sm:$0xff] }
  0xc7   : > { %v4190_v63 = vld [vmem:[%s5708_s2 + $0x2c8] sm:$0xff]  ;;  %v1708_v10 = vadd.f32 %v1580_v4, %v1452_v52  ;;  %1367 = vst.msk [vmem:[%s2519_s24 + $0x2b0] sm:$0xff] %vm1280_vm0, %v1238_v24  ;;  %v4211_v49 = vld [vmem:[%s2444_s22 + $0x2d0] sm:$0xff]  ;;  %v1240_v51 = vsub.f32 %v984_v39, %v1112_v7  ;;  %v6148_v33 = vld [vmem:[#allocation97_spill] sm:$0xff] }
  0xc8   : > { %v4195_v38 = vld [vmem:[%s5709_s3 + $0x2c8] sm:$0xff]  ;;  %v985_v30 = vmul.f32 %v4190_v63, %v4170_v12  ;;  %v4216_v20 = vld [vmem:[%s5708_s2 + $0x2d0] sm:$0xff]  ;;  %v1709_v17 = vadd.f32 %v1581_v1, %v1453_v40  ;;  %v6149_v50 = vld [vmem:[#allocation98_spill] sm:$0xff]  ;;  %1368 = vst.msk [vmem:[%s2519_s24 + $0x2b8] sm:$0xff] %vm1280_vm0, %v1239_v19 }
  0xc9   : > { %v6147_v3 = vld [vmem:[#allocation99_spill] sm:$0xff]  ;;  %v1113_v37 = vmul.f32 %v4195_v38, %v4185_v36  ;;  %v4221_v13 = vld [vmem:[%s5709_s3 + $0x2d0] sm:$0xff]  ;;  %v986_v18 = vmul.f32 %v4216_v20, %v4208_v57  ;;  %1836 = vst.msk [vmem:[%s3185_s25 + $0x158] sm:$0xff] %vm1280_vm0, %v1708_v10  ;;  %v1582_v61 = vmul.f32 %v6149_v50, %v6148_v33  ;;  %v4244_v45 = vld [vmem:[%s5708_s2 + $0x2d8] sm:$0xff] }
  0xca   : > { %v1454_v21 = vmul.f32 %v6147_v3, %v6146_v58  ;;  %v6150_v26 = vld [vmem:[#allocation100_spill] sm:$0xff]  ;;  %v6151_v47 = vld [vmem:[#allocation103_spill] sm:$0xff]  ;;  %v1114_v32 = vmul.f32 %v4221_v13, %v4211_v49  ;;  %v4249_v2 = vld [vmem:[%s5709_s3 + $0x2d8] sm:$0xff]  ;;  %1837 = vst.msk [vmem:[%s3185_s25 + $0x160] sm:$0xff] %vm1280_vm0, %v1709_v17  ;;  %v987_v52 = vmul.f32 %v4244_v45, %v4226_v54 }
  0xcb   : > { %v1455_v53 = vmul.f32 %v6151_v47, %v6150_v26  ;;  %v1241_v59 = vsub.f32 %v985_v30, %v1113_v37  ;;  %v4252_v14 = vld [vmem:[%s2438_s16 + $0x2e0] sm:$0xff]  ;;  %v6152_v15 = vld [vmem:[#allocation101_spill] sm:$0xff]  ;;  %v6154_v16 = vld [vmem:[#allocation104_spill] sm:$0xff]  ;;  %1369 = vst.msk [vmem:[%s2519_s24 + $0x2c0] sm:$0xff] %vm1280_vm0, %v1240_v51  ;;  %v1115_v29 = vmul.f32 %v4249_v2, %v4229_v0 }
  0xcc   : > { %v6153_v28 = vld [vmem:[#allocation102_spill] sm:$0xff]  ;;  %v6155_v46 = vld [vmem:[#allocation105_spill] sm:$0xff]  ;;  %v1710_v9 = vadd.f32 %v1582_v61, %v1454_v21  ;;  %v1242_v56 = vsub.f32 %v986_v18, %v1114_v32  ;;  %v4288_v25 = vld [vmem:[%s2438_s16 + $0x2e8] sm:$0xff] }
  0xcd   : > { %v1583_v5 = vmul.f32 %v6153_v28, %v6152_v15  ;;  %v1456_v55 = vmul.f32 %v6155_v46, %v6154_v16  ;;  %v4267_v27 = vld [vmem:[%s2444_s22 + $0x2e0] sm:$0xff]  ;;  %v6157_v35 = vld [vmem:[#allocation5_spill] sm:$0xff]  ;;  %1370 = vst.msk [vmem:[%s2519_s24 + $0x2c8] sm:$0xff] %vm1280_vm0, %v1241_v59  ;;  %v4291_v40 = vld [vmem:[%s2444_s22 + $0x2e8] sm:$0xff]  ;;  %v1243_v39 = vsub.f32 %v987_v52, %v1115_v29 }
  0xce   : > { %v4272_v60 = vld [vmem:[%s5708_s2 + $0x2e0] sm:$0xff]  ;;  %v4296_v22 = vld [vmem:[%s5708_s2 + $0x2e8] sm:$0xff]  ;;  %v4306_v58 = vld [vmem:[%s2438_s16 + $0x2f0] sm:$0xff]  ;;  %1838 = vst.msk [vmem:[%s3185_s25 + $0x168] sm:$0xff] %vm1280_vm0, %v1710_v9 }
  0xcf   : > { %v4277_v23 = vld [vmem:[%s5709_s3 + $0x2e0] sm:$0xff]  ;;  %v988_v4 = vmul.f32 %v4272_v60, %v4252_v14  ;;  %v1711_v1 = vadd.f32 %v1583_v5, %v1455_v53  ;;  %v4301_v7 = vld [vmem:[%s5709_s3 + $0x2e8] sm:$0xff]  ;;  %v989_v10 = vmul.f32 %v4296_v22, %v4288_v25  ;;  %v4309_v3 = vld [vmem:[%s2444_s22 + $0x2f0] sm:$0xff]  ;;  %1371 = vst.msk [vmem:[%s2519_s24 + $0x2d0] sm:$0xff] %vm1280_vm0, %v1242_v56 }
  0xd0   : > { %v6156_v6 = vld [vmem:[#allocation2_spill] sm:$0xff]  ;;  %v1116_v24 = vmul.f32 %v4277_v23, %v4267_v27  ;;  %v6158_v19 = vld [vmem:[#allocation3_spill] sm:$0xff]  ;;  %v6159_v30 = vld [vmem:[#allocation4_spill] sm:$0xff]  ;;  %v1117_v51 = vmul.f32 %v4301_v7, %v4291_v40  ;;  %1372 = vst.msk [vmem:[%s2519_s24 + $0x2d8] sm:$0xff] %vm1280_vm0, %v1243_v39 }
  0xd1   : > { %v1584_v31 = vmul.f32 %v6157_v35, %v6156_v6  ;;  %v1457_v37 = vmul.f32 %v6159_v30, %v6158_v19  ;;  %v4322_v18 = vld [vmem:[%s5708_s2 + $0x2f0] sm:$0xff]  ;;  %v4330_v50 = vld [vmem:[%s2438_s16 + $0x2f8] sm:$0xff]  ;;  %1839 = vst.msk [vmem:[%s3185_s25 + $0x170] sm:$0xff] %vm1280_vm0, %v1711_v1  ;;  %v2169_v61 = vld [vmem:[%s2444_s22 + $0x180] sm:$0xff] }
  0xd2   : > { %v1244_v17 = vsub.f32 %v988_v4, %v1116_v24  ;;  %v4327_v33 = vld [vmem:[%s5709_s3 + $0x2f0] sm:$0xff]  ;;  %v2170_v26 = vld [vmem:[%s5708_s2 + $0x180] sm:$0xff]  ;;  %v2171_v53 = vld [vmem:[%s2438_s16 + $0x188] sm:$0xff]  ;;  %v990_v15 = vmul.f32 %v4322_v18, %v4306_v58 }
  0xd3   : > { %v1712_v21 = vadd.f32 %v1584_v31, %v1456_v55  ;;  %v1585_v47 = vmul.f32 %v2170_v26, %v2169_v61  ;;  %v6160_v59 = vld [vmem:[#allocation6_spill] sm:$0xff]  ;;  %v1118_v28 = vmul.f32 %v4327_v33, %v4309_v3  ;;  %v4347_v5 = vld [vmem:[%s2444_s22 + $0x2f8] sm:$0xff]  ;;  %v2172_v55 = vld [vmem:[%s2444_s22 + $0x188] sm:$0xff]  ;;  %v1245_v31 = vsub.f32 %v989_v10, %v1117_v51 }
  0xd4   : > { %v1458_v32 = vmul.f32 %v2171_v53, %v6160_v59  ;;  %v4352_v16 = vld [vmem:[%s5708_s2 + $0x2f8] sm:$0xff]  ;;  %v2173_v52 = vld [vmem:[%s5708_s2 + $0x188] sm:$0xff]  ;;  %v2174_v9 = vld [vmem:[%s2438_s16 + $0x190] sm:$0xff]  ;;  %1373 = vst.msk [vmem:[%s2519_s24 + $0x2e0] sm:$0xff] %vm1280_vm0, %v1244_v17 }
  0xd5   : > { %v4357_v46 = vld [vmem:[%s5709_s3 + $0x2f8] sm:$0xff]  ;;  %1840 = vst.msk [vmem:[%s3185_s25 + $0x178] sm:$0xff] %vm1280_vm0, %v1712_v21  ;;  %v1586_v29 = vmul.f32 %v2173_v52, %v2172_v55  ;;  %v991_v56 = vmul.f32 %v4352_v16, %v4330_v50  ;;  %v4374_v24 = vld [vmem:[%s2438_s16 + $0x300] sm:$0xff]  ;;  %v1713_v21 = vadd.f32 %v1585_v47, %v1457_v37  ;;  %v1246_v10 = vsub.f32 %v990_v15, %v1118_v28  ;;  %v4392_v17 = vld [vmem:[%s2438_s16 + $0x308] sm:$0xff] }
  0xd6   : > { %v6161_v6 = vld [vmem:[#allocation9_spill] sm:$0xff]  ;;  %v1119_v4 = vmul.f32 %v4357_v46, %v4347_v5  ;;  %v4377_v1 = vld [vmem:[%s2444_s22 + $0x300] sm:$0xff]  ;;  %v4395_v51 = vld [vmem:[%s2444_s22 + $0x308] sm:$0xff]  ;;  %1374 = vst.msk [vmem:[%s2519_s24 + $0x2e8] sm:$0xff] %vm1280_vm0, %v1245_v31 }
  0xd7   : > { %v1459_v35 = vmul.f32 %v2174_v9, %v6161_v6  ;;  %v4382_v39 = vld [vmem:[%s5708_s2 + $0x300] sm:$0xff]  ;;  %6162 = vst [vmem:[#allocation7_spill] sm:$0xff] %v4395_v51  ;;  %v1714_v61 = vadd.f32 %v1586_v29, %v1458_v32  ;;  %v2175_v26 = vld [vmem:[%s2444_s22 + $0x190] sm:$0xff]  ;;  %v4408_v15 = vld [vmem:[%s5708_s2 + $0x308] sm:$0xff] }
  0xd8   : > { %v4387_v19 = vld [vmem:[%s5709_s3 + $0x300] sm:$0xff]  ;;  %v992_v30 = vmul.f32 %v4382_v39, %v4374_v24  ;;  %v2176_v37 = vld [vmem:[%s5708_s2 + $0x190] sm:$0xff]  ;;  %v1247_v53 = vsub.f32 %v991_v56, %v1119_v4  ;;  %6163 = vst [vmem:[#allocation8_spill] sm:$0xff] %v4408_v15  ;;  %v4413_v32 = vld [vmem:[%s5709_s3 + $0x308] sm:$0xff]  ;;  %v993_v56 = vmul.f32 %v4408_v15, %v4392_v17 }
  0xd9   : > { %v1587_v47 = vmul.f32 %v2176_v37, %v2175_v26  ;;  %v1120_v59 = vmul.f32 %v4387_v19, %v4377_v1  ;;  %6164 = vst [vmem:[#allocation10_spill] sm:$0xff] %v4413_v32  ;;  %v4416_v28 = vld [vmem:[%s2438_s16 + $0x310] sm:$0xff]  ;;  %1841 = vst.msk [vmem:[%s3185_s25 + $0x180] sm:$0xff] %vm1280_vm0, %v1713_v21  ;;  %v2177_v55 = vld [vmem:[%s2438_s16 + $0x198] sm:$0xff]  ;;  %v1121_v4 = vmul.f32 %v4413_v32, %v4395_v51 }
  0xda   : > { %6165 = vst [vmem:[#allocation13_spill] sm:$0xff] %v4416_v28  ;;  %v2178_v52 = vld [vmem:[%s5709_s3 + $0x198] sm:$0xff]  ;;  %1375 = vst.msk [vmem:[%s2519_s24 + $0x2f0] sm:$0xff] %vm1280_vm0, %v1246_v10  ;;  %v4435_v21 = vld [vmem:[%s2444_s22 + $0x310] sm:$0xff] }
  0xdb   : > { %v1460_v29 = vmul.f32 %v2178_v52, %v2177_v55  ;;  %v2179_v9 = vld [vmem:[%s2444_s22 + $0x198] sm:$0xff]  ;;  %6166 = vst [vmem:[#allocation11_spill] sm:$0xff] %v4435_v21  ;;  %v4440_v26 = vld [vmem:[%s5708_s2 + $0x310] sm:$0xff]  ;;  %1842 = vst.msk [vmem:[%s3185_s25 + $0x188] sm:$0xff] %vm1280_vm0, %v1714_v61  ;;  %v1715_v10 = vadd.f32 %v1587_v47, %v1459_v35 }
  0xdc   : > { %v2180_v6 = vld [vmem:[%s5708_s2 + $0x198] sm:$0xff]  ;;  %6167 = vst [vmem:[#allocation12_spill] sm:$0xff] %v4440_v26  ;;  %v4445_v37 = vld [vmem:[%s5709_s3 + $0x310] sm:$0xff]  ;;  %v2181_v55 = vld [vmem:[%s2438_s16 + $0x1a0] sm:$0xff]  ;;  %v994_v15 = vmul.f32 %v4440_v26, %v4416_v28 }
  0xdd   : > { %v1588_v31 = vmul.f32 %v2180_v6, %v2179_v9  ;;  %6168 = vst [vmem:[#allocation14_spill] sm:$0xff] %v4445_v37  ;;  %v2182_v52 = vld [vmem:[%s5709_s3 + $0x1a0] sm:$0xff]  ;;  %1376 = vst.msk [vmem:[%s2519_s24 + $0x2f8] sm:$0xff] %vm1280_vm0, %v1247_v53  ;;  %v1248_v6 = vsub.f32 %v992_v30, %v1120_v59  ;;  %v1122_v61 = vmul.f32 %v4445_v37, %v4435_v21  ;;  %v4460_v35 = vld [vmem:[%s2438_s16 + $0x318] sm:$0xff] }
  0xde   : > { %v1461_v9 = vmul.f32 %v2182_v52, %v2181_v55  ;;  %6169 = vst [vmem:[#allocation17_spill] sm:$0xff] %v4460_v35  ;;  %v4463_v47 = vld [vmem:[%s2444_s22 + $0x318] sm:$0xff]  ;;  %v1249_v53 = vsub.f32 %v993_v56, %v1121_v4  ;;  %v4478_v52 = vld [vmem:[%s2438_s16 + $0x320] sm:$0xff]  ;;  %1843 = vst.msk [vmem:[%s3185_s25 + $0x190] sm:$0xff] %vm1280_vm0, %v1715_v10 }
  0xdf   : > { %6170 = vst [vmem:[#allocation15_spill] sm:$0xff] %v4463_v47  ;;  %v4468_v51 = vld [vmem:[%s5708_s2 + $0x318] sm:$0xff]  ;;  %v1716_v55 = vadd.f32 %v1588_v31, %v1460_v29  ;;  %6173 = vst [vmem:[#allocation21_spill] sm:$0xff] %v4478_v52  ;;  %v4481_v26 = vld [vmem:[%s2444_s22 + $0x320] sm:$0xff] }
  0xe0   : > { %6171 = vst [vmem:[#allocation16_spill] sm:$0xff] %v4468_v51  ;;  %v4473_v30 = vld [vmem:[%s5709_s3 + $0x318] sm:$0xff]  ;;  %v995_v59 = vmul.f32 %v4468_v51, %v4460_v35  ;;  %6174 = vst [vmem:[#allocation19_spill] sm:$0xff] %v4481_v26  ;;  %v2183_v21 = vld [vmem:[%s2444_s22 + $0x1a0] sm:$0xff]  ;;  %v1250_v35 = vsub.f32 %v994_v15, %v1122_v61 }
  0xe1   : > { %6172 = vst [vmem:[#allocation18_spill] sm:$0xff] %v4473_v30  ;;  %v2184_v29 = vld [vmem:[%s5708_s2 + $0x1a0] sm:$0xff]  ;;  %v2185_v56 = vld [vmem:[%s2438_s16 + $0x1a8] sm:$0xff]  ;;  %1377 = vst.msk [vmem:[%s2519_s24 + $0x300] sm:$0xff] %vm1280_vm0, %v1248_v6  ;;  %v1123_v10 = vmul.f32 %v4473_v30, %v4463_v47 }
  0xe2   : > { %v1589_v31 = vmul.f32 %v2184_v29, %v2183_v21  ;;  %v2186_v4 = vld [vmem:[%s5709_s3 + $0x1a8] sm:$0xff]  ;;  %v4500_v37 = vld [vmem:[%s5708_s2 + $0x320] sm:$0xff]  ;;  %1844 = vst.msk [vmem:[%s3185_s25 + $0x198] sm:$0xff] %vm1280_vm0, %v1716_v55  ;;  %1378 = vst.msk [vmem:[%s2519_s24 + $0x308] sm:$0xff] %vm1280_vm0, %v1249_v53 }
  0xe3   : > { %v1462_v51 = vmul.f32 %v2186_v4, %v2185_v56  ;;  %6175 = vst [vmem:[#allocation20_spill] sm:$0xff] %v4500_v37  ;;  %v4505_v21 = vld [vmem:[%s5709_s3 + $0x320] sm:$0xff]  ;;  %v4508_v29 = vld [vmem:[%s2438_s16 + $0x328] sm:$0xff]  ;;  %v2189_v56 = vld [vmem:[%s2438_s16 + $0x1b0] sm:$0xff]  ;;  %v996_v55 = vmul.f32 %v4500_v37, %v4478_v52 }
  0xe4   : > { %6176 = vst [vmem:[#allocation22_spill] sm:$0xff] %v4505_v21  ;;  %6177 = vst [vmem:[#allocation25_spill] sm:$0xff] %v4508_v29  ;;  %v2187_v6 = vld [vmem:[%s2444_s22 + $0x1a8] sm:$0xff]  ;;  %v2190_v4 = vld [vmem:[%s5709_s3 + $0x1b0] sm:$0xff]  ;;  %v1124_v30 = vmul.f32 %v4505_v21, %v4481_v26  ;;  %v1717_v53 = vadd.f32 %v1589_v31, %v1461_v9  ;;  %v1251_v26 = vsub.f32 %v995_v59, %v1123_v10 }
  0xe5   : > { %v2188_v15 = vld [vmem:[%s5708_s2 + $0x1a8] sm:$0xff]  ;;  %v1463_v47 = vmul.f32 %v2190_v4, %v2189_v56  ;;  %v2191_v56 = vld [vmem:[%s2444_s22 + $0x1b0] sm:$0xff]  ;;  %1379 = vst.msk [vmem:[%s2519_s24 + $0x310] sm:$0xff] %vm1280_vm0, %v1250_v35 }
  0xe6   : > { %v1590_v61 = vmul.f32 %v2188_v15, %v2187_v6  ;;  %v4527_v28 = vld [vmem:[%s2444_s22 + $0x328] sm:$0xff]  ;;  %v2192_v4 = vld [vmem:[%s5708_s2 + $0x1b0] sm:$0xff]  ;;  %v1252_v35 = vsub.f32 %v996_v55, %v1124_v30  ;;  %1845 = vst.msk [vmem:[%s3185_s25 + $0x1a0] sm:$0xff] %vm1280_vm0, %v1717_v53  ;;  %v2194_v30 = vld [vmem:[%s5709_s3 + $0x1b8] sm:$0xff] }
  0xe7   : > { %6178 = vst [vmem:[#allocation23_spill] sm:$0xff] %v4527_v28  ;;  %v4532_v6 = vld [vmem:[%s5708_s2 + $0x328] sm:$0xff]  ;;  %v1591_v37 = vmul.f32 %v2192_v4, %v2191_v56  ;;  %v4550_v9 = vld [vmem:[%s2438_s16 + $0x330] sm:$0xff]  ;;  %v4568_v4 = vld [vmem:[%s2438_s16 + $0x338] sm:$0xff] }
  0xe8   : > { %6179 = vst [vmem:[#allocation24_spill] sm:$0xff] %v4532_v6  ;;  %v4537_v15 = vld [vmem:[%s5709_s3 + $0x328] sm:$0xff]  ;;  %v997_v21 = vmul.f32 %v4532_v6, %v4508_v29  ;;  %6181 = vst [vmem:[#allocation29_spill] sm:$0xff] %v4550_v9  ;;  %v4553_v31 = vld [vmem:[%s2444_s22 + $0x330] sm:$0xff]  ;;  %v1718_v56 = vadd.f32 %v1590_v61, %v1462_v51 }
  0xe9   : > { %6180 = vst [vmem:[#allocation26_spill] sm:$0xff] %v4537_v15  ;;  %v1125_v52 = vmul.f32 %v4537_v15, %v4527_v28  ;;  %6182 = vst [vmem:[#allocation27_spill] sm:$0xff] %v4553_v31  ;;  %v4558_v32 = vld [vmem:[%s5708_s2 + $0x330] sm:$0xff]  ;;  %v4571_v6 = vld [vmem:[%s2444_s22 + $0x338] sm:$0xff]  ;;  %v1719_v51 = vadd.f32 %v1591_v37, %v1463_v47 }
  0xea   : > { %6183 = vst [vmem:[#allocation28_spill] sm:$0xff] %v4558_v32  ;;  %v4563_v59 = vld [vmem:[%s5709_s3 + $0x330] sm:$0xff]  ;;  %v998_v10 = vmul.f32 %v4558_v32, %v4550_v9  ;;  %6185 = vst [vmem:[#allocation33_spill] sm:$0xff] %v4568_v4  ;;  %v2193_v61 = vld [vmem:[%s2438_s16 + $0x1b8] sm:$0xff] }
  0xeb   : > { %6184 = vst [vmem:[#allocation30_spill] sm:$0xff] %v4563_v59  ;;  %6186 = vst [vmem:[#allocation31_spill] sm:$0xff] %v4571_v6  ;;  %v1464_v55 = vmul.f32 %v2194_v30, %v2193_v61  ;;  %v1253_v28 = vsub.f32 %v997_v21, %v1125_v52  ;;  %v1126_v32 = vmul.f32 %v4563_v59, %v4553_v31  ;;  %v4586_v9 = vld [vmem:[%s5708_s2 + $0x338] sm:$0xff]  ;;  %v4594_v47 = vld [vmem:[%s2438_s16 + $0x340] sm:$0xff] }
  0xec   : > { %1380 = vst.msk [vmem:[%s2519_s24 + $0x318] sm:$0xff] %vm1280_vm0, %v1251_v26  ;;  %6187 = vst [vmem:[#allocation32_spill] sm:$0xff] %v4586_v9  ;;  %v4591_v37 = vld [vmem:[%s5709_s3 + $0x338] sm:$0xff]  ;;  %v2197_v53 = vld [vmem:[%s2438_s16 + $0x1c0] sm:$0xff]  ;;  %v999_v31 = vmul.f32 %v4586_v9, %v4568_v4 }
  0xed   : > { %6188 = vst [vmem:[#allocation34_spill] sm:$0xff] %v4591_v37  ;;  %6189 = vst [vmem:[#allocation37_spill] sm:$0xff] %v4594_v47  ;;  %v2195_v26 = vld [vmem:[%s2444_s22 + $0x1b8] sm:$0xff]  ;;  %v2198_v61 = vld [vmem:[%s5709_s3 + $0x1c0] sm:$0xff]  ;;  %v1254_v4 = vsub.f32 %v998_v10, %v1126_v32 }
  0xee   : > { %1846 = vst.msk [vmem:[%s3185_s25 + $0x1a8] sm:$0xff] %vm1280_vm0, %v1718_v56  ;;  %v2196_v52 = vld [vmem:[%s5708_s2 + $0x1b8] sm:$0xff]  ;;  %v1465_v30 = vmul.f32 %v2198_v61, %v2197_v53  ;;  %1381 = vst.msk [vmem:[%s2519_s24 + $0x320] sm:$0xff] %vm1280_vm0, %v1252_v35  ;;  %v1127_v56 = vmul.f32 %v4591_v37, %v4571_v6  ;;  %v4613_v59 = vld [vmem:[%s2444_s22 + $0x340] sm:$0xff] }
  0xef   : > { %v1592_v21 = vmul.f32 %v2196_v52, %v2195_v26  ;;  %6190 = vst [vmem:[#allocation35_spill] sm:$0xff] %v4613_v59  ;;  %v4618_v26 = vld [vmem:[%s5708_s2 + $0x340] sm:$0xff]  ;;  %1847 = vst.msk [vmem:[%s3185_s25 + $0x1b0] sm:$0xff] %vm1280_vm0, %v1719_v51  ;;  %v2201_v9 = vld [vmem:[%s2438_s16 + $0x1c8] sm:$0xff] }
  0xf0   : > { %6191 = vst [vmem:[#allocation36_spill] sm:$0xff] %v4618_v26  ;;  %v4623_v52 = vld [vmem:[%s5709_s3 + $0x340] sm:$0xff]  ;;  %v2202_v6 = vld [vmem:[%s5709_s3 + $0x1c8] sm:$0xff]  ;;  %1382 = vst.msk [vmem:[%s2519_s24 + $0x328] sm:$0xff] %vm1280_vm0, %v1253_v28  ;;  %v1000_v51 = vmul.f32 %v4618_v26, %v4594_v47  ;;  %v1255_v32 = vsub.f32 %v999_v31, %v1127_v56 }
  0xf1   : > { %6192 = vst [vmem:[#allocation38_spill] sm:$0xff] %v4623_v52  ;;  %v2199_v35 = vld [vmem:[%s2444_s22 + $0x1c0] sm:$0xff]  ;;  %v1466_v37 = vmul.f32 %v2202_v6, %v2201_v9  ;;  %v1128_v15 = vmul.f32 %v4623_v52, %v4613_v59  ;;  %v4642_v29 = vld [vmem:[%s2438_s16 + $0x348] sm:$0xff]  ;;  %v1720_v6 = vadd.f32 %v1592_v21, %v1464_v55  ;;  %v4660_v10 = vld [vmem:[%s2438_s16 + $0x350] sm:$0xff] }
  0xf2   : > { %v2200_v53 = vld [vmem:[%s5708_s2 + $0x1c0] sm:$0xff]  ;;  %6193 = vst [vmem:[#allocation41_spill] sm:$0xff] %v4642_v29  ;;  %v4655_v28 = vld [vmem:[%s5709_s3 + $0x348] sm:$0xff]  ;;  %6197 = vst [vmem:[#allocation45_spill] sm:$0xff] %v4660_v10 }
  0xf3   : > { %v1593_v61 = vmul.f32 %v2200_v53, %v2199_v35  ;;  %v4645_v35 = vld [vmem:[%s2444_s22 + $0x348] sm:$0xff]  ;;  %6196 = vst [vmem:[#allocation42_spill] sm:$0xff] %v4655_v28  ;;  %v4663_v26 = vld [vmem:[%s2444_s22 + $0x350] sm:$0xff]  ;;  %1383 = vst.msk [vmem:[%s2519_s24 + $0x330] sm:$0xff] %vm1280_vm0, %v1254_v4  ;;  %v1256_v21 = vsub.f32 %v1000_v51, %v1128_v15 }
  0xf4   : > { %6194 = vst [vmem:[#allocation39_spill] sm:$0xff] %v4645_v35  ;;  %v4650_v53 = vld [vmem:[%s5708_s2 + $0x348] sm:$0xff]  ;;  %6198 = vst [vmem:[#allocation43_spill] sm:$0xff] %v4663_v26  ;;  %v1129_v56 = vmul.f32 %v4655_v28, %v4645_v35  ;;  %v2205_v15 = vld [vmem:[%s2438_s16 + $0x1d0] sm:$0xff] }
  0xf5   : > { %6195 = vst [vmem:[#allocation40_spill] sm:$0xff] %v4650_v53  ;;  %v1001_v9 = vmul.f32 %v4650_v53, %v4642_v29  ;;  %v1721_v59 = vadd.f32 %v1593_v61, %v1465_v30  ;;  %v2203_v52 = vld [vmem:[%s2444_s22 + $0x1c8] sm:$0xff]  ;;  %v4676_v53 = vld [vmem:[%s5708_s2 + $0x350] sm:$0xff]  ;;  %v4684_v61 = vld [vmem:[%s2438_s16 + $0x358] sm:$0xff] }
  0xf6   : > { %v2204_v31 = vld [vmem:[%s5708_s2 + $0x1c8] sm:$0xff]  ;;  %6199 = vst [vmem:[#allocation44_spill] sm:$0xff] %v4676_v53  ;;  %v4681_v30 = vld [vmem:[%s5709_s3 + $0x350] sm:$0xff]  ;;  %6201 = vst [vmem:[#allocation49_spill] sm:$0xff] %v4684_v61 }
  0xf7   : > { %v1594_v55 = vmul.f32 %v2204_v31, %v2203_v52  ;;  %6200 = vst [vmem:[#allocation46_spill] sm:$0xff] %v4681_v30  ;;  %1848 = vst.msk [vmem:[%s3185_s25 + $0x1b8] sm:$0xff] %vm1280_vm0, %v1720_v6  ;;  %v2206_v4 = vld [vmem:[%s5709_s3 + $0x1d0] sm:$0xff]  ;;  %v1002_v6 = vmul.f32 %v4676_v53, %v4660_v10  ;;  %v1130_v28 = vmul.f32 %v4681_v30, %v4663_v26  ;;  %v4703_v29 = vld [vmem:[%s2444_s22 + $0x358] sm:$0xff] }
  0xf8   : > { %v1467_v52 = vmul.f32 %v2206_v4, %v2205_v15  ;;  %v2207_v51 = vld [vmem:[%s2444_s22 + $0x1d0] sm:$0xff]  ;;  %1384 = vst.msk [vmem:[%s2519_s24 + $0x338] sm:$0xff] %vm1280_vm0, %v1255_v32  ;;  %6202 = vst [vmem:[#allocation47_spill] sm:$0xff] %v4703_v29  ;;  %v4708_v15 = vld [vmem:[%s5708_s2 + $0x358] sm:$0xff]  ;;  %v1257_v26 = vsub.f32 %v1001_v9, %v1129_v56 }
  0xf9   : > { %v2208_v31 = vld [vmem:[%s5708_s2 + $0x1d0] sm:$0xff]  ;;  %6203 = vst [vmem:[#allocation48_spill] sm:$0xff] %v4708_v15  ;;  %v4713_v4 = vld [vmem:[%s5709_s3 + $0x358] sm:$0xff]  ;;  %1849 = vst.msk [vmem:[%s3185_s25 + $0x1c0] sm:$0xff] %vm1280_vm0, %v1721_v59  ;;  %v1722_v32 = vadd.f32 %v1594_v55, %v1466_v37  ;;  %v1003_v30 = vmul.f32 %v4708_v15, %v4684_v61 }
  0xfa   : > { %v1595_v35 = vmul.f32 %v2208_v31, %v2207_v51  ;;  %6204 = vst [vmem:[#allocation50_spill] sm:$0xff] %v4713_v4  ;;  %v2209_v51 = vld [vmem:[%s2438_s16 + $0x1d8] sm:$0xff]  ;;  %1385 = vst.msk [vmem:[%s2519_s24 + $0x340] sm:$0xff] %vm1280_vm0, %v1256_v21  ;;  %v1131_v59 = vmul.f32 %v4713_v4, %v4703_v29  ;;  %v4728_v37 = vld [vmem:[%s2438_s16 + $0x360] sm:$0xff]  ;;  %v1258_v21 = vsub.f32 %v1002_v6, %v1130_v28 }
  0xfb   : > { %v2210_v31 = vld [vmem:[%s5709_s3 + $0x1d8] sm:$0xff]  ;;  %6205 = vst [vmem:[#allocation53_spill] sm:$0xff] %v4728_v37  ;;  %v4731_v55 = vld [vmem:[%s2444_s22 + $0x360] sm:$0xff]  ;;  %v4749_v15 = vld [vmem:[%s2444_s22 + $0x368] sm:$0xff] }
  0xfc   : > { %v1468_v53 = vmul.f32 %v2210_v31, %v2209_v51  ;;  %6206 = vst [vmem:[#allocation51_spill] sm:$0xff] %v4731_v55  ;;  %v4736_v10 = vld [vmem:[%s5708_s2 + $0x360] sm:$0xff]  ;;  %v1723_v51 = vadd.f32 %v1595_v35, %v1467_v52  ;;  %v4746_v31 = vld [vmem:[%s2438_s16 + $0x368] sm:$0xff]  ;;  %6210 = vst [vmem:[#allocation55_spill] sm:$0xff] %v4749_v15 }
  0xfd   : > { %6207 = vst [vmem:[#allocation52_spill] sm:$0xff] %v4736_v10  ;;  %v4741_v9 = vld [vmem:[%s5709_s3 + $0x360] sm:$0xff]  ;;  %v1004_v56 = vmul.f32 %v4736_v10, %v4728_v37  ;;  %6209 = vst [vmem:[#allocation57_spill] sm:$0xff] %v4746_v31  ;;  %v2211_v29 = vld [vmem:[%s2444_s22 + $0x1d8] sm:$0xff]  ;;  %v1259_v37 = vsub.f32 %v1003_v30, %v1131_v59 }
  0xfe   : > { %6208 = vst [vmem:[#allocation54_spill] sm:$0xff] %v4741_v9  ;;  %1850 = vst.msk [vmem:[%s3185_s25 + $0x1c8] sm:$0xff] %vm1280_vm0, %v1722_v32  ;;  %v2212_v35 = vld [vmem:[%s5708_s2 + $0x1d8] sm:$0xff]  ;;  %v2213_v52 = vld [vmem:[%s2438_s16 + $0x1e0] sm:$0xff]  ;;  %v1132_v32 = vmul.f32 %v4741_v9, %v4731_v55 }
  0xff   : > { %v1596_v28 = vmul.f32 %v2212_v35, %v2211_v29  ;;  %v2214_v6 = vld [vmem:[%s5709_s3 + $0x1e0] sm:$0xff]  ;;  %1386 = vst.msk [vmem:[%s2519_s24 + $0x348] sm:$0xff] %vm1280_vm0, %v1257_v26  ;;  %v4768_v4 = vld [vmem:[%s5708_s2 + $0x368] sm:$0xff]  ;;  %v4776_v35 = vld [vmem:[%s2438_s16 + $0x370] sm:$0xff] }
 0x100   : > { %v1469_v10 = vmul.f32 %v2214_v6, %v2213_v52  ;;  %6211 = vst [vmem:[#allocation56_spill] sm:$0xff] %v4768_v4  ;;  %v4773_v29 = vld [vmem:[%s5709_s3 + $0x368] sm:$0xff]  ;;  %6213 = vst [vmem:[#allocation61_spill] sm:$0xff] %v4776_v35  ;;  %v2215_v26 = vld [vmem:[%s2444_s22 + $0x1e0] sm:$0xff] }
 0x101   : > { %6212 = vst [vmem:[#allocation58_spill] sm:$0xff] %v4773_v29  ;;  %1851 = vst.msk [vmem:[%s3185_s25 + $0x1d0] sm:$0xff] %vm1280_vm0, %v1723_v51  ;;  %v2216_v30 = vld [vmem:[%s5708_s2 + $0x1e0] sm:$0xff]  ;;  %v2217_v52 = vld [vmem:[%s2438_s16 + $0x1e8] sm:$0xff]  ;;  %v1005_v51 = vmul.f32 %v4768_v4, %v4746_v31  ;;  %v1133_v9 = vmul.f32 %v4773_v29, %v4749_v15  ;;  %v1260_v15 = vsub.f32 %v1004_v56, %v1132_v32 }
 0x102   : > { %v1597_v59 = vmul.f32 %v2216_v30, %v2215_v26  ;;  %v2218_v6 = vld [vmem:[%s5709_s3 + $0x1e8] sm:$0xff]  ;;  %1387 = vst.msk [vmem:[%s2519_s24 + $0x350] sm:$0xff] %vm1280_vm0, %v1258_v21  ;;  %v4795_v61 = vld [vmem:[%s2444_s22 + $0x370] sm:$0xff]  ;;  %v1724_v21 = vadd.f32 %v1596_v28, %v1468_v53  ;;  %1388 = vst.msk [vmem:[%s2519_s24 + $0x358] sm:$0xff] %vm1280_vm0, %v1259_v37 }
 0x103   : > { %v1470_v55 = vmul.f32 %v2218_v6, %v2217_v52  ;;  %6214 = vst [vmem:[#allocation59_spill] sm:$0xff] %v4795_v61  ;;  %v4800_v26 = vld [vmem:[%s5708_s2 + $0x370] sm:$0xff]  ;;  %v2219_v52 = vld [vmem:[%s2444_s22 + $0x1e8] sm:$0xff]  ;;  %v4818_v53 = vld [vmem:[%s2438_s16 + $0x378] sm:$0xff]  ;;  %v1261_v37 = vsub.f32 %v1005_v51, %v1133_v9 }
 0x104   : > { %6215 = vst [vmem:[#allocation60_spill] sm:$0xff] %v4800_v26  ;;  %v4805_v30 = vld [vmem:[%s5709_s3 + $0x370] sm:$0xff]  ;;  %v2220_v6 = vld [vmem:[%s5708_s2 + $0x1e8] sm:$0xff]  ;;  %v1006_v29 = vmul.f32 %v4800_v26, %v4776_v35  ;;  %6217 = vst [vmem:[#allocation65_spill] sm:$0xff] %v4818_v53 }
 0x105   : > { %6216 = vst [vmem:[#allocation62_spill] sm:$0xff] %v4805_v30  ;;  %v1598_v4 = vmul.f32 %v2220_v6, %v2219_v52  ;;  %v1134_v31 = vmul.f32 %v4805_v30, %v4795_v61  ;;  %v4821_v28 = vld [vmem:[%s2444_s22 + $0x378] sm:$0xff]  ;;  %v1725_v52 = vadd.f32 %v1597_v59, %v1469_v10  ;;  %v4836_v6 = vld [vmem:[%s2438_s16 + $0x380] sm:$0xff]  ;;  %1852 = vst.msk [vmem:[%s3185_s25 + $0x1d8] sm:$0xff] %vm1280_vm0, %v1724_v21 }
 0x106   : > { %6218 = vst [vmem:[#allocation63_spill] sm:$0xff] %v4821_v28  ;;  %v4826_v47 = vld [vmem:[%s5708_s2 + $0x378] sm:$0xff]  ;;  %6221 = vst [vmem:[#allocation69_spill] sm:$0xff] %v4836_v6  ;;  %v4839_v26 = vld [vmem:[%s2444_s22 + $0x380] sm:$0xff] }
 0x107   : > { %6219 = vst [vmem:[#allocation64_spill] sm:$0xff] %v4826_v47  ;;  %v4831_v56 = vld [vmem:[%s5709_s3 + $0x378] sm:$0xff]  ;;  %v1007_v32 = vmul.f32 %v4826_v47, %v4818_v53  ;;  %6222 = vst [vmem:[#allocation67_spill] sm:$0xff] %v4839_v26  ;;  %v1726_v10 = vadd.f32 %v1598_v4, %v1470_v55  ;;  %v2221_v59 = vld [vmem:[%s2438_s16 + $0x1f0] sm:$0xff]  ;;  %v1262_v61 = vsub.f32 %v1006_v29, %v1134_v31 }
 0x108   : > { %6220 = vst [vmem:[#allocation66_spill] sm:$0xff] %v4831_v56  ;;  %v2222_v9 = vld [vmem:[%s5709_s3 + $0x1f0] sm:$0xff]  ;;  %1389 = vst.msk [vmem:[%s2519_s24 + $0x360] sm:$0xff] %vm1280_vm0, %v1260_v15  ;;  %v1135_v47 = vmul.f32 %v4831_v56, %v4821_v28  ;;  %v4854_v53 = vld [vmem:[%s5708_s2 + $0x380] sm:$0xff] }
 0x109   : > { %v1471_v51 = vmul.f32 %v2222_v9, %v2221_v59  ;;  %6223 = vst [vmem:[#allocation68_spill] sm:$0xff] %v4854_v53  ;;  %v4859_v4 = vld [vmem:[%s5709_s3 + $0x380] sm:$0xff]  ;;  %v4862_v55 = vld [vmem:[%s2438_s16 + $0x388] sm:$0xff]  ;;  %1853 = vst.msk [vmem:[%s3185_s25 + $0x1e0] sm:$0xff] %vm1280_vm0, %v1725_v52  ;;  %v1008_v28 = vmul.f32 %v4854_v53, %v4836_v6 }
 0x10a   : > { %6224 = vst [vmem:[#allocation70_spill] sm:$0xff] %v4859_v4  ;;  %6225 = vst [vmem:[#allocation73_spill] sm:$0xff] %v4862_v55  ;;  %v2223_v15 = vld [vmem:[%s2444_s22 + $0x1f0] sm:$0xff]  ;;  %v2225_v21 = vld [vmem:[%s2438_s16 + $0x1f8] sm:$0xff]  ;;  %v1136_v52 = vmul.f32 %v4859_v4, %v4839_v26  ;;  %v1263_v6 = vsub.f32 %v1007_v32, %v1135_v47 }
 0x10b   : > { %v2224_v31 = vld [vmem:[%s5708_s2 + $0x1f0] sm:$0xff]  ;;  %v2226_v59 = vld [vmem:[%s5709_s3 + $0x1f8] sm:$0xff]  ;;  %1390 = vst.msk [vmem:[%s2519_s24 + $0x368] sm:$0xff] %vm1280_vm0, %v1261_v37  ;;  %v4881_v56 = vld [vmem:[%s2444_s22 + $0x388] sm:$0xff] }
 0x10c   : > { %v1599_v29 = vmul.f32 %v2224_v31, %v2223_v15  ;;  %v1472_v9 = vmul.f32 %v2226_v59, %v2225_v21  ;;  %6226 = vst [vmem:[#allocation71_spill] sm:$0xff] %v4881_v56  ;;  %v4886_v15 = vld [vmem:[%s5708_s2 + $0x388] sm:$0xff]  ;;  %1854 = vst.msk [vmem:[%s3185_s25 + $0x1e8] sm:$0xff] %vm1280_vm0, %v1726_v10  ;;  %v2227_v37 = vld [vmem:[%s2444_s22 + $0x1f8] sm:$0xff]  ;;  %v1264_v47 = vsub.f32 %v1008_v28, %v1136_v52 }
 0x10d   : > { %6227 = vst [vmem:[#allocation72_spill] sm:$0xff] %v4886_v15  ;;  %v4891_v31 = vld [vmem:[%s5709_s3 + $0x388] sm:$0xff]  ;;  %v2228_v21 = vld [vmem:[%s5708_s2 + $0x1f8] sm:$0xff]  ;;  %v2229_v53 = vld [vmem:[%s2438_s16 + $0x200] sm:$0xff]  ;;  %v1009_v10 = vmul.f32 %v4886_v15, %v4862_v55 }
 0x10e   : > { %6228 = vst [vmem:[#allocation74_spill] sm:$0xff] %v4891_v31  ;;  %v1600_v59 = vmul.f32 %v2228_v21, %v2227_v37  ;;  %v2230_v26 = vld [vmem:[%s5709_s3 + $0x200] sm:$0xff]  ;;  %1391 = vst.msk [vmem:[%s2519_s24 + $0x370] sm:$0xff] %vm1280_vm0, %v1262_v61  ;;  %v1137_v30 = vmul.f32 %v4891_v31, %v4881_v56  ;;  %v4910_v35 = vld [vmem:[%s2438_s16 + $0x390] sm:$0xff] }
 0x10f   : > { %v1473_v4 = vmul.f32 %v2230_v26, %v2229_v53  ;;  %6229 = vst [vmem:[#allocation77_spill] sm:$0xff] %v4910_v35  ;;  %v4913_v37 = vld [vmem:[%s2444_s22 + $0x390] sm:$0xff]  ;;  %v1727_v26 = vadd.f32 %v1599_v29, %v1471_v51  ;;  %v4928_v32 = vld [vmem:[%s2438_s16 + $0x398] sm:$0xff]  ;;  %v2231_v31 = vld [vmem:[%s2444_s22 + $0x200] sm:$0xff] }
 0x110   : > { %6230 = vst [vmem:[#allocation75_spill] sm:$0xff] %v4913_v37  ;;  %v4918_v21 = vld [vmem:[%s5708_s2 + $0x390] sm:$0xff]  ;;  %6233 = vst [vmem:[#allocation81_spill] sm:$0xff] %v4928_v32  ;;  %v4931_v15 = vld [vmem:[%s2444_s22 + $0x398] sm:$0xff]  ;;  %v1728_v56 = vadd.f32 %v1600_v59, %v1472_v9  ;;  %v1265_v29 = vsub.f32 %v1009_v10, %v1137_v30 }
 0x111   : > { %6231 = vst [vmem:[#allocation76_spill] sm:$0xff] %v4918_v21  ;;  %v4923_v61 = vld [vmem:[%s5709_s3 + $0x390] sm:$0xff]  ;;  %v1010_v53 = vmul.f32 %v4918_v21, %v4910_v35  ;;  %6234 = vst [vmem:[#allocation79_spill] sm:$0xff] %v4931_v15  ;;  %v2232_v28 = vld [vmem:[%s5708_s2 + $0x200] sm:$0xff] }
 0x112   : > { %6232 = vst [vmem:[#allocation78_spill] sm:$0xff] %v4923_v61  ;;  %v1601_v51 = vmul.f32 %v2232_v28, %v2231_v31  ;;  %1392 = vst.msk [vmem:[%s2519_s24 + $0x378] sm:$0xff] %vm1280_vm0, %v1263_v6  ;;  %v1138_v52 = vmul.f32 %v4923_v61, %v4913_v37  ;;  %v4944_v21 = vld [vmem:[%s5708_s2 + $0x398] sm:$0xff]  ;;  %v4952_v59 = vld [vmem:[%s2438_s16 + $0x3a0] sm:$0xff] }
 0x113   : > { %6235 = vst [vmem:[#allocation80_spill] sm:$0xff] %v4944_v21  ;;  %v4949_v9 = vld [vmem:[%s5709_s3 + $0x398] sm:$0xff]  ;;  %6237 = vst [vmem:[#allocation83_spill] sm:$0xff] %v4952_v59  ;;  %v2233_v30 = vld [vmem:[%s2438_s16 + $0x208] sm:$0xff] }
 0x114   : > { %6236 = vst [vmem:[#allocation82_spill] sm:$0xff] %v4949_v9  ;;  %1855 = vst.msk [vmem:[%s3185_s25 + $0x1f0] sm:$0xff] %vm1280_vm0, %v1727_v26  ;;  %v2234_v6 = vld [vmem:[%s5709_s3 + $0x208] sm:$0xff]  ;;  %v1011_v26 = vmul.f32 %v4944_v21, %v4928_v32  ;;  %v1139_v61 = vmul.f32 %v4949_v9, %v4931_v15  ;;  %v4971_v35 = vld [vmem:[%s2444_s22 + $0x3a0] sm:$0xff]  ;;  %v1266_v15 = vsub.f32 %v1010_v53, %v1138_v52 }
 0x115   : > { %v1474_v31 = vmul.f32 %v2234_v6, %v2233_v30  ;;  %v2235_v10 = vld [vmem:[%s2444_s22 + $0x208] sm:$0xff]  ;;  %1393 = vst.msk [vmem:[%s2519_s24 + $0x380] sm:$0xff] %vm1280_vm0, %v1264_v47  ;;  %6238 = vst [vmem:[#allocation86_spill] sm:$0xff] %v4971_v35  ;;  %v4976_v30 = vld [vmem:[%s5708_s2 + $0x3a0] sm:$0xff]  ;;  %v1729_v47 = vadd.f32 %v1601_v51, %v1473_v4 }
 0x116   : > { %v2236_v28 = vld [vmem:[%s5708_s2 + $0x208] sm:$0xff]  ;;  %6239 = vst [vmem:[#allocation84_spill] sm:$0xff] %v4976_v30  ;;  %v4981_v6 = vld [vmem:[%s5709_s3 + $0x3a0] sm:$0xff]  ;;  %1856 = vst.msk [vmem:[%s3185_s25 + $0x1f8] sm:$0xff] %vm1280_vm0, %v1728_v56  ;;  %v1012_v9 = vmul.f32 %v4976_v30, %v4952_v59 }
 0x117   : > { %v1602_v37 = vmul.f32 %v2236_v28, %v2235_v10  ;;  %6240 = vst [vmem:[#allocation85_spill] sm:$0xff] %v4981_v6  ;;  %v2237_v10 = vld [vmem:[%s2438_s16 + $0x210] sm:$0xff]  ;;  %1394 = vst.msk [vmem:[%s2519_s24 + $0x388] sm:$0xff] %vm1280_vm0, %v1265_v29  ;;  %v1140_v56 = vmul.f32 %v4981_v6, %v4971_v35  ;;  %v4996_v4 = vld [vmem:[%s2438_s16 + $0x3a8] sm:$0xff]  ;;  %v1267_v29 = vsub.f32 %v1011_v26, %v1139_v61 }
 0x118   : > { %v2238_v28 = vld [vmem:[%s5709_s3 + $0x210] sm:$0xff]  ;;  %6241 = vst [vmem:[#allocation87_spill] sm:$0xff] %v4996_v4  ;;  %v4999_v51 = vld [vmem:[%s2444_s22 + $0x3a8] sm:$0xff]  ;;  %1857 = vst.msk [vmem:[%s3185_s25 + $0x200] sm:$0xff] %vm1280_vm0, %v1729_v47 }
 0x119   : > { %v1475_v21 = vmul.f32 %v2238_v28, %v2237_v10  ;;  %6242 = vst [vmem:[#allocation88_spill] sm:$0xff] %v4999_v51  ;;  %v5004_v32 = vld [vmem:[%s5708_s2 + $0x3a8] sm:$0xff]  ;;  %v1730_v10 = vadd.f32 %v1602_v37, %v1474_v31  ;;  %v5014_v28 = vld [vmem:[%s2438_s16 + $0x3b0] sm:$0xff]  ;;  %v2241_v31 = vld [vmem:[%s2438_s16 + $0x218] sm:$0xff] }
 0x11a   : > { %6243 = vst [vmem:[#allocation89_spill] sm:$0xff] %v5004_v32  ;;  %v5009_v53 = vld [vmem:[%s5709_s3 + $0x3a8] sm:$0xff]  ;;  %v1013_v52 = vmul.f32 %v5004_v32, %v4996_v4  ;;  %6245 = vst [vmem:[#allocation91_spill] sm:$0xff] %v5014_v28  ;;  %v5017_v30 = vld [vmem:[%s2444_s22 + $0x3b0] sm:$0xff]  ;;  %v1268_v4 = vsub.f32 %v1012_v9, %v1140_v56 }
 0x11b   : > { %6244 = vst [vmem:[#allocation90_spill] sm:$0xff] %v5009_v53  ;;  %6246 = vst [vmem:[#allocation92_spill] sm:$0xff] %v5017_v30  ;;  %v2239_v35 = vld [vmem:[%s2444_s22 + $0x210] sm:$0xff]  ;;  %v2242_v26 = vld [vmem:[%s5709_s3 + $0x218] sm:$0xff]  ;;  %v1141_v47 = vmul.f32 %v5009_v53, %v4999_v51 }
 0x11c   : > { %v2240_v37 = vld [vmem:[%s5708_s2 + $0x210] sm:$0xff]  ;;  %v1476_v32 = vmul.f32 %v2242_v26, %v2241_v31  ;;  %1395 = vst.msk [vmem:[%s2519_s24 + $0x390] sm:$0xff] %vm1280_vm0, %v1266_v15  ;;  %1858 = vst.msk [vmem:[%s3185_s25 + $0x208] sm:$0xff] %vm1280_vm0, %v1730_v10  ;;  %v2243_v15 = vld [vmem:[%s2444_s22 + $0x218] sm:$0xff] }
 0x11d   : > { %v1603_v61 = vmul.f32 %v2240_v37, %v2239_v35  ;;  %v5036_v6 = vld [vmem:[%s5708_s2 + $0x3b0] sm:$0xff]  ;;  %v5044_v37 = vld [vmem:[%s2438_s16 + $0x3b8] sm:$0xff]  ;;  %v2245_v31 = vld [vmem:[%s2438_s16 + $0x220] sm:$0xff]  ;;  %1396 = vst.msk [vmem:[%s2519_s24 + $0x398] sm:$0xff] %vm1280_vm0, %v1267_v29 }
 0x11e   : > { %6247 = vst [vmem:[#allocation93_spill] sm:$0xff] %v5036_v6  ;;  %v5041_v35 = vld [vmem:[%s5709_s3 + $0x3b0] sm:$0xff]  ;;  %6249 = vst [vmem:[#allocation95_spill] sm:$0xff] %v5044_v37  ;;  %v2244_v9 = vld [vmem:[%s5708_s2 + $0x218] sm:$0xff]  ;;  %v1014_v10 = vmul.f32 %v5036_v6, %v5014_v28 }
 0x11f   : > { %6248 = vst [vmem:[#allocation94_spill] sm:$0xff] %v5041_v35  ;;  %v1604_v56 = vmul.f32 %v2244_v9, %v2243_v15  ;;  %v2246_v26 = vld [vmem:[%s5709_s3 + $0x220] sm:$0xff]  ;;  %v1142_v53 = vmul.f32 %v5041_v35, %v5017_v30  ;;  %v5063_v59 = vld [vmem:[%s2444_s22 + $0x3b8] sm:$0xff]  ;;  %v1731_v29 = vadd.f32 %v1603_v61, %v1475_v21  ;;  %1397 = vst.msk [vmem:[%s2519_s24 + $0x3a0] sm:$0xff] %vm1280_vm0, %v1268_v4 }
 0x120   : > { %v1477_v51 = vmul.f32 %v2246_v26, %v2245_v31  ;;  %6250 = vst [vmem:[#allocation96_spill] sm:$0xff] %v5063_v59  ;;  %v5068_v15 = vld [vmem:[%s5708_s2 + $0x3b8] sm:$0xff]  ;;  %v2247_v31 = vld [vmem:[%s2444_s22 + $0x220] sm:$0xff]  ;;  %v1269_v30 = vsub.f32 %v1013_v52, %v1141_v47 }
 0x121   : > { %6251 = vst [vmem:[#allocation99_spill] sm:$0xff] %v5068_v15  ;;  %v5073_v9 = vld [vmem:[%s5709_s3 + $0x3b8] sm:$0xff]  ;;  %v2248_v26 = vld [vmem:[%s5708_s2 + $0x220] sm:$0xff]  ;;  %v1015_v35 = vmul.f32 %v5068_v15, %v5044_v37  ;;  %v1270_v4 = vsub.f32 %v1014_v10, %v1142_v53  ;;  %v5107_v15 = vld [vmem:[%s2444_s22 + $0x3c8] sm:$0xff] }
 0x122   : > { %6252 = vst [vmem:[#allocation97_spill] sm:$0xff] %v5073_v9  ;;  %v1605_v6 = vmul.f32 %v2248_v26, %v2247_v31  ;;  %v1143_v28 = vmul.f32 %v5073_v9, %v5063_v59  ;;  %v5086_v21 = vld [vmem:[%s2438_s16 + $0x3c0] sm:$0xff]  ;;  %v1732_v31 = vadd.f32 %v1604_v56, %v1476_v32  ;;  %v5104_v26 = vld [vmem:[%s2438_s16 + $0x3c8] sm:$0xff]  ;;  %6258 = vst [vmem:[#allocation104_spill] sm:$0xff] %v5107_v15 }
 0x123   : > { %6253 = vst [vmem:[#allocation98_spill] sm:$0xff] %v5086_v21  ;;  %v5089_v61 = vld [vmem:[%s2444_s22 + $0x3c0] sm:$0xff]  ;;  %6257 = vst [vmem:[#allocation102_spill] sm:$0xff] %v5104_v26  ;;  %v2249_v56 = vld [vmem:[%s2438_s16 + $0x228] sm:$0xff] }
 0x124   : > { %6254 = vst [vmem:[#allocation100_spill] sm:$0xff] %v5089_v61  ;;  %v5094_v55 = vld [vmem:[%s5708_s2 + $0x3c0] sm:$0xff]  ;;  %1859 = vst.msk [vmem:[%s3185_s25 + $0x210] sm:$0xff] %vm1280_vm0, %v1731_v29  ;;  %v1733_v32 = vadd.f32 %v1605_v6, %v1477_v51  ;;  %v2250_v53 = vld [vmem:[%s5709_s3 + $0x228] sm:$0xff]  ;;  %v1271_v59 = vsub.f32 %v1015_v35, %v1143_v28 }
 0x125   : > { %6255 = vst [vmem:[#allocation103_spill] sm:$0xff] %v5094_v55  ;;  %v5099_v52 = vld [vmem:[%s5709_s3 + $0x3c0] sm:$0xff]  ;;  %v1016_v47 = vmul.f32 %v5094_v55, %v5086_v21  ;;  %v1478_v10 = vmul.f32 %v2250_v53, %v2249_v56  ;;  %1398 = vst.msk [vmem:[%s2519_s24 + $0x3a8] sm:$0xff] %vm1280_vm0, %v1269_v30  ;;  %v5122_v21 = vld [vmem:[%s5708_s2 + $0x3c8] sm:$0xff] }
 0x126   : > { %6256 = vst [vmem:[#allocation101_spill] sm:$0xff] %v5099_v52  ;;  %v1144_v55 = vmul.f32 %v5099_v52, %v5089_v61  ;;  %6259 = vst [vmem:[#allocation105_spill] sm:$0xff] %v5122_v21  ;;  %v5127_v6 = vld [vmem:[%s5709_s3 + $0x3c8] sm:$0xff]  ;;  %v5130_v51 = vld [vmem:[%s2438_s16 + $0x3d0] sm:$0xff]  ;;  %v1017_v61 = vmul.f32 %v5122_v21, %v5104_v26 }
 0x127   : > { %6260 = vst [vmem:[#allocation2_spill] sm:$0xff] %v5127_v6  ;;  %1860 = vst.msk [vmem:[%s3185_s25 + $0x218] sm:$0xff] %vm1280_vm0, %v1732_v31  ;;  %v2251_v30 = vld [vmem:[%s2444_s22 + $0x228] sm:$0xff]  ;;  %v2253_v29 = vld [vmem:[%s2438_s16 + $0x230] sm:$0xff]  ;;  %v1145_v31 = vmul.f32 %v5127_v6, %v5107_v15 }
 0x128   : > { %v2252_v28 = vld [vmem:[%s5708_s2 + $0x228] sm:$0xff]  ;;  %v2254_v56 = vld [vmem:[%s5709_s3 + $0x230] sm:$0xff]  ;;  %1399 = vst.msk [vmem:[%s2519_s24 + $0x3b0] sm:$0xff] %vm1280_vm0, %v1270_v4  ;;  %1861 = vst.msk [vmem:[%s3185_s25 + $0x220] sm:$0xff] %vm1280_vm0, %v1733_v32  ;;  %v1272_v26 = vsub.f32 %v1016_v47, %v1144_v55 }
 0x129   : > { %v1606_v35 = vmul.f32 %v2252_v28, %v2251_v30  ;;  %v1479_v53 = vmul.f32 %v2254_v56, %v2253_v29  ;;  %v5149_v52 = vld [vmem:[%s2444_s22 + $0x3d0] sm:$0xff]  ;;  %v2257_v21 = vld [vmem:[%s2438_s16 + $0x238] sm:$0xff]  ;;  %1400 = vst.msk [vmem:[%s2519_s24 + $0x3b8] sm:$0xff] %vm1280_vm0, %v1271_v59  ;;  %v1273_v55 = vsub.f32 %v1017_v61, %v1145_v31  ;;  %v5196_v47 = vld [vmem:[%s2438_s16 + $0x3e0] sm:$0xff] }
 0x12a   : > { %6261 = vst [vmem:[#allocation5_spill] sm:$0xff] %v5149_v52  ;;  %v5154_v30 = vld [vmem:[%s5708_s2 + $0x3d0] sm:$0xff]  ;;  %v2258_v15 = vld [vmem:[%s5709_s3 + $0x238] sm:$0xff]  ;;  %6268 = vst [vmem:[#allocation108_spill] sm:$0xff] %v5196_v47 }
 0x12b   : > { %6262 = vst [vmem:[#allocation3_spill] sm:$0xff] %v5154_v30  ;;  %v5159_v28 = vld [vmem:[%s5709_s3 + $0x3d0] sm:$0xff]  ;;  %v1480_v6 = vmul.f32 %v2258_v15, %v2257_v21  ;;  %v1018_v32 = vmul.f32 %v5154_v30, %v5130_v51  ;;  %v5178_v37 = vld [vmem:[%s2438_s16 + $0x3d8] sm:$0xff]  ;;  %v1734_v15 = vadd.f32 %v1606_v35, %v1478_v10  ;;  %v5199_v30 = vld [vmem:[%s2444_s22 + $0x3e0] sm:$0xff] }
 0x12c   : > { %6263 = vst [vmem:[#allocation4_spill] sm:$0xff] %v5159_v28  ;;  %v2255_v4 = vld [vmem:[%s2444_s22 + $0x230] sm:$0xff]  ;;  %v1146_v9 = vmul.f32 %v5159_v28, %v5149_v52  ;;  %6264 = vst [vmem:[#allocation6_spill] sm:$0xff] %v5178_v37  ;;  %v5191_v59 = vld [vmem:[%s5709_s3 + $0x3d8] sm:$0xff] }
 0x12d   : > { %v2256_v29 = vld [vmem:[%s5708_s2 + $0x230] sm:$0xff]  ;;  %6267 = vst [vmem:[#allocation107_spill] sm:$0xff] %v5191_v59  ;;  %6269 = vst [vmem:[#allocation109_spill] sm:$0xff] %v5199_v30  ;;  %v2259_v28 = vld [vmem:[%s2444_s22 + $0x238] sm:$0xff] }
 0x12e   : > { %v1607_v56 = vmul.f32 %v2256_v29, %v2255_v4  ;;  %v5181_v4 = vld [vmem:[%s2444_s22 + $0x3d8] sm:$0xff]  ;;  %1401 = vst.msk [vmem:[%s2519_s24 + $0x3c0] sm:$0xff] %vm1280_vm0, %v1272_v26  ;;  %v1274_v35 = vsub.f32 %v1018_v32, %v1146_v9  ;;  %1862 = vst.msk [vmem:[%s3185_s25 + $0x228] sm:$0xff] %vm1280_vm0, %v1734_v15  ;;  %v2261_v9 = vld [vmem:[%s2438_s16 + $0x240] sm:$0xff] }
 0x12f   : > { %6265 = vst [vmem:[#allocation9_spill] sm:$0xff] %v5181_v4  ;;  %v5186_v29 = vld [vmem:[%s5708_s2 + $0x3d8] sm:$0xff]  ;;  %v1147_v31 = vmul.f32 %v5191_v59, %v5181_v4  ;;  %v2262_v26 = vld [vmem:[%s5709_s3 + $0x240] sm:$0xff]  ;;  %1402 = vst.msk [vmem:[%s2519_s24 + $0x3c8] sm:$0xff] %vm1280_vm0, %v1273_v55 }
 0x130   : > { %6266 = vst [vmem:[#allocation106_spill] sm:$0xff] %v5186_v29  ;;  %v1019_v21 = vmul.f32 %v5186_v29, %v5178_v37  ;;  %v1735_v52 = vadd.f32 %v1607_v56, %v1479_v53  ;;  %v2260_v61 = vld [vmem:[%s5708_s2 + $0x238] sm:$0xff]  ;;  %v5212_v29 = vld [vmem:[%s5708_s2 + $0x3e0] sm:$0xff]  ;;  %v5220_v56 = vld [vmem:[%s2438_s16 + $0x3e8] sm:$0xff] }
 0x131   : > { %v1608_v10 = vmul.f32 %v2260_v61, %v2259_v28  ;;  %6270 = vst [vmem:[#allocation110_spill] sm:$0xff] %v5212_v29  ;;  %v5217_v53 = vld [vmem:[%s5709_s3 + $0x3e0] sm:$0xff]  ;;  %6272 = vst [vmem:[#allocation112_spill] sm:$0xff] %v5220_v56  ;;  %v1481_v28 = vmul.f32 %v2262_v26, %v2261_v9  ;;  %v1020_v15 = vmul.f32 %v5212_v29, %v5196_v47  ;;  %v5239_v37 = vld [vmem:[%s2444_s22 + $0x3e8] sm:$0xff] }
 0x132   : > { %6271 = vst [vmem:[#allocation111_spill] sm:$0xff] %v5217_v53  ;;  %v2263_v32 = vld [vmem:[%s2444_s22 + $0x240] sm:$0xff]  ;;  %v1148_v59 = vmul.f32 %v5217_v53, %v5199_v30  ;;  %6273 = vst [vmem:[#allocation113_spill] sm:$0xff] %v5239_v37  ;;  %v5244_v9 = vld [vmem:[%s5708_s2 + $0x3e8] sm:$0xff]  ;;  %v1275_v30 = vsub.f32 %v1019_v21, %v1147_v31 }
 0x133   : > { %v2264_v61 = vld [vmem:[%s5708_s2 + $0x240] sm:$0xff]  ;;  %6274 = vst [vmem:[#allocation114_spill] sm:$0xff] %v5244_v9  ;;  %v5249_v26 = vld [vmem:[%s5709_s3 + $0x3e8] sm:$0xff]  ;;  %1863 = vst.msk [vmem:[%s3185_s25 + $0x230] sm:$0xff] %vm1280_vm0, %v1735_v52  ;;  %v1736_v55 = vadd.f32 %v1608_v10, %v1480_v6  ;;  %v1021_v53 = vmul.f32 %v5244_v9, %v5220_v56 }
 0x134   : > { %v1609_v4 = vmul.f32 %v2264_v61, %v2263_v32  ;;  %6275 = vst [vmem:[#allocation115_spill] sm:$0xff] %v5249_v26  ;;  %v2265_v32 = vld [vmem:[%s2438_s16 + $0x248] sm:$0xff]  ;;  %1403 = vst.msk [vmem:[%s2519_s24 + $0x3d0] sm:$0xff] %vm1280_vm0, %v1274_v35  ;;  %v1149_v52 = vmul.f32 %v5249_v26, %v5239_v37  ;;  %v5264_v6 = vld [vmem:[%s2438_s16 + $0x3f0] sm:$0xff]  ;;  %v1276_v35 = vsub.f32 %v1020_v15, %v1148_v59 }
 0x135   : > { %v2266_v61 = vld [vmem:[%s5709_s3 + $0x248] sm:$0xff]  ;;  %6276 = vst [vmem:[#allocation116_spill] sm:$0xff] %v5264_v6  ;;  %v5267_v10 = vld [vmem:[%s2444_s22 + $0x3f0] sm:$0xff]  ;;  %v5285_v9 = vld [vmem:[%s2444_s22 + $0x3f8] sm:$0xff] }
 0x136   : > { %v1482_v29 = vmul.f32 %v2266_v61, %v2265_v32  ;;  %6277 = vst [vmem:[#allocation117_spill] sm:$0xff] %v5267_v10  ;;  %v5272_v47 = vld [vmem:[%s5708_s2 + $0x3f0] sm:$0xff]  ;;  %v1737_v32 = vadd.f32 %v1609_v4, %v1481_v28  ;;  %v5282_v61 = vld [vmem:[%s2438_s16 + $0x3f8] sm:$0xff]  ;;  %6280 = vst [vmem:[#allocation120_spill] sm:$0xff] %v5285_v9 }
 0x137   : > { %6278 = vst [vmem:[#allocation118_spill] sm:$0xff] %v5272_v47  ;;  %v5277_v21 = vld [vmem:[%s5709_s3 + $0x3f0] sm:$0xff]  ;;  %v1022_v31 = vmul.f32 %v5272_v47, %v5264_v6  ;;  %1864 = vst.msk [vmem:[%s3185_s25 + $0x238] sm:$0xff] %vm1280_vm0, %v1736_v55  ;;  %v2267_v37 = vld [vmem:[%s2444_s22 + $0x248] sm:$0xff]  ;;  %v1277_v6 = vsub.f32 %v1021_v53, %v1149_v52 }
 0x138   : > { %6279 = vst [vmem:[#allocation119_spill] sm:$0xff] %v5277_v21  ;;  %v2268_v4 = vld [vmem:[%s5708_s2 + $0x248] sm:$0xff]  ;;  %v2269_v28 = vld [vmem:[%s2438_s16 + $0x250] sm:$0xff]  ;;  %1404 = vst.msk [vmem:[%s2519_s24 + $0x3d8] sm:$0xff] %vm1280_vm0, %v1275_v30  ;;  %v1150_v55 = vmul.f32 %v5277_v21, %v5267_v10 }
 0x139   : > { %v1610_v59 = vmul.f32 %v2268_v4, %v2267_v37  ;;  %v2270_v15 = vld [vmem:[%s5709_s3 + $0x250] sm:$0xff]  ;;  %v5304_v26 = vld [vmem:[%s5708_s2 + $0x3f8] sm:$0xff]  ;;  %1865 = vst.msk [vmem:[%s3185_s25 + $0x240] sm:$0xff] %vm1280_vm0, %v1737_v32  ;;  %1405 = vst.msk [vmem:[%s2519_s24 + $0x3e0] sm:$0xff] %vm1280_vm0, %v1276_v35 }
 0x13a   : > { %v1483_v47 = vmul.f32 %v2270_v15, %v2269_v28  ;;  %6281 = vst [vmem:[#allocation121_spill] sm:$0xff] %v5304_v26  ;;  %v5309_v37 = vld [vmem:[%s5709_s3 + $0x3f8] sm:$0xff]  ;;  %v2271_v4 = vld [vmem:[%s2444_s22 + $0x250] sm:$0xff]  ;;  %v1023_v10 = vmul.f32 %v5304_v26, %v5282_v61  ;;  %1406 = vst.msk [vmem:[%s2519_s24 + $0x3e8] sm:$0xff] %vm1280_vm0, %v1277_v6 }
 0x13b   : > { %v2272_v30 = vld [vmem:[%s5708_s2 + $0x250] sm:$0xff]  ;;  %v2273_v52 = vld [vmem:[%s2438_s16 + $0x258] sm:$0xff]  ;;  %v1151_v32 = vmul.f32 %v5309_v37, %v5285_v9  ;;  %v1738_v21 = vadd.f32 %v1610_v59, %v1482_v29  ;;  %v2278_v26 = vld [vmem:[%s5709_s3 + $0x260] sm:$0xff] }
 0x13c   : > { %v1611_v53 = vmul.f32 %v2272_v30, %v2271_v4  ;;  %v2274_v28 = vld [vmem:[%s5709_s3 + $0x258] sm:$0xff]  ;;  %v2279_v59 = vld [vmem:[%s2444_s22 + $0x260] sm:$0xff]  ;;  %v2281_v6 = vld [vmem:[%s2438_s16 + $0x268] sm:$0xff] }
 0x13d   : > { %v1484_v15 = vmul.f32 %v2274_v28, %v2273_v52  ;;  %v2275_v56 = vld [vmem:[%s2444_s22 + $0x258] sm:$0xff]  ;;  %v1278_v52 = vsub.f32 %v1022_v31, %v1150_v55  ;;  %v2277_v28 = vld [vmem:[%s2438_s16 + $0x260] sm:$0xff]  ;;  %1866 = vst.msk [vmem:[%s3185_s25 + $0x248] sm:$0xff] %vm1280_vm0, %v1738_v21  ;;  %v2282_v31 = vld [vmem:[%s5709_s3 + $0x268] sm:$0xff] }
 0x13e   : > { %v2276_v4 = vld [vmem:[%s5708_s2 + $0x258] sm:$0xff]  ;;  %v1739_v35 = vadd.f32 %v1611_v53, %v1483_v47  ;;  %v1485_v29 = vmul.f32 %v2278_v26, %v2277_v28  ;;  %v2280_v9 = vld [vmem:[%s5708_s2 + $0x260] sm:$0xff]  ;;  %v1486_v55 = vmul.f32 %v2282_v31, %v2281_v6  ;;  %v2283_v26 = vld [vmem:[%s2444_s22 + $0x268] sm:$0xff] }
 0x13f   : > { %v1612_v30 = vmul.f32 %v2276_v4, %v2275_v56  ;;  %v1613_v56 = vmul.f32 %v2280_v9, %v2279_v59  ;;  %v1279_v4 = vsub.f32 %v1023_v10, %v1151_v32  ;;  %v2284_v53 = vld [vmem:[%s5708_s2 + $0x268] sm:$0xff]  ;;  %1407 = vst.msk [vmem:[%s2519_s24 + $0x3f0] sm:$0xff] %vm1280_vm0, %v1278_v52  ;;  %v2285_v21 = vld [vmem:[%s2438_s16 + $0x270] sm:$0xff]  ;;  %v2289_v6 = vld [vmem:[%s2438_s16 + $0x278] sm:$0xff] }
 0x140   : > { %v1614_v9 = vmul.f32 %v2284_v53, %v2283_v26  ;;  %1867 = vst.msk [vmem:[%s3185_s25 + $0x250] sm:$0xff] %vm1280_vm0, %v1739_v35  ;;  %v2288_v28 = vld [vmem:[%s5708_s2 + $0x270] sm:$0xff]  ;;  %v2290_v52 = vld [vmem:[%s5709_s3 + $0x278] sm:$0xff]  ;;  %v2293_v53 = vld [vmem:[%s2438_s16 + $0x280] sm:$0xff] }
 0x141   : > { %v1740_v47 = vadd.f32 %v1612_v30, %v1484_v15  ;;  %v1741_v10 = vadd.f32 %v1613_v56, %v1485_v29  ;;  %v2286_v15 = vld [vmem:[%s5709_s3 + $0x270] sm:$0xff]  ;;  %v1488_v35 = vmul.f32 %v2290_v52, %v2289_v6  ;;  %1408 = vst.msk [vmem:[%s2519_s24 + $0x3f8] sm:$0xff] %vm1280_vm0, %v1279_v4  ;;  %v2291_v56 = vld [vmem:[%s2444_s22 + $0x278] sm:$0xff]  ;;  %v2296_v4 = vld [vmem:[%s5708_s2 + $0x280] sm:$0xff] }
 0x142   : > { %v1487_v32 = vmul.f32 %v2286_v15, %v2285_v21  ;;  %v2287_v30 = vld [vmem:[%s2444_s22 + $0x270] sm:$0xff]  ;;  %v1742_v29 = vadd.f32 %v1614_v9, %v1486_v55  ;;  %v2292_v31 = vld [vmem:[%s5708_s2 + $0x278] sm:$0xff]  ;;  %v2294_v21 = vld [vmem:[%s5709_s3 + $0x280] sm:$0xff] }
 0x143   : > { %v1615_v59 = vmul.f32 %v2288_v28, %v2287_v30  ;;  %1868 = vst.msk [vmem:[%s3185_s25 + $0x258] sm:$0xff] %vm1280_vm0, %v1740_v47  ;;  %v1616_v26 = vmul.f32 %v2292_v31, %v2291_v56  ;;  %v1489_v15 = vmul.f32 %v2294_v21, %v2293_v53  ;;  %v2295_v30 = vld [vmem:[%s2444_s22 + $0x280] sm:$0xff]  ;;  %1869 = vst.msk [vmem:[%s3185_s25 + $0x260] sm:$0xff] %vm1280_vm0, %v1741_v10  ;;  %v2297_v9 = vld [vmem:[%s2438_s16 + $0x288] sm:$0xff] }
 0x144   : > { %v1617_v47 = vmul.f32 %v2296_v4, %v2295_v30  ;;  %v2298_v28 = vld [vmem:[%s5709_s3 + $0x288] sm:$0xff]  ;;  %v2301_v53 = vld [vmem:[%s2438_s16 + $0x290] sm:$0xff]  ;;  %1870 = vst.msk [vmem:[%s3185_s25 + $0x268] sm:$0xff] %vm1280_vm0, %v1742_v29  ;;  %v2307_v29 = vld [vmem:[%s2444_s22 + $0x298] sm:$0xff] }
 0x145   : > { %v1743_v55 = vadd.f32 %v1615_v59, %v1487_v32  ;;  %v1490_v6 = vmul.f32 %v2298_v28, %v2297_v9  ;;  %v2299_v52 = vld [vmem:[%s2444_s22 + $0x288] sm:$0xff]  ;;  %v2302_v10 = vld [vmem:[%s5709_s3 + $0x290] sm:$0xff]  ;;  %v1744_v59 = vadd.f32 %v1616_v26, %v1488_v35  ;;  %v2305_v28 = vld [vmem:[%s2438_s16 + $0x298] sm:$0xff] }
 0x146   : > { %v2300_v56 = vld [vmem:[%s5708_s2 + $0x288] sm:$0xff]  ;;  %v1491_v32 = vmul.f32 %v2302_v10, %v2301_v53  ;;  %v1745_v21 = vadd.f32 %v1617_v47, %v1489_v15  ;;  %v2303_v30 = vld [vmem:[%s2444_s22 + $0x290] sm:$0xff]  ;;  %v2308_v26 = vld [vmem:[%s5708_s2 + $0x298] sm:$0xff] }
 0x147   : > { %v1618_v31 = vmul.f32 %v2300_v56, %v2299_v52  ;;  %v2304_v4 = vld [vmem:[%s5708_s2 + $0x290] sm:$0xff]  ;;  %v2306_v52 = vld [vmem:[%s5709_s3 + $0x298] sm:$0xff]  ;;  %1871 = vst.msk [vmem:[%s3185_s25 + $0x270] sm:$0xff] %vm1280_vm0, %v1743_v55  ;;  %v1620_v15 = vmul.f32 %v2308_v26, %v2307_v29  ;;  %v2309_v47 = vld [vmem:[%s2438_s16 + $0x2a0] sm:$0xff] }
 0x148   : > { %v1619_v9 = vmul.f32 %v2304_v4, %v2303_v30  ;;  %v1492_v56 = vmul.f32 %v2306_v52, %v2305_v28  ;;  %v2310_v53 = vld [vmem:[%s5709_s3 + $0x2a0] sm:$0xff]  ;;  %1872 = vst.msk [vmem:[%s3185_s25 + $0x278] sm:$0xff] %vm1280_vm0, %v1744_v59  ;;  %1873 = vst.msk [vmem:[%s3185_s25 + $0x280] sm:$0xff] %vm1280_vm0, %v1745_v21  ;;  %v2313_v4 = vld [vmem:[%s2438_s16 + $0x2a8] sm:$0xff] }
 0x149   : > { %v1746_v35 = vadd.f32 %v1618_v31, %v1490_v6  ;;  %v1493_v10 = vmul.f32 %v2310_v53, %v2309_v47  ;;  %v2311_v30 = vld [vmem:[%s2444_s22 + $0x2a0] sm:$0xff]  ;;  %v2314_v28 = vld [vmem:[%s5709_s3 + $0x2a8] sm:$0xff]  ;;  %v2317_v53 = vld [vmem:[%s2438_s16 + $0x2b0] sm:$0xff] }
 0x14a   : > { %v2312_v55 = vld [vmem:[%s5708_s2 + $0x2a0] sm:$0xff]  ;;  %v1747_v31 = vadd.f32 %v1619_v9, %v1491_v32  ;;  %v1494_v52 = vmul.f32 %v2314_v28, %v2313_v4  ;;  %v2315_v29 = vld [vmem:[%s2444_s22 + $0x2a8] sm:$0xff]  ;;  %v1495_v59 = vmul.f32 %v2317_v53, %v4118_v43  ;;  %v1748_v32 = vadd.f32 %v1620_v15, %v1492_v56  ;;  %v2318_v9 = vld [vmem:[%s2444_s22 + $0x2b0] sm:$0xff] }
 0x14b   : > { %v1621_v6 = vmul.f32 %v2312_v55, %v2311_v30  ;;  %v2316_v26 = vld [vmem:[%s5708_s2 + $0x2a8] sm:$0xff]  ;;  %1874 = vst.msk [vmem:[%s3185_s25 + $0x288] sm:$0xff] %vm1280_vm0, %v1746_v35  ;;  %v2319_v30 = vld [vmem:[%s5708_s2 + $0x2b0] sm:$0xff]  ;;  %v1496_v4 = vmul.f32 %v4143_v44, %v4130_v62  ;;  %v1624_v43 = vmul.f32 %v4138_v11, %v4133_v41  ;;  %v1497_v56 = vmul.f32 %v4167_v48, %v4148_v8 }
 0x14c   : > { %v1622_v47 = vmul.f32 %v2316_v26, %v2315_v29  ;;  %v1623_v55 = vmul.f32 %v2319_v30, %v2318_v9  ;;  %1875 = vst.msk [vmem:[%s3185_s25 + $0x290] sm:$0xff] %vm1280_vm0, %v1747_v31  ;;  %v1625_v35 = vmul.f32 %v4162_v42, %v4151_v34  ;;  %1876 = vst.msk [vmem:[%s3185_s25 + $0x298] sm:$0xff] %vm1280_vm0, %v1748_v32  ;;  %v6294_v29 = vld [vmem:[#allocation22_spill] sm:$0xff]  ;;  %v6296_v53 = vld [vmem:[#allocation20_spill] sm:$0xff] }
 0x14d   : > { %v1749_v21 = vadd.f32 %v1621_v6, %v1493_v10  ;;  %v1498_v44 = vmul.f32 %v4195_v38, %v4170_v12  ;;  %v1626_v15 = vmul.f32 %v4190_v63, %v4185_v36  ;;  %v1499_v41 = vmul.f32 %v4221_v13, %v4208_v57  ;;  %v6291_v10 = vld [vmem:[#allocation15_spill] sm:$0xff]  ;;  %v6292_v6 = vld [vmem:[#allocation16_spill] sm:$0xff]  ;;  %v6298_v9 = vld [vmem:[#allocation26_spill] sm:$0xff] }
 0x14e   : > { %v1750_v28 = vadd.f32 %v1622_v47, %v1494_v52  ;;  %v1751_v62 = vadd.f32 %v1623_v55, %v1495_v59  ;;  %v1752_v11 = vadd.f32 %v1624_v43, %v1496_v4  ;;  %v1753_v8 = vadd.f32 %v1625_v35, %v1497_v56  ;;  %v6293_v52 = vld [vmem:[#allocation21_spill] sm:$0xff]  ;;  %v6295_v47 = vld [vmem:[#allocation19_spill] sm:$0xff]  ;;  %v6300_v4 = vld [vmem:[#allocation24_spill] sm:$0xff] }
 0x14f   : > { %1877 = vst.msk [vmem:[%s3185_s25 + $0x2a0] sm:$0xff] %vm1280_vm0, %v1749_v21  ;;  %v1627_v34 = vmul.f32 %v4216_v20, %v4211_v49  ;;  %v1500_v42 = vmul.f32 %v4249_v2, %v4226_v54  ;;  %v1754_v48 = vadd.f32 %v1626_v15, %v1498_v44  ;;  %v1628_v12 = vmul.f32 %v4244_v45, %v4229_v0  ;;  %v6297_v21 = vld [vmem:[#allocation25_spill] sm:$0xff]  ;;  %v6299_v55 = vld [vmem:[#allocation23_spill] sm:$0xff]  ;;  %v6302_v56 = vld [vmem:[#allocation30_spill] sm:$0xff] }
 0x150   : > { %1878 = vst.msk [vmem:[%s3185_s25 + $0x2a8] sm:$0xff] %vm1280_vm0, %v1750_v28  ;;  %1879 = vst.msk [vmem:[%s3185_s25 + $0x2b0] sm:$0xff] %vm1280_vm0, %v1751_v62  ;;  %v1501_v36 = vmul.f32 %v4277_v23, %v4252_v14  ;;  %v1629_v63 = vmul.f32 %v4272_v60, %v4267_v27  ;;  %v1502_v57 = vmul.f32 %v4301_v7, %v4288_v25  ;;  %v6282_v25 = vld [vmem:[#allocation10_spill] sm:$0xff]  ;;  %v6284_v7 = vld [vmem:[#allocation8_spill] sm:$0xff] }
 0x151   : > { %1880 = vst.msk [vmem:[%s3185_s25 + $0x2b8] sm:$0xff] %vm1280_vm0, %v1752_v11  ;;  %1881 = vst.msk [vmem:[%s3185_s25 + $0x2c0] sm:$0xff] %vm1280_vm0, %v1753_v8  ;;  %v1755_v38 = vadd.f32 %v1627_v34, %v1499_v41  ;;  %v1630_v49 = vmul.f32 %v4296_v22, %v4291_v40  ;;  %v1503_v20 = vmul.f32 %v4327_v33, %v4306_v58  ;;  %v6283_v22 = vld [vmem:[#allocation7_spill] sm:$0xff]  ;;  %v6301_v43 = vld [vmem:[#allocation29_spill] sm:$0xff] }
 0x152   : > { %1882 = vst.msk [vmem:[%s3185_s25 + $0x2c8] sm:$0xff] %vm1280_vm0, %v1754_v48  ;;  %v1756_v13 = vadd.f32 %v1628_v12, %v1500_v42  ;;  %v1757_v54 = vadd.f32 %v1629_v63, %v1501_v36  ;;  %v1631_v0 = vmul.f32 %v4322_v18, %v4309_v3  ;;  %v1504_v45 = vmul.f32 %v4357_v46, %v4330_v50  ;;  %v6285_v3 = vld [vmem:[#allocation13_spill] sm:$0xff]  ;;  %v6286_v18 = vld [vmem:[#allocation14_spill] sm:$0xff]  ;;  %v6288_v46 = vld [vmem:[#allocation12_spill] sm:$0xff] }
 0x153   : > { %1883 = vst.msk [vmem:[%s3185_s25 + $0x2d0] sm:$0xff] %vm1280_vm0, %v1755_v38  ;;  %v1758_v2 = vadd.f32 %v1630_v49, %v1502_v57  ;;  %v1632_v14 = vmul.f32 %v4352_v16, %v4347_v5  ;;  %v1505_v27 = vmul.f32 %v4387_v19, %v4374_v24  ;;  %v1633_v60 = vmul.f32 %v4382_v39, %v4377_v1  ;;  %v6287_v16 = vld [vmem:[#allocation11_spill] sm:$0xff]  ;;  %v6289_v1 = vld [vmem:[#allocation17_spill] sm:$0xff]  ;;  %v6290_v39 = vld [vmem:[#allocation18_spill] sm:$0xff] }
 0x154   : > { %1884 = vst.msk [vmem:[%s3185_s25 + $0x2d8] sm:$0xff] %vm1280_vm0, %v1756_v13  ;;  %1885 = vst.msk [vmem:[%s3185_s25 + $0x2e0] sm:$0xff] %vm1280_vm0, %v1757_v54  ;;  %v1759_v23 = vadd.f32 %v1631_v0, %v1503_v20  ;;  %v1506_v40 = vmul.f32 %v6282_v25, %v4392_v17  ;;  %v1634_v58 = vmul.f32 %v6284_v7, %v6283_v22  ;;  %v6303_v15 = vld [vmem:[#allocation27_spill] sm:$0xff]  ;;  %v6304_v41 = vld [vmem:[#allocation28_spill] sm:$0xff] }
 0x155   : > { %v1507_v33 = vmul.f32 %v6286_v18, %v6285_v3  ;;  %1886 = vst.msk [vmem:[%s3185_s25 + $0x2e8] sm:$0xff] %vm1280_vm0, %v1758_v2  ;;  %v1760_v50 = vadd.f32 %v1632_v14, %v1504_v45  ;;  %v1761_v5 = vadd.f32 %v1633_v60, %v1505_v27  ;;  %v1635_v24 = vmul.f32 %v6288_v46, %v6287_v16  ;;  %v6305_v8 = vld [vmem:[#allocation33_spill] sm:$0xff]  ;;  %v6306_v34 = vld [vmem:[#allocation34_spill] sm:$0xff]  ;;  %v6307_v12 = vld [vmem:[#allocation31_spill] sm:$0xff] }
 0x156   : > { %v1508_v19 = vmul.f32 %v6290_v39, %v6289_v1  ;;  %1887 = vst.msk [vmem:[%s3185_s25 + $0x2f0] sm:$0xff] %vm1280_vm0, %v1759_v23  ;;  %v1762_v17 = vadd.f32 %v1634_v58, %v1506_v40  ;;  %v1636_v31 = vmul.f32 %v6292_v6, %v6291_v10  ;;  %v1509_v26 = vmul.f32 %v6294_v29, %v6293_v52  ;;  %v6308_v36 = vld [vmem:[#allocation32_spill] sm:$0xff]  ;;  %v6309_v38 = vld [vmem:[#allocation37_spill] sm:$0xff]  ;;  %v6310_v57 = vld [vmem:[#allocation38_spill] sm:$0xff] }
 0x157   : > { %v1637_v59 = vmul.f32 %v6296_v53, %v6295_v47  ;;  %1888 = vst.msk [vmem:[%s3185_s25 + $0x2f8] sm:$0xff] %vm1280_vm0, %v1760_v50  ;;  %1889 = vst.msk [vmem:[%s3185_s25 + $0x300] sm:$0xff] %vm1280_vm0, %v1761_v5  ;;  %v1763_v32 = vadd.f32 %v1635_v24, %v1507_v33  ;;  %v1510_v30 = vmul.f32 %v6298_v9, %v6297_v21  ;;  %v6311_v20 = vld [vmem:[#allocation35_spill] sm:$0xff]  ;;  %v6312_v13 = vld [vmem:[#allocation36_spill] sm:$0xff] }
 0x158   : > { %v1638_v28 = vmul.f32 %v6300_v4, %v6299_v55  ;;  %v1511_v35 = vmul.f32 %v6302_v56, %v6301_v43  ;;  %1890 = vst.msk [vmem:[%s3185_s25 + $0x308] sm:$0xff] %vm1280_vm0, %v1762_v17  ;;  %v1764_v62 = vadd.f32 %v1636_v31, %v1508_v19  ;;  %v1639_v11 = vmul.f32 %v6304_v41, %v6303_v15  ;;  %v6313_v45 = vld [vmem:[#allocation41_spill] sm:$0xff]  ;;  %v6314_v2 = vld [vmem:[#allocation42_spill] sm:$0xff]  ;;  %v6315_v27 = vld [vmem:[#allocation39_spill] sm:$0xff] }
 0x159   : > { %v1765_v44 = vadd.f32 %v1637_v59, %v1509_v26  ;;  %v1512_v42 = vmul.f32 %v6306_v34, %v6305_v8  ;;  %1891 = vst.msk [vmem:[%s3185_s25 + $0x310] sm:$0xff] %vm1280_vm0, %v1763_v32  ;;  %v1640_v63 = vmul.f32 %v6308_v36, %v6307_v12  ;;  %v1513_v49 = vmul.f32 %v6310_v57, %v6309_v38  ;;  %v6316_v60 = vld [vmem:[#allocation40_spill] sm:$0xff]  ;;  %v6317_v25 = vld [vmem:[#allocation45_spill] sm:$0xff]  ;;  %v6318_v40 = vld [vmem:[#allocation46_spill] sm:$0xff] }
 0x15a   : > { %v1766_v48 = vadd.f32 %v1638_v28, %v1510_v30  ;;  %v1641_v54 = vmul.f32 %v6312_v13, %v6311_v20  ;;  %1892 = vst.msk [vmem:[%s3185_s25 + $0x318] sm:$0xff] %vm1280_vm0, %v1764_v62  ;;  %v1767_v0 = vadd.f32 %v1639_v11, %v1511_v35  ;;  %v1514_v14 = vmul.f32 %v6314_v2, %v6313_v45  ;;  %v6319_v3 = vld [vmem:[#allocation43_spill] sm:$0xff]  ;;  %v6320_v18 = vld [vmem:[#allocation44_spill] sm:$0xff]  ;;  %v6321_v50 = vld [vmem:[#allocation49_spill] sm:$0xff] }
 0x15b   : > { %1893 = vst.msk [vmem:[%s3185_s25 + $0x320] sm:$0xff] %vm1280_vm0, %v1765_v44  ;;  %v1642_v23 = vmul.f32 %v6316_v60, %v6315_v27  ;;  %v1515_v22 = vmul.f32 %v6318_v40, %v6317_v25  ;;  %v1768_v7 = vadd.f32 %v1640_v63, %v1512_v42  ;;  %v1643_v33 = vmul.f32 %v6320_v18, %v6319_v3  ;;  %v6322_v5 = vld [vmem:[#allocation50_spill] sm:$0xff]  ;;  %v6323_v24 = vld [vmem:[#allocation47_spill] sm:$0xff]  ;;  %v6324_v1 = vld [vmem:[#allocation48_spill] sm:$0xff] }
 0x15c   : > { %1894 = vst.msk [vmem:[%s3185_s25 + $0x328] sm:$0xff] %vm1280_vm0, %v1766_v48  ;;  %v1769_v58 = vadd.f32 %v1641_v54, %v1513_v49  ;;  %v1516_v16 = vmul.f32 %v6322_v5, %v6321_v50  ;;  %1895 = vst.msk [vmem:[%s3185_s25 + $0x330] sm:$0xff] %vm1280_vm0, %v1767_v0  ;;  %v1644_v39 = vmul.f32 %v6324_v1, %v6323_v24  ;;  %v6325_v19 = vld [vmem:[#allocation53_spill] sm:$0xff]  ;;  %v6326_v17 = vld [vmem:[#allocation54_spill] sm:$0xff] }
 0x15d   : > { %v1770_v46 = vadd.f32 %v1642_v23, %v1514_v14  ;;  %v1517_v10 = vmul.f32 %v6326_v17, %v6325_v19  ;;  %v6327_v6 = vld [vmem:[#allocation51_spill] sm:$0xff]  ;;  %v6328_v31 = vld [vmem:[#allocation52_spill] sm:$0xff]  ;;  %1896 = vst.msk [vmem:[%s3185_s25 + $0x338] sm:$0xff] %vm1280_vm0, %v1768_v7  ;;  %v1771_v29 = vadd.f32 %v1643_v33, %v1515_v22  ;;  %v6329_v26 = vld [vmem:[#allocation57_spill] sm:$0xff] }
 0x15e   : > { %v1645_v52 = vmul.f32 %v6328_v31, %v6327_v6  ;;  %1897 = vst.msk [vmem:[%s3185_s25 + $0x340] sm:$0xff] %vm1280_vm0, %v1769_v58  ;;  %v6330_v47 = vld [vmem:[#allocation58_spill] sm:$0xff]  ;;  %v6331_v59 = vld [vmem:[#allocation55_spill] sm:$0xff]  ;;  %v6332_v32 = vld [vmem:[#allocation56_spill] sm:$0xff]  ;;  %v1772_v4 = vadd.f32 %v1644_v39, %v1516_v16 }
 0x15f   : > { %v1518_v53 = vmul.f32 %v6330_v47, %v6329_v26  ;;  %v1646_v21 = vmul.f32 %v6332_v32, %v6331_v59  ;;  %v6333_v9 = vld [vmem:[#allocation61_spill] sm:$0xff]  ;;  %v6334_v30 = vld [vmem:[#allocation62_spill] sm:$0xff]  ;;  %1898 = vst.msk [vmem:[%s3185_s25 + $0x348] sm:$0xff] %vm1280_vm0, %v1770_v46  ;;  %v6335_v43 = vld [vmem:[#allocation59_spill] sm:$0xff] }
 0x160   : > { %v1519_v55 = vmul.f32 %v6334_v30, %v6333_v9  ;;  %v1773_v28 = vadd.f32 %v1645_v52, %v1517_v10  ;;  %v6336_v56 = vld [vmem:[#allocation60_spill] sm:$0xff]  ;;  %v6337_v62 = vld [vmem:[#allocation65_spill] sm:$0xff]  ;;  %v6338_v44 = vld [vmem:[#allocation66_spill] sm:$0xff]  ;;  %1899 = vst.msk [vmem:[%s3185_s25 + $0x350] sm:$0xff] %vm1280_vm0, %v1771_v29 }
 0x161   : > { %v1647_v35 = vmul.f32 %v6336_v56, %v6335_v43  ;;  %v1520_v15 = vmul.f32 %v6338_v44, %v6337_v62  ;;  %v1774_v41 = vadd.f32 %v1646_v21, %v1518_v53  ;;  %v6339_v11 = vld [vmem:[#allocation63_spill] sm:$0xff]  ;;  %v6340_v8 = vld [vmem:[#allocation64_spill] sm:$0xff]  ;;  %v6341_v42 = vld [vmem:[#allocation69_spill] sm:$0xff]  ;;  %1900 = vst.msk [vmem:[%s3185_s25 + $0x358] sm:$0xff] %vm1280_vm0, %v1772_v4 }
 0x162   : > { %v1648_v34 = vmul.f32 %v6340_v8, %v6339_v11  ;;  %v6342_v48 = vld [vmem:[#allocation70_spill] sm:$0xff]  ;;  %v6343_v36 = vld [vmem:[#allocation67_spill] sm:$0xff]  ;;  %v6344_v63 = vld [vmem:[#allocation68_spill] sm:$0xff]  ;;  %1901 = vst.msk [vmem:[%s3185_s25 + $0x360] sm:$0xff] %vm1280_vm0, %v1773_v28 }
 0x163   : > { %v1521_v12 = vmul.f32 %v6342_v48, %v6341_v42  ;;  %v1649_v38 = vmul.f32 %v6344_v63, %v6343_v36  ;;  %v1775_v57 = vadd.f32 %v1647_v35, %v1519_v55  ;;  %v6345_v49 = vld [vmem:[#allocation73_spill] sm:$0xff]  ;;  %v6346_v20 = vld [vmem:[#allocation74_spill] sm:$0xff]  ;;  %v6347_v54 = vld [vmem:[#allocation71_spill] sm:$0xff]  ;;  %1902 = vst.msk [vmem:[%s3185_s25 + $0x368] sm:$0xff] %vm1280_vm0, %v1774_v41 }
 0x164   : > { %v1522_v13 = vmul.f32 %v6346_v20, %v6345_v49  ;;  %v6348_v0 = vld [vmem:[#allocation72_spill] sm:$0xff]  ;;  %v6349_v2 = vld [vmem:[#allocation77_spill] sm:$0xff]  ;;  %v6350_v14 = vld [vmem:[#allocation78_spill] sm:$0xff]  ;;  %v1776_v60 = vadd.f32 %v1648_v34, %v1520_v15 }
 0x165   : > { %v1650_v45 = vmul.f32 %v6348_v0, %v6347_v54  ;;  %v1523_v27 = vmul.f32 %v6350_v14, %v6349_v2  ;;  %v1777_v23 = vadd.f32 %v1649_v38, %v1521_v12  ;;  %v6351_v25 = vld [vmem:[#allocation75_spill] sm:$0xff]  ;;  %v6352_v40 = vld [vmem:[#allocation76_spill] sm:$0xff]  ;;  %v6353_v7 = vld [vmem:[#allocation81_spill] sm:$0xff]  ;;  %1903 = vst.msk [vmem:[%s3185_s25 + $0x370] sm:$0xff] %vm1280_vm0, %v1775_v57 }
 0x166   : > { %v1651_v22 = vmul.f32 %v6352_v40, %v6351_v25  ;;  %v6354_v58 = vld [vmem:[#allocation82_spill] sm:$0xff]  ;;  %v6355_v33 = vld [vmem:[#allocation79_spill] sm:$0xff]  ;;  %v6356_v50 = vld [vmem:[#allocation80_spill] sm:$0xff]  ;;  %1904 = vst.msk [vmem:[%s3185_s25 + $0x378] sm:$0xff] %vm1280_vm0, %v1776_v60 }
 0x167   : > { %v1524_v3 = vmul.f32 %v6354_v58, %v6353_v7  ;;  %v1778_v18 = vadd.f32 %v1650_v45, %v1522_v13  ;;  %v1652_v5 = vmul.f32 %v6356_v50, %v6355_v33  ;;  %v6357_v16 = vld [vmem:[#allocation83_spill] sm:$0xff]  ;;  %v6358_v46 = vld [vmem:[#allocation85_spill] sm:$0xff]  ;;  %v6359_v1 = vld [vmem:[#allocation86_spill] sm:$0xff]  ;;  %1905 = vst.msk [vmem:[%s3185_s25 + $0x380] sm:$0xff] %vm1280_vm0, %v1777_v23 }
 0x168   : > { %v1525_v24 = vmul.f32 %v6358_v46, %v6357_v16  ;;  %v6360_v39 = vld [vmem:[#allocation84_spill] sm:$0xff]  ;;  %v1779_v17 = vadd.f32 %v1651_v22, %v1523_v27  ;;  %v6361_v10 = vld [vmem:[#allocation87_spill] sm:$0xff]  ;;  %v6362_v6 = vld [vmem:[#allocation90_spill] sm:$0xff] }
 0x169   : > { %v1653_v19 = vmul.f32 %v6360_v39, %v6359_v1  ;;  %v1526_v31 = vmul.f32 %v6362_v6, %v6361_v10  ;;  %v6363_v52 = vld [vmem:[#allocation88_spill] sm:$0xff]  ;;  %v6364_v29 = vld [vmem:[#allocation89_spill] sm:$0xff]  ;;  %v6365_v47 = vld [vmem:[#allocation91_spill] sm:$0xff]  ;;  %1906 = vst.msk [vmem:[%s3185_s25 + $0x388] sm:$0xff] %vm1280_vm0, %v1778_v18  ;;  %v1780_v32 = vadd.f32 %v1652_v5, %v1524_v3 }
 0x16a   : > { %v1654_v26 = vmul.f32 %v6364_v29, %v6363_v52  ;;  %v6366_v53 = vld [vmem:[#allocation94_spill] sm:$0xff]  ;;  %v6367_v9 = vld [vmem:[#allocation92_spill] sm:$0xff]  ;;  %v6368_v30 = vld [vmem:[#allocation93_spill] sm:$0xff]  ;;  %1907 = vst.msk [vmem:[%s3185_s25 + $0x390] sm:$0xff] %vm1280_vm0, %v1779_v17 }
 0x16b   : > { %v1527_v59 = vmul.f32 %v6366_v53, %v6365_v47  ;;  %v1781_v21 = vadd.f32 %v1653_v19, %v1525_v24  ;;  %v1655_v55 = vmul.f32 %v6368_v30, %v6367_v9  ;;  %v6369_v4 = vld [vmem:[#allocation95_spill] sm:$0xff]  ;;  %v6370_v28 = vld [vmem:[#allocation97_spill] sm:$0xff]  ;;  %v6371_v35 = vld [vmem:[#allocation96_spill] sm:$0xff]  ;;  %1908 = vst.msk [vmem:[%s3185_s25 + $0x398] sm:$0xff] %vm1280_vm0, %v1780_v32  ;;  %v1536_v53 = vmul.f32 %v5309_v37, %v5282_v61 }
 0x16c   : > { %v1528_v43 = vmul.f32 %v6370_v28, %v6369_v4  ;;  %v1782_v56 = vadd.f32 %v1654_v26, %v1526_v31  ;;  %v6372_v62 = vld [vmem:[#allocation99_spill] sm:$0xff]  ;;  %v6373_v15 = vld [vmem:[#allocation98_spill] sm:$0xff]  ;;  %v6374_v41 = vld [vmem:[#allocation101_spill] sm:$0xff] }
 0x16d   : > { %v1656_v44 = vmul.f32 %v6372_v62, %v6371_v35  ;;  %v1529_v11 = vmul.f32 %v6374_v41, %v6373_v15  ;;  %v6375_v8 = vld [vmem:[#allocation100_spill] sm:$0xff]  ;;  %v6376_v34 = vld [vmem:[#allocation103_spill] sm:$0xff]  ;;  %1909 = vst.msk [vmem:[%s3185_s25 + $0x3a0] sm:$0xff] %vm1280_vm0, %v1781_v21  ;;  %v1783_v48 = vadd.f32 %v1655_v55, %v1527_v59  ;;  %v6377_v12 = vld [vmem:[#allocation102_spill] sm:$0xff] }
 0x16e   : > { %v1657_v42 = vmul.f32 %v6376_v34, %v6375_v8  ;;  %v6378_v36 = vld [vmem:[#allocation2_spill] sm:$0xff]  ;;  %v6379_v38 = vld [vmem:[#allocation104_spill] sm:$0xff]  ;;  %v6380_v57 = vld [vmem:[#allocation105_spill] sm:$0xff]  ;;  %1910 = vst.msk [vmem:[%s3185_s25 + $0x3a8] sm:$0xff] %vm1280_vm0, %v1782_v56 }
 0x16f   : > { %v1530_v63 = vmul.f32 %v6378_v36, %v6377_v12  ;;  %v1658_v49 = vmul.f32 %v6380_v57, %v6379_v38  ;;  %v6381_v20 = vld [vmem:[#allocation4_spill] sm:$0xff]  ;;  %v1784_v54 = vadd.f32 %v1656_v44, %v1528_v43  ;;  %v6382_v45 = vld [vmem:[#allocation5_spill] sm:$0xff]  ;;  %v6383_v2 = vld [vmem:[#allocation3_spill] sm:$0xff]  ;;  %1911 = vst.msk [vmem:[%s3185_s25 + $0x3b0] sm:$0xff] %vm1280_vm0, %v1783_v48 }
 0x170   : > { %v1531_v13 = vmul.f32 %v6381_v20, %v5130_v51  ;;  %v1785_v0 = vadd.f32 %v1657_v42, %v1529_v11  ;;  %v1659_v14 = vmul.f32 %v6383_v2, %v6382_v45  ;;  %v6384_v27 = vld [vmem:[#allocation6_spill] sm:$0xff]  ;;  %v6385_v60 = vld [vmem:[#allocation107_spill] sm:$0xff]  ;;  %v6386_v40 = vld [vmem:[#allocation9_spill] sm:$0xff] }
 0x171   : > { %v1532_v23 = vmul.f32 %v6385_v60, %v6384_v27  ;;  %v1786_v25 = vadd.f32 %v1658_v49, %v1530_v63  ;;  %v6387_v22 = vld [vmem:[#allocation106_spill] sm:$0xff]  ;;  %v6388_v58 = vld [vmem:[#allocation108_spill] sm:$0xff]  ;;  %v6389_v51 = vld [vmem:[#allocation111_spill] sm:$0xff]  ;;  %1912 = vst.msk [vmem:[%s3185_s25 + $0x3b8] sm:$0xff] %vm1280_vm0, %v1784_v54 }
 0x172   : > { %v1660_v7 = vmul.f32 %v6387_v22, %v6386_v40  ;;  %v1533_v3 = vmul.f32 %v6389_v51, %v6388_v58  ;;  %v6390_v18 = vld [vmem:[#allocation109_spill] sm:$0xff]  ;;  %v6391_v33 = vld [vmem:[#allocation110_spill] sm:$0xff]  ;;  %1913 = vst.msk [vmem:[%s3185_s25 + $0x3c0] sm:$0xff] %vm1280_vm0, %v1785_v0  ;;  %v1787_v5 = vadd.f32 %v1659_v14, %v1531_v13  ;;  %v6392_v16 = vld [vmem:[#allocation112_spill] sm:$0xff] }
 0x173   : > { %v1661_v50 = vmul.f32 %v6391_v33, %v6390_v18  ;;  %v6393_v46 = vld [vmem:[#allocation115_spill] sm:$0xff]  ;;  %v6394_v1 = vld [vmem:[#allocation113_spill] sm:$0xff]  ;;  %v6395_v39 = vld [vmem:[#allocation114_spill] sm:$0xff]  ;;  %1914 = vst.msk [vmem:[%s3185_s25 + $0x3c8] sm:$0xff] %vm1280_vm0, %v1786_v25 }
 0x174   : > { %v1534_v24 = vmul.f32 %v6393_v46, %v6392_v16  ;;  %v1662_v19 = vmul.f32 %v6395_v39, %v6394_v1  ;;  %v6396_v17 = vld [vmem:[#allocation116_spill] sm:$0xff]  ;;  %v6397_v10 = vld [vmem:[#allocation119_spill] sm:$0xff]  ;;  %v1788_v31 = vadd.f32 %v1660_v7, %v1532_v23  ;;  %v6398_v29 = vld [vmem:[#allocation117_spill] sm:$0xff]  ;;  %1915 = vst.msk [vmem:[%s3185_s25 + $0x3d0] sm:$0xff] %vm1280_vm0, %v1787_v5 }
 0x175   : > { %v1535_v6 = vmul.f32 %v6397_v10, %v6396_v17  ;;  %v1789_v52 = vadd.f32 %v1661_v50, %v1533_v3  ;;  %v6399_v26 = vld [vmem:[#allocation118_spill] sm:$0xff]  ;;  %v6400_v32 = vld [vmem:[#allocation120_spill] sm:$0xff]  ;;  %v6401_v21 = vld [vmem:[#allocation121_spill] sm:$0xff] }
 0x176   : > { %v1663_v47 = vmul.f32 %v6399_v26, %v6398_v29  ;;  %v1790_v59 = vadd.f32 %v1662_v19, %v1534_v24  ;;  %v1664_v9 = vmul.f32 %v6401_v21, %v6400_v32  ;;  %1916 = vst.msk [vmem:[%s3185_s25 + $0x3d8] sm:$0xff] %vm1280_vm0, %v1788_v31 }
 0x177   : > { %1917 = vst.msk [vmem:[%s3185_s25 + $0x3e0] sm:$0xff] %vm1280_vm0, %v1789_v52 }
 0x178   : > { %v1791_v30 = vadd.f32 %v1663_v47, %v1535_v6  ;;  %1918 = vst.msk [vmem:[%s3185_s25 + $0x3e8] sm:$0xff] %vm1280_vm0, %v1790_v59  ;;  %v1792_v55 = vadd.f32 %v1664_v9, %v1536_v53 }
 0x17a   : > { %1919 = vst.msk [vmem:[%s3185_s25 + $0x3f0] sm:$0xff] %vm1280_vm0, %v1791_v30  ;;  %1920 = vst.msk [vmem:[%s3185_s25 + $0x3f8] sm:$0xff] %vm1280_vm0, %v1792_v55 }
 0x17b PF: > { %s16_s20 = sadd.s32 1, %s2342_s20   ;;  %s6402_s18 = smov %s2338_s19 }
 0x17c   : > { %p13_p5 = scmp.ge.s32.totalorder %s16_s20, 6   ;;  %s6403_s19 = smov %s6405_s21 }
 0x17e   :  { %15 = sbr.rel (!%p13_p5) target bundleno = 2 (0x2), region = 87 }

// kernel: custom-call
= control target key start
LH: loop header
LB: loop body
LE: loop exit
PB: predicated region body
PF: predicated region fallthrough
CT: control target
= control target key end

     0   :  { %s6_s0 = inlined_call_operand.vmem [shape: f32[8,2,8,8,8], index: 0, kind: output, shape index: {}]  }

// kernel: closed_call.10
= control target key start
LH: loop header
LB: loop body
LE: loop exit
PB: predicated region body
PF: predicated region fallthrough
CT: control target
= control target key end

     0   :  { %s869_s18 = smov 0   ;;  %s871_s19 = smov 0   ;;  %s930_s0 = inlined_call_operand.vmem [shape: f32[2,16], index: 0, kind: input, shape index: {}]   ;;  %s931_s1 = inlined_call_operand.vmem [shape: f32[2,16,256], index: 1, kind: input, shape index: {}]   ;;  %s932_s2 = inlined_call_operand.vmem [shape: f32[2,16,256], index: 2, kind: input, shape index: {}]   ;;  %s933_s3 = inlined_call_operand.vmem [shape: f32[2,16,256], index: 3, kind: input, shape index: {}]   ;;  %s934_s4 = inlined_call_operand.vmem [shape: f32[2,16,256], index: 4, kind: input, shape index: {}]   ;;  %s935_s5 = inlined_call_operand.vmem [shape: f32[2,2,256], index: 5, kind: output, shape index: {}]  }
   0x1   :  { %s873_s20 = smov 0  }
   0x2 LB: > { %s27_s21 = sadd.s32 1, %s832_s19  ;;  %p749_p0 = scmp.ge.s32.totalorder %s836_s20, 1  ;;  %s836_s20 = sphi %s873_s20, %s15_s20   ;;  %s832_s19 = sphi %s871_s19, %s937_s19   ;;  %s828_s18 = sphi %s869_s18, %s936_s18  }
   0x3   : > { %p29_p1 = scmp.ge.s32.totalorder %s27_s21, 2  ;;  %p259_p2 = scmp.lt.s32.totalorder %s836_s20, 3 }
   0x5   : > { %s939_s21 = smov (%p29_p1, %s27_s21), 0  ;;  %p260_p3 = pnand %p749_p0, %p259_p2 }
   0x6   : > { %p323_p4 = scmp.lt.s32.totalorder (!%p260_p3), %s828_s18, 1  ;;  %v838_v0 = vmov (!%p260_p3), 0.0  }
   0x7   : > { %263 = sbr.rel (%p260_p3) target bundleno = 296 (0x128), region = 40  ;;  %585 = vmatprep.mubr.f32.mxu0 (!%p260_p3), %v838_v0 }
   0xe   : > { %s941_s18 = smov (!%p323_p4, %s828_s18), 1 }
   0xf   : > { %s764_s22 = sshll.u32 %s941_s18, 5  ;;  %s768_s12 = sshll.u32 %s941_s18, 2 }
  0x10   : > { %s330_s25 = scalar_lea.vmem %s931_s1, %s764_s22  ;;  %s340_s28 = scalar_lea.vmem %s932_s2, %s764_s22 }
  0x11   : > { %s899_s6 = scalar_lea.vmem %s933_s3, %s764_s22  ;;  %s904_s9 = scalar_lea.vmem %s934_s4, %s764_s22  ;;  %v373_v1 = vld [vmem:[%s330_s25 + $0x8] sm:$0xff]  ;;  %v375_v2 = vld [vmem:[%s330_s25 + $0x18] sm:$0xff]  ;;  %v372_v17 = vld [vmem:[%s330_s25] sm:$0xff] }
  0x12   : > { %v377_v3 = vld [vmem:[%s340_s28 + $0x8] sm:$0xff]  ;;  %v379_v4 = vld [vmem:[%s340_s28 + $0x18] sm:$0xff]  ;;  %v389_v7 = vmul.f32 %v373_v1, %v373_v1  ;;  %v391_v8 = vmul.f32 %v375_v2, %v375_v2  ;;  %v417_v10 = vmul.f32 2.0, %v373_v1  ;;  %v419_v16 = vmul.f32 2.0, %v375_v2  ;;  %v374_v22 = vld [vmem:[%s330_s25 + $0x10] sm:$0xff]  ;;  %s370_s15 = scalar_lea.vmem %s935_s5, %s768_s12 }
  0x13   : > { %v381_v5 = vld [vmem:[%s899_s6 + $0x8] sm:$0xff]  ;;  %v383_v6 = vld [vmem:[%s899_s6 + $0x18] sm:$0xff]  ;;  %v393_v9 = vmul.f32 %v377_v3, %v377_v3  ;;  %v395_v13 = vmul.f32 %v379_v4, %v379_v4  ;;  %v376_v23 = vld [vmem:[%s340_s28] sm:$0xff]  ;;  %v388_v32 = vmul.f32 %v372_v17, %v372_v17  ;;  %v390_v33 = vmul.f32 %v374_v22, %v374_v22 }
  0x14   : > { %v385_v11 = vld [vmem:[%s904_s9 + $0x8] sm:$0xff]  ;;  %v387_v12 = vld [vmem:[%s904_s9 + $0x18] sm:$0xff]  ;;  %v401_v14 = vmul.f32 %v381_v5, %v381_v5  ;;  %v403_v15 = vmul.f32 %v383_v6, %v383_v6  ;;  %v421_v21 = vmul.f32 %v417_v10, %v377_v3  ;;  %v378_v24 = vld [vmem:[%s340_s28 + $0x10] sm:$0xff]  ;;  %v423_v26 = vmul.f32 %v419_v16, %v379_v4 }
  0x15   : > { %v397_v18 = vsub.f32 %v389_v7, %v393_v9  ;;  %v409_v19 = vmul.f32 %v385_v11, %v385_v11  ;;  %v411_v20 = vmul.f32 %v387_v12, %v387_v12  ;;  %v399_v25 = vsub.f32 %v391_v8, %v395_v13  ;;  %v380_v29 = vld [vmem:[%s899_s6] sm:$0xff]  ;;  %v382_v30 = vld [vmem:[%s899_s6 + $0x10] sm:$0xff] }
  0x16   : > { %v425_v27 = vmul.f32 2.0, %v381_v5  ;;  %v427_v28 = vmul.f32 2.0, %v383_v6  ;;  %v392_v34 = vmul.f32 %v376_v23, %v376_v23  ;;  %v384_v38 = vld [vmem:[%s904_s9] sm:$0xff]  ;;  %v386_v39 = vld [vmem:[%s904_s9 + $0x10] sm:$0xff]  ;;  %v394_v40 = vmul.f32 %v378_v24, %v378_v24 }
  0x17   : > { %v405_v31 = vadd.f32 %v401_v14, %v397_v18  ;;  %v407_v35 = vadd.f32 %v403_v15, %v399_v25  ;;  %v400_v43 = vmul.f32 %v380_v29, %v380_v29  ;;  %v402_v44 = vmul.f32 %v382_v30, %v382_v30 }
  0x18   : > { %v429_v36 = vmul.f32 %v425_v27, %v385_v11  ;;  %v431_v37 = vmul.f32 %v427_v28, %v387_v12  ;;  %v396_v42 = vsub.f32 %v388_v32, %v392_v34  ;;  %v398_v48 = vsub.f32 %v390_v33, %v394_v40 }
  0x19   : > { %v413_v41 = vsub.f32 %v405_v31, %v409_v19  ;;  %v415_v45 = vsub.f32 %v407_v35, %v411_v20  ;;  %v408_v51 = vmul.f32 %v384_v38, %v384_v38  ;;  %v410_v52 = vmul.f32 %v386_v39, %v386_v39 }
  0x1a   : > { %v433_v46 = vadd.f32 %v429_v36, %v421_v21  ;;  %v435_v47 = vadd.f32 %v431_v37, %v423_v26  ;;  %v404_v50 = vadd.f32 %v400_v43, %v396_v42  ;;  %v406_v56 = vadd.f32 %v402_v44, %v398_v48 }
  0x1b   : > { %v437_v49 = vmul.f32 %v413_v41, %v413_v41  ;;  %v439_v53 = vmul.f32 %v415_v45, %v415_v45  ;;  %v416_v57 = vmul.f32 2.0, %v372_v17  ;;  %v418_v58 = vmul.f32 2.0, %v374_v22 }
  0x1c   : > { %v441_v54 = vmul.f32 %v433_v46, %v433_v46  ;;  %v443_v55 = vmul.f32 %v435_v47, %v435_v47  ;;  %v424_v59 = vmul.f32 2.0, %v380_v29  ;;  %v412_v62 = vsub.f32 %v404_v50, %v408_v51 }
  0x1d   : > { %v426_v63 = vmul.f32 2.0, %v382_v30  ;;  %v420_v0 = vmul.f32 %v416_v57, %v376_v23  ;;  %v414_v2 = vsub.f32 %v406_v56, %v410_v52  ;;  %v422_v3 = vmul.f32 %v418_v58, %v378_v24 }
  0x1e   : > { %v445_v60 = vadd.f32 %v441_v54, %v437_v49  ;;  %v447_v61 = vadd.f32 %v443_v55, %v439_v53  ;;  %v428_v1 = vmul.f32 %v424_v59, %v384_v38  ;;  %v436_v6 = vmul.f32 %v412_v62, %v412_v62 }
  0x1f   : > { %v430_v4 = vmul.f32 %v426_v63, %v386_v39  ;;  %v438_v8 = vmul.f32 %v414_v2, %v414_v2 }
  0x20   : > { %798 = vrsqrt.f32 %v445_v60  ;;  %v432_v5 = vadd.f32 %v428_v1, %v420_v0  ;;  %vm457_vm0 = vcmp.eq.f32.partialorder %v445_v60, inf  ;;  %v460_v14 = vand.u32 2147483648, %v445_v60 }
  0x21   : > { %800 = vrsqrt.f32 %v447_v61  ;;  %v434_v7 = vadd.f32 %v430_v4, %v422_v3  ;;  %vm459_vm1 = vcmp.eq.f32.partialorder %v445_v60, 0.0  ;;  %vm471_vm2 = vcmp.eq.f32.partialorder %v447_v61, inf  ;;  %v516_v3 = vld [vmem:[%s930_s0] sm:$0x3] }
  0x22   : > { %v440_v9 = vmul.f32 %v432_v5, %v432_v5  ;;  %v474_v17 = vand.u32 2147483648, %v447_v61  ;;  %vm473_vm3 = vcmp.eq.f32.partialorder %v447_v61, 0.0 }
  0x23   : > { %v442_v10 = vmul.f32 %v434_v7, %v434_v7 }
  0x24   : > { %v444_v11 = vadd.f32 %v440_v9, %v436_v6 }
  0x25   : > { %v446_v12 = vadd.f32 %v442_v10, %v438_v8 }
  0x26   : > { %802 = vrsqrt.f32 %v444_v11  ;;  %vm450_vm4 = vcmp.eq.f32.partialorder %v444_v11, inf  ;;  %v453_v32 = vand.u32 2147483648, %v444_v11  ;;  %vm452_vm5 = vcmp.eq.f32.partialorder %v444_v11, 0.0 }
  0x27   : > { %804 = vrsqrt.f32 %v446_v12  ;;  %vm464_vm6 = vcmp.eq.f32.partialorder %v446_v12, inf  ;;  %v467_v33 = vand.u32 2147483648, %v446_v12  ;;  %vm466_vm7 = vcmp.eq.f32.partialorder %v446_v12, 0.0 }
  0x2a   : > { %v799_v13 = vpop.eup %798 }
  0x2b   : > { %v801_v15 = vpop.eup %800  ;;  %v456_v16 = vmul.f32 %v799_v13, %v445_v60 }
  0x2c   : > { %v470_v18 = vmul.f32 %v801_v15, %v447_v61 }
  0x2d   : > { %v458_v19 = vsel %vm457_vm0, %v445_v60, %v456_v16  ;;  %vm517_vm0 = vcmask 130048  }
  0x2e   : > { %v461_v20 = vsel %vm459_vm1, %v460_v14, %v458_v19  ;;  %v472_v21 = vsel %vm471_vm2, %v447_v61, %v470_v18 }
  0x2f   : > { %v475_v22 = vsel %vm473_vm3, %v474_v17, %v472_v21  ;;  %v477_v23 = vadd.f32 %v461_v20, %v413_v41 }
  0x30   : > { %v479_v24 = vadd.f32 %v475_v22, %v415_v45  ;;  %v803_v26 = vpop.eup %802 }
  0x31   : > { %v481_v25 = vmul.f32 0.5, %v477_v23  ;;  %v449_v29 = vmul.f32 %v803_v26, %v444_v11  ;;  %v805_v30 = vpop.eup %804 }
  0x32   : > { %v483_v27 = vmul.f32 0.5, %v479_v24  ;;  %v463_v35 = vmul.f32 %v805_v30, %v446_v12 }
  0x33   : > { %v485_v28 = vmax.f32 %v481_v25, 0.0  ;;  %v451_v34 = vsel %vm450_vm4, %v444_v11, %v449_v29 }
  0x34   : > { %v487_v31 = vmax.f32 %v483_v27, 0.0  ;;  %v454_v36 = vsel %vm452_vm5, %v453_v32, %v451_v34  ;;  %v465_v37 = vsel %vm464_vm6, %v446_v12, %v463_v35 }
  0x35   : > { %806 = vrsqrt.f32 %v485_v28  ;;  %v476_v38 = vadd.f32 %v454_v36, %v412_v62  ;;  %v468_v39 = vsel %vm466_vm7, %v467_v33, %v465_v37  ;;  %vm497_vm8 = vcmp.eq.f32.partialorder %v485_v28, inf }
  0x36   : > { %808 = vrsqrt.f32 %v487_v31  ;;  %v478_v40 = vadd.f32 %v468_v39, %v414_v2  ;;  %v500_v45 = vand.u32 2147483648, %v485_v28  ;;  %vm499_vm9 = vcmp.eq.f32.partialorder %v485_v28, 0.0 }
  0x37   : > { %v480_v41 = vmul.f32 0.5, %v476_v38  ;;  %vm511_vm10 = vcmp.eq.f32.partialorder %v487_v31, inf  ;;  %v514_v49 = vand.u32 2147483648, %v487_v31  ;;  %vm513_vm11 = vcmp.eq.f32.partialorder %v487_v31, 0.0 }
  0x38   : > { %v482_v42 = vmul.f32 0.5, %v478_v40 }
  0x39   : > { %v484_v43 = vmax.f32 %v480_v41, 0.0 }
  0x3a   : > { %v486_v46 = vmax.f32 %v482_v42, 0.0 }
  0x3b   : > { %810 = vrsqrt.f32 %v484_v43  ;;  %vm490_vm12 = vcmp.eq.f32.partialorder %v484_v43, inf  ;;  %v493_v57 = vand.u32 2147483648, %v484_v43  ;;  %vm492_vm13 = vcmp.eq.f32.partialorder %v484_v43, 0.0 }
  0x3c   : > { %812 = vrsqrt.f32 %v486_v46  ;;  %vm504_vm14 = vcmp.eq.f32.partialorder %v486_v46, inf  ;;  %v507_v60 = vand.u32 2147483648, %v486_v46  ;;  %vm506_vm15 = vcmp.eq.f32.partialorder %v486_v46, 0.0 }
  0x3f   : > { %v807_v44 = vpop.eup %806 }
  0x40   : > { %v809_v47 = vpop.eup %808  ;;  %v496_v48 = vmul.f32 %v807_v44, %v485_v28 }
  0x41   : > { %v510_v50 = vmul.f32 %v809_v47, %v487_v31 }
  0x42   : > { %v498_v51 = vsel %vm497_vm8, %v485_v28, %v496_v48 }
  0x43   : > { %v501_v52 = vsel %vm499_vm9, %v500_v45, %v498_v51  ;;  %v512_v53 = vsel %vm511_vm10, %v487_v31, %v510_v50 }
  0x44   : > { %v515_v54 = vsel %vm513_vm11, %v514_v49, %v512_v53 }
  0x45   : > { %v769_v55 = vpack.c.bf16 %v515_v54, %v501_v52  ;;  %v811_v56 = vpop.eup %810 }
  0x46   : > { %v489_v58 = vmul.f32 %v811_v56, %v484_v43  ;;  %v813_v59 = vpop.eup %812 }
  0x47   : > { %770 = vmatprep.subr.bf16.mxu0 %v769_v55  ;;  %v503_v62 = vmul.f32 %v813_v59, %v486_v46 }
  0x48   : > { %v491_v61 = vsel %vm490_vm12, %v484_v43, %v489_v58 }
  0x49   : > { %v494_v63 = vsel %vm492_vm13, %v493_v57, %v491_v61  ;;  %v505_v0 = vsel %vm504_vm14, %v486_v46, %v503_v62 }
  0x4a   : > { %v508_v1 = vsel %vm506_vm15, %v507_v60, %v505_v0 }
  0x4b   : > { %v771_v2 = vpack.c.bf16 %v508_v1, %v494_v63 }
  0x4d   : > { %772 = vmatpush1.bf16.msra.mxu0 %v771_v2 }
  0x50   : > { %760 = vmatmul.mubr.msk.f32.vlgmr.msra.gmra.mrb[0].mxu0 %vm517_vm0, %v516_v3 }
 0x123   : > { %v587_v4 = vpop.f32.mrb[0].mxu0 }
 0x124   : > { %v589_v5 = vpop.f32.mrb[1].mxu0 }
 0x125   : > { %v594_v6 = vcombine.low %v587_v4, %v589_v5 }
 0x127   : > { %761 = vst.sshfl [vmem:[%s370_s15] sm:$0x33 pattern:$0x76325410] %v594_v6 }
 0x128 PF: > { %s15_s20 = sadd.s32 1, %s836_s20   ;;  %s936_s18 = smov %s832_s19 }
 0x129   : > { %p12_p5 = scmp.ge.s32.totalorder %s15_s20, 4   ;;  %s937_s19 = smov %s939_s21 }
 0x12b   :  { %14 = sbr.rel (!%p12_p5) target bundleno = 2 (0x2), region = 79 }

</bundles_post_ra>
